<compile_context>
chip_gen: v5e
topology: v5e:2x2
jax: 0.10.0
libtpu: 0.0.40
codegen_flags: <defaults>
</compile_context>

<pallas_src>
import functools

import jax
import jax.numpy as jnp
from jax.experimental import pallas as pl
from jax.experimental.pallas import tpu as pltpu

_BN_EPS = 1e-5
_LANE = 128  # lane width: channels are padded to a multiple of this


def _round_up(x, m):
    return ((x + m - 1) // m) * m


# --------------------------------------------------------------------------
# In-kernel helpers
# --------------------------------------------------------------------------

def _im2col_matmul(xpad, w_bf16, H, W):
    """3x3 'same' conv as ONE im2col matmul (bf16 operands, f32 accumulation).

    xpad:   (H+2, W+2, Cin_p) value (zero halo already present)
    w_bf16: (9*Cin_p, Cout_p) bf16
    Returns (H*W, Cout_p) f32.

    The 9 shifted taps are concatenated along the lane (channel) axis so the
    MXU sees a single K = 9*Cin_p contraction.  The H-shift is a free
    leading-dim slice; the W-shift is a sublane shift; the lane concat is
    vreg copies (Cin_p is a multiple of 128).  cols is cast to bf16 right
    before the dot -> native MXU rate, f32 accumulator.
    """
    cin_p = xpad.shape[-1]
    taps = [xpad[dy:dy + H, dx:dx + W, :]
            for dy in range(3) for dx in range(3)]
    cols = jnp.concatenate(taps, axis=-1)            # (H, W, 9*Cin_p)
    cols = cols.reshape(H * W, 9 * cin_p).astype(jnp.bfloat16)
    return jnp.dot(cols, w_bf16, preferred_element_type=jnp.float32)


def _bn_scale_shift(sum_v, ssq_v, gamma, beta, count):
    """Training-mode BatchNorm affine (scale, shift) from global sum / sumsq.

    Biased variance (divide by count), eps = 1e-5 — matches PyTorch training
    behaviour.  All operands are (1, C): pure VPU/EUP work.
    NOTE: E[x^2]-E[x]^2 in f32 can cancel if |mean| >> std; padded channels
    have sum == ssq == 0 exactly, so var == 0 and scale = gamma*rsqrt(eps)
    (harmless: the corresponding inputs are exactly 0).
    """
    inv_n = 1.0 / count
    mean = sum_v * inv_n
    var = ssq_v * inv_n - mean * mean
    scale = gamma * jax.lax.rsqrt(var + _BN_EPS)
    shift = beta - mean * scale
    return scale, shift


# --------------------------------------------------------------------------
# Kernel bodies
# --------------------------------------------------------------------------

def _conv_stats_kernel(xpad_ref, w_ref, yraw_ref, psum_ref, pssq_ref, *, H, W):
    """Layer 1, pass 1: conv3x3 on the pre-padded input + per-step BN partials.

    Grid is over the batch ("parallel"); each step writes its own (1,1,C)
    partial sum / sumsq block, reduced later in plain JAX.
    """
    acc = _im2col_matmul(xpad_ref[0], w_ref[...], H, W)       # (H*W, Cout_p) f32
    yraw_ref[...] = acc.reshape(yraw_ref.shape).astype(yraw_ref.dtype)
    psum_ref[...] = jnp.sum(acc, axis=0, keepdims=True).reshape(psum_ref.shape)
    pssq_ref[...] = jnp.sum(acc * acc, axis=0, keepdims=True).reshape(pssq_ref.shape)


def _norm_conv_stats_kernel(yraw_ref, sum1_ref, ssq1_ref, g1_ref, b1_ref,
                            w_ref, y2raw_ref, psum2_ref, pssq2_ref, xpad_sc,
                            *, H, W, count):
    """Fused layer boundary: BN1 (from global stats) + ReLU + zero-pad halo
    into VMEM scratch, then conv2 + per-step layer-2 BN partials."""
    c1 = xpad_sc.shape[-1]

    scale, shift = _bn_scale_shift(sum1_ref[...], ssq1_ref[...],
                                   g1_ref[...], b1_ref[...], count)
    y1 = jnp.maximum(yraw_ref[0].astype(jnp.float32) * scale + shift, 0.0)

    # Only the halo border needs zeroing; the interior is fully overwritten
    # every step.  A one-time @pl.when(program_id==0) init would be WRONG
    # under "parallel" megacore sharding (core 1 never runs step 0, and each
    # core has its own private scratch), so re-zero the cheap border per step.
    zrow = jnp.zeros((1, W + 2, c1), jnp.float32)
    xpad_sc[0:1, :, :] = zrow
    xpad_sc[H + 1:H + 2, :, :] = zrow
    zcol = jnp.zeros((H, 1, c1), jnp.float32)
    xpad_sc[1:H + 1, 0:1, :] = zcol
    xpad_sc[1:H + 1, W + 1:W + 2, :] = zcol
    # TODO(synk): (v5e) build conv2's taps directly from y1 with iota-masked W
    #             edges to eliminate this full-tile (sublane-offset) store.
    xpad_sc[1:H + 1, 1:W + 1, :] = y1

    acc = _im2col_matmul(xpad_sc[...], w_ref[...], H, W)      # (H*W, C2) f32
    y2raw_ref[...] = acc.reshape(y2raw_ref.shape).astype(y2raw_ref.dtype)
    psum2_ref[...] = jnp.sum(acc, axis=0, keepdims=True).reshape(psum2_ref.shape)
    pssq2_ref[...] = jnp.sum(acc * acc, axis=0, keepdims=True).reshape(pssq2_ref.shape)


def _norm_relu_kernel(yraw_ref, sum_ref, ssq_ref, g_ref, b_ref, out_ref,
                      *, count, c_out):
    """Layer 2, pass 2: BN2 + ReLU; writes only the true c_out channels
    (un-padding folded into the kernel — narrower store, but saves a full
    padded-tensor XLA pass)."""
    scale, shift = _bn_scale_shift(sum_ref[...], ssq_ref[...],
                                   g_ref[...], b_ref[...], count)
    y = jnp.maximum(yraw_ref[...].astype(jnp.float32) * scale + shift, 0.0)
    out_ref[...] = y[..., :c_out]


# --------------------------------------------------------------------------
# pallas_call wrappers
# --------------------------------------------------------------------------
# VMEM per grid step at these shapes is a few MB, well under the scoped
# defaults (16 MiB v5e / 32 MiB v6e+v7x); raise vmem_limit_bytes only when
# adding larger H tiles.

def _conv_stats_call(x_pad, w, N, H, W, cin_p, cout_p):
    kernel = functools.partial(_conv_stats_kernel, H=H, W=W)
    flops = 2 * N * H * W * 9 * cin_p * cout_p
    bytes_accessed = (x_pad.size * 4 + w.size * 2
                      + N * H * W * cout_p * 2 + 2 * N * cout_p * 4)
    return pl.pallas_call(
        kernel,
        grid=(N,),
        in_specs=[
            pl.BlockSpec((1, H + 2, W + 2, cin_p), lambda n: (n, 0, 0, 0)),
            pl.BlockSpec((9 * cin_p, cout_p), lambda n: (0, 0)),
        ],
        out_specs=[
            pl.BlockSpec((1, H, W, cout_p), lambda n: (n, 0, 0, 0)),
            pl.BlockSpec((1, 1, cout_p), lambda n: (n, 0, 0)),   # partial sum
            pl.BlockSpec((1, 1, cout_p), lambda n: (n, 0, 0)),   # partial sumsq
        ],
        out_shape=[
            jax.ShapeDtypeStruct((N, H, W, cout_p), jnp.bfloat16),
            jax.ShapeDtypeStruct((N, 1, cout_p), jnp.float32),
            jax.ShapeDtypeStruct((N, 1, cout_p), jnp.float32),
        ],
        compiler_params=pltpu.CompilerParams(
            dimension_semantics=("parallel",)),   # no cross-step state
        cost_estimate=pl.CostEstimate(
            flops=flops, transcendentals=0, bytes_accessed=bytes_accessed),
    )(x_pad, w)


def _norm_conv_stats_call(y1_raw, s1, q1, g1, b1, w2, N, H, W, c1, c2, count):
    kernel = functools.partial(_norm_conv_stats_kernel, H=H, W=W, count=count)
    flops = 2 * N * H * W * 9 * c1 * c2
    bytes_accessed = (y1_raw.size * 2 + w2.size * 2 + N * H * W * c2 * 2
                      + 4 * c1 * 4 + 2 * N * c2 * 4)
    return pl.pallas_call(
        kernel,
        grid=(N,),
        in_specs=[
            pl.BlockSpec((1, H, W, c1), lambda n: (n, 0, 0, 0)),
            pl.BlockSpec((1, c1), lambda n: (0, 0)),   # sum1 (reduced)
            pl.BlockSpec((1, c1), lambda n: (0, 0)),   # ssq1 (reduced)
            pl.BlockSpec((1, c1), lambda n: (0, 0)),   # gamma1
            pl.BlockSpec((1, c1), lambda n: (0, 0)),   # beta1
            pl.BlockSpec((9 * c1, c2), lambda n: (0, 0)),
        ],
        out_specs=[
            pl.BlockSpec((1, H, W, c2), lambda n: (n, 0, 0, 0)),
            pl.BlockSpec((1, 1, c2), lambda n: (n, 0, 0)),
            pl.BlockSpec((1, 1, c2), lambda n: (n, 0, 0)),
        ],
        out_shape=[
            jax.ShapeDtypeStruct((N, H, W, c2), jnp.bfloat16),
            jax.ShapeDtypeStruct((N, 1, c2), jnp.float32),
            jax.ShapeDtypeStruct((N, 1, c2), jnp.float32),
        ],
        scratch_shapes=[pltpu.VMEM((H + 2, W + 2, c1), jnp.float32)],
        compiler_params=pltpu.CompilerParams(
            dimension_semantics=("parallel",)),
        cost_estimate=pl.CostEstimate(
            flops=flops, transcendentals=0, bytes_accessed=bytes_accessed),
    )(y1_raw, s1, q1, g1, b1, w2)


def _norm_relu_call(y_raw, s, q, g, b, N, H, W, c, c_out, count):
    kernel = functools.partial(_norm_relu_kernel, count=count, c_out=c_out)
    return pl.pallas_call(
        kernel,
        grid=(N,),
        in_specs=[
            pl.BlockSpec((1, H, W, c), lambda n: (n, 0, 0, 0)),
            pl.BlockSpec((1, c), lambda n: (0, 0)),
            pl.BlockSpec((1, c), lambda n: (0, 0)),
            pl.BlockSpec((1, c), lambda n: (0, 0)),
            pl.BlockSpec((1, c), lambda n: (0, 0)),
        ],
        out_specs=pl.BlockSpec((1, H, W, c_out), lambda n: (n, 0, 0, 0)),
        out_shape=jax.ShapeDtypeStruct((N, H, W, c_out), jnp.float32),
        compiler_params=pltpu.CompilerParams(
            dimension_semantics=("parallel",)),   # stateless -> megacore OK
        cost_estimate=pl.CostEstimate(
            flops=4 * N * H * W * c, transcendentals=0,
            bytes_accessed=N * H * W * (c * 2 + c_out * 4) + 4 * 4 * c),
    )(y_raw, s, q, g, b)


# --------------------------------------------------------------------------
# Layout glue (plain JAX) + forward
# --------------------------------------------------------------------------

def _pad_weight(w_hwio, cin_p, cout_p):
    """(3, 3, Cin, Cout) -> zero-pad channels -> (9*Cin_p, Cout_p) im2col mat."""
    _, _, ci, co = w_hwio.shape
    w = jnp.pad(w_hwio, ((0, 0), (0, 0), (0, cin_p - ci), (0, cout_p - co)))
    return w.reshape(9 * cin_p, cout_p)


def _pad_channels(v, c_p, fill):
    c = v.shape[-1]
    return jnp.pad(v, ((0, 0), (0, c_p - c)), constant_values=fill)


def conv_block_forward(x_nchw, params):
    """Forward pass matching the PyTorch conv_block. Input/output are NCHW."""
    N, c_in, H, W = x_nchw.shape
    c_out = params["g1"].shape[-1]
    cin_p = max(_round_up(c_in, _LANE), _LANE)
    cout_p = max(_round_up(c_out, _LANE), _LANE)

    # Layout glue: NCHW -> NHWC, zero spatial halo, lane-pad channels.
    x = jnp.transpose(x_nchw, (0, 2, 3, 1))
    x_pad = jnp.pad(x, ((0, 0), (1, 1), (1, 1), (0, cin_p - c_in)))

    # Weights go to the MXU in bf16 (f32 accumulation inside the kernels).
    w1 = _pad_weight(params["w1"], cin_p, cout_p).astype(jnp.bfloat16)
    w2 = _pad_weight(params["w2"], cout_p, cout_p).astype(jnp.bfloat16)
    g1 = _pad_channels(params["g1"], cout_p, 1.0)
    bt1 = _pad_channels(params["bt1"], cout_p, 0.0)
    g2 = _pad_channels(params["g2"], cout_p, 1.0)
    bt2 = _pad_channels(params["bt2"], cout_p, 0.0)
    # NOTE: conv biases b1/b2 are intentionally unused: training-mode BN
    # subtracts the per-channel mean, which cancels a constant bias exactly.

    count = N * H * W  # BN population: full batch*spatial, not per-tile

    # Layer 1, pass 1: conv1 + per-image BN partials; reduce partials in JAX.
    y1_raw, ps1, pq1 = _conv_stats_call(x_pad, w1, N, H, W, cin_p, cout_p)
    s1 = jnp.sum(ps1, axis=0)   # (1, cout_p)
    q1 = jnp.sum(pq1, axis=0)

    # Fused: BN1+ReLU (pass 2) -> pad in VMEM -> conv2 + partials (pass 1).
    y2_raw, ps2, pq2 = _norm_conv_stats_call(
        y1_raw, s1, q1, g1, bt1, w2, N, H, W, cout_p, cout_p, count)
    s2 = jnp.sum(ps2, axis=0)
    q2 = jnp.sum(pq2, axis=0)

    # Layer 2, pass 2: BN2 + ReLU, writing only the true c_out channels.
    y2 = _norm_relu_call(y2_raw, s2, q2, g2, bt2, N, H, W, cout_p, c_out, count)
    return jnp.transpose(y2, (0, 3, 1, 2))   # NHWC -> NCHW


def init_params(key, in_channels, out_channels):
    """Deterministic synthetic init mirroring PyTorch shapes.
    Conv weights are stored as (3, 3, Cin, Cout) = permuted (Cout, Cin, 3, 3)."""
    k_w1, k_b1, k_w2, k_b2 = jax.random.split(key, 4)
    bound1 = 1.0 / (in_channels * 9) ** 0.5
    bound2 = 1.0 / (out_channels * 9) ** 0.5
    w1 = jax.random.uniform(
        k_w1, (3, 3, in_channels, out_channels), jnp.float32, -bound1, bound1)
    b1 = jax.random.uniform(k_b1, (1, out_channels), jnp.float32, -bound1, bound1)
    w2 = jax.random.uniform(
        k_w2, (3, 3, out_channels, out_channels), jnp.float32, -bound2, bound2)
    b2 = jax.random.uniform(k_b2, (1, out_channels), jnp.float32, -bound2, bound2)
    return {
        "w1": w1, "b1": b1,  # b1/b2 kept for API parity; cancelled by BN
        "g1": jnp.ones((1, out_channels), jnp.float32),
        "bt1": jnp.zeros((1, out_channels), jnp.float32),
        "w2": w2, "b2": b2,
        "g2": jnp.ones((1, out_channels), jnp.float32),
        "bt2": jnp.zeros((1, out_channels), jnp.float32),
    }


if __name__ == "__main__":
    N, C_IN, C_OUT, H, W = 2, 4, 8, 16, 16
    key = jax.random.PRNGKey(0)
    k_x, k_p = jax.random.split(key)
    x = jax.random.normal(k_x, (N, C_IN, H, W), jnp.float32)
    params = init_params(k_p, C_IN, C_OUT)

    out = jax.jit(conv_block_forward)(x, params)
    jax.block_until_ready(out)
    assert out.shape == (N, C_OUT, H, W)
    assert bool(jnp.all(jnp.isfinite(out)))
    print("KERNEL_OK")
</pallas_src>

<mosaic_0001>
module attributes {stable_mosaic.version = 11 : i64} {
  func.func @_conv_stats_kernel(%arg0: i32, %arg1: memref<1x18x18x128xf32, #tpu.memory_space<vmem>>, %arg2: memref<1152x128xbf16, #tpu.memory_space<vmem>>, %arg3: memref<1x16x16x128xbf16, #tpu.memory_space<vmem>>, %arg4: memref<1x1x128xf32, #tpu.memory_space<vmem>>, %arg5: memref<1x1x128xf32, #tpu.memory_space<vmem>>) attributes {dimension_semantics = [#tpu.dimension_semantics<parallel>], iteration_bounds = array<i64: 2>, scalar_prefetch = 0 : i64, scratch_operands = 0 : i64, tpu.core_type = #tpu.core_type<tc>, window_params = [{transform_indices = @transform_0, window_bounds = array<i64: 1, 18, 18, 128>}, {pipeline_mode = #tpu.pipeline_mode<synchronous>, transform_indices = @transform_1, window_bounds = array<i64: 1152, 128>}, {transform_indices = @transform_2, window_bounds = array<i64: 1, 16, 16, 128>}, {transform_indices = @transform_3, window_bounds = array<i64: 1, 1, 128>}, {transform_indices = @transform_4, window_bounds = array<i64: 1, 1, 128>}]} {
    %c0 = arith.constant 0 : index
    %c0_0 = arith.constant 0 : index
    %c0_1 = arith.constant 0 : index
    %c0_2 = arith.constant 0 : index
    %0 = vector.load %arg1[%c0, %c0_0, %c0_1, %c0_2] : memref<1x18x18x128xf32, #tpu.memory_space<vmem>>, vector<1x18x18x128xf32>
    %1 = vector.shape_cast %0 : vector<1x18x18x128xf32> to vector<18x18x128xf32>
    %c0_3 = arith.constant 0 : index
    %c0_4 = arith.constant 0 : index
    %2 = vector.load %arg2[%c0_3, %c0_4] : memref<1152x128xbf16, #tpu.memory_space<vmem>>, vector<1152x128xbf16>
    %3 = vector.extract_strided_slice %1 {offsets = [0, 0, 0], sizes = [16, 16, 128], strides = [1, 1, 1]} : vector<18x18x128xf32> to vector<16x16x128xf32>
    %4 = vector.extract_strided_slice %1 {offsets = [0, 1, 0], sizes = [16, 16, 128], strides = [1, 1, 1]} : vector<18x18x128xf32> to vector<16x16x128xf32>
    %5 = vector.extract_strided_slice %1 {offsets = [0, 2, 0], sizes = [16, 16, 128], strides = [1, 1, 1]} : vector<18x18x128xf32> to vector<16x16x128xf32>
    %6 = vector.extract_strided_slice %1 {offsets = [1, 0, 0], sizes = [16, 16, 128], strides = [1, 1, 1]} : vector<18x18x128xf32> to vector<16x16x128xf32>
    %7 = vector.extract_strided_slice %1 {offsets = [1, 1, 0], sizes = [16, 16, 128], strides = [1, 1, 1]} : vector<18x18x128xf32> to vector<16x16x128xf32>
    %8 = vector.extract_strided_slice %1 {offsets = [1, 2, 0], sizes = [16, 16, 128], strides = [1, 1, 1]} : vector<18x18x128xf32> to vector<16x16x128xf32>
    %9 = vector.extract_strided_slice %1 {offsets = [2, 0, 0], sizes = [16, 16, 128], strides = [1, 1, 1]} : vector<18x18x128xf32> to vector<16x16x128xf32>
    %10 = vector.extract_strided_slice %1 {offsets = [2, 1, 0], sizes = [16, 16, 128], strides = [1, 1, 1]} : vector<18x18x128xf32> to vector<16x16x128xf32>
    %11 = vector.extract_strided_slice %1 {offsets = [2, 2, 0], sizes = [16, 16, 128], strides = [1, 1, 1]} : vector<18x18x128xf32> to vector<16x16x128xf32>
    %12 = tpu.concatenate %3, %4, %5, %6, %7, %8, %9, %10, %11 in 2 : vector<16x16x128xf32>, vector<16x16x128xf32>, vector<16x16x128xf32>, vector<16x16x128xf32>, vector<16x16x128xf32>, vector<16x16x128xf32>, vector<16x16x128xf32>, vector<16x16x128xf32>, vector<16x16x128xf32> -> vector<16x16x1152xf32>
    %13 = vector.shape_cast %12 : vector<16x16x1152xf32> to vector<256x1152xf32>
    %14 = arith.truncf %13 : vector<256x1152xf32> to vector<256x1152xbf16>
    %cst = arith.constant dense<0.000000e+00> : vector<256x128xf32>
    %15 = tpu.matmul %14, %2, %cst {dimension_numbers = #tpu.dot_dimension_numbers<[1], [0], [0], [1], [0, 0, 1, 1], [], []>} : vector<256x1152xbf16>, vector<1152x128xbf16>, vector<256x128xf32> -> vector<256x128xf32>
    %16 = vector.shape_cast %15 : vector<256x128xf32> to vector<1x16x16x128xf32>
    %17 = arith.truncf %16 : vector<1x16x16x128xf32> to vector<1x16x16x128xbf16>
    %c0_5 = arith.constant 0 : index
    %c0_6 = arith.constant 0 : index
    %c0_7 = arith.constant 0 : index
    %c0_8 = arith.constant 0 : index
    %18 = vector.load %arg3[%c0_5, %c0_6, %c0_7, %c0_8] : memref<1x16x16x128xbf16, #tpu.memory_space<vmem>>, vector<1x16x16x128xbf16>
    tpu.vector_store %arg3[%c0_5, %c0_6, %c0_7, %c0_8], %17 {strides = array<i32>} : memref<1x16x16x128xbf16, #tpu.memory_space<vmem>>, vector<1x16x16x128xbf16>,
    %cst_9 = arith.constant dense<0.000000e+00> : vector<128xf32>
    %19 = vector.multi_reduction <add>, %15, %cst_9 [0] : vector<256x128xf32> to vector<128xf32>
    %20 = vector.shape_cast %19 : vector<128xf32> to vector<1x128xf32>
    %21 = vector.shape_cast %20 : vector<1x128xf32> to vector<1x1x128xf32>
    %c0_10 = arith.constant 0 : index
    %c0_11 = arith.constant 0 : index
    %c0_12 = arith.constant 0 : index
    %22 = vector.load %arg4[%c0_10, %c0_11, %c0_12] : memref<1x1x128xf32, #tpu.memory_space<vmem>>, vector<1x1x128xf32>
    tpu.vector_store %arg4[%c0_10, %c0_11, %c0_12], %21 {strides = array<i32>} : memref<1x1x128xf32, #tpu.memory_space<vmem>>, vector<1x1x128xf32>,
    %23 = arith.mulf %15, %15 : vector<256x128xf32>
    %cst_13 = arith.constant dense<0.000000e+00> : vector<128xf32>
    %24 = vector.multi_reduction <add>, %23, %cst_13 [0] : vector<256x128xf32> to vector<128xf32>
    %25 = vector.shape_cast %24 : vector<128xf32> to vector<1x128xf32>
    %26 = vector.shape_cast %25 : vector<1x128xf32> to vector<1x1x128xf32>
    %c0_14 = arith.constant 0 : index
    %c0_15 = arith.constant 0 : index
    %c0_16 = arith.constant 0 : index
    %27 = vector.load %arg5[%c0_14, %c0_15, %c0_16] : memref<1x1x128xf32, #tpu.memory_space<vmem>>, vector<1x1x128xf32>
    tpu.vector_store %arg5[%c0_14, %c0_15, %c0_16], %26 {strides = array<i32>} : memref<1x1x128xf32, #tpu.memory_space<vmem>>, vector<1x1x128xf32>,
    return
  }
  func.func @transform_0(%arg0: i32) -> (i32, i32, i32, i32) {
    %c0_i32 = arith.constant 0 : i32
    %c0_i32_0 = arith.constant 0 : i32
    %c0_i32_1 = arith.constant 0 : i32
    %c0_i32_2 = arith.constant 0 : i32
    return %arg0, %c0_i32, %c0_i32_0, %c0_i32_1 : i32, i32, i32, i32
  }
  func.func @transform_1(%arg0: i32) -> (i32, i32) {
    %c0_i32 = arith.constant 0 : i32
    %c0_i32_0 = arith.constant 0 : i32
    %c0_i32_1 = arith.constant 0 : i32
    return %c0_i32, %c0_i32_0 : i32, i32
  }
  func.func @transform_2(%arg0: i32) -> (i32, i32, i32, i32) {
    %c0_i32 = arith.constant 0 : i32
    %c0_i32_0 = arith.constant 0 : i32
    %c0_i32_1 = arith.constant 0 : i32
    %c0_i32_2 = arith.constant 0 : i32
    return %arg0, %c0_i32, %c0_i32_0, %c0_i32_1 : i32, i32, i32, i32
  }
  func.func @transform_3(%arg0: i32) -> (i32, i32, i32) {
    %c0_i32 = arith.constant 0 : i32
    %c0_i32_0 = arith.constant 0 : i32
    %c0_i32_1 = arith.constant 0 : i32
    return %arg0, %c0_i32, %c0_i32_0 : i32, i32, i32
  }
  func.func @transform_4(%arg0: i32) -> (i32, i32, i32) {
    %c0_i32 = arith.constant 0 : i32
    %c0_i32_0 = arith.constant 0 : i32
    %c0_i32_1 = arith.constant 0 : i32
    return %arg0, %c0_i32, %c0_i32_0 : i32, i32, i32
  }
}

module attributes {stable_mosaic.version = 11 : i64} {
  func.func @_norm_relu_kernel(%arg0: i32, %arg1: memref<1x16x16x128xbf16, #tpu.memory_space<vmem>>, %arg2: memref<1x128xf32, #tpu.memory_space<vmem>>, %arg3: memref<1x128xf32, #tpu.memory_space<vmem>>, %arg4: memref<1x128xf32, #tpu.memory_space<vmem>>, %arg5: memref<1x128xf32, #tpu.memory_space<vmem>>, %arg6: memref<1x16x16x8xf32, #tpu.memory_space<vmem>>) attributes {dimension_semantics = [#tpu.dimension_semantics<parallel>], iteration_bounds = array<i64: 2>, scalar_prefetch = 0 : i64, scratch_operands = 0 : i64, tpu.core_type = #tpu.core_type<tc>, window_params = [{transform_indices = @transform_0, window_bounds = array<i64: 1, 16, 16, 128>}, {pipeline_mode = #tpu.pipeline_mode<synchronous>, transform_indices = @transform_1, window_bounds = array<i64: 1, 128>}, {pipeline_mode = #tpu.pipeline_mode<synchronous>, transform_indices = @transform_2, window_bounds = array<i64: 1, 128>}, {pipeline_mode = #tpu.pipeline_mode<synchronous>, transform_indices = @transform_3, window_bounds = array<i64: 1, 128>}, {pipeline_mode = #tpu.pipeline_mode<synchronous>, transform_indices = @transform_4, window_bounds = array<i64: 1, 128>}, {transform_indices = @transform_5, window_bounds = array<i64: 1, 16, 16, 8>}]} {
    %c0 = arith.constant 0 : index
    %c0_0 = arith.constant 0 : index
    %0 = vector.load %arg2[%c0, %c0_0] : memref<1x128xf32, #tpu.memory_space<vmem>>, vector<1x128xf32>
    %c0_1 = arith.constant 0 : index
    %c0_2 = arith.constant 0 : index
    %1 = vector.load %arg3[%c0_1, %c0_2] : memref<1x128xf32, #tpu.memory_space<vmem>>, vector<1x128xf32>
    %c0_3 = arith.constant 0 : index
    %c0_4 = arith.constant 0 : index
    %2 = vector.load %arg4[%c0_3, %c0_4] : memref<1x128xf32, #tpu.memory_space<vmem>>, vector<1x128xf32>
    %c0_5 = arith.constant 0 : index
    %c0_6 = arith.constant 0 : index
    %3 = vector.load %arg5[%c0_5, %c0_6] : memref<1x128xf32, #tpu.memory_space<vmem>>, vector<1x128xf32>
    %cst = arith.constant 0.001953125 : f32
    %4 = vector.broadcast %cst : f32 to vector<1x128xf32>
    %5 = arith.mulf %0, %4 : vector<1x128xf32>
    %cst_7 = arith.constant 0.001953125 : f32
    %6 = vector.broadcast %cst_7 : f32 to vector<1x128xf32>
    %7 = arith.mulf %1, %6 : vector<1x128xf32>
    %8 = arith.mulf %5, %5 : vector<1x128xf32>
    %9 = arith.subf %7, %8 : vector<1x128xf32>
    %cst_8 = arith.constant 9.99999974E-6 : f32
    %10 = vector.broadcast %cst_8 : f32 to vector<1x128xf32>
    %11 = arith.addf %9, %10 : vector<1x128xf32>
    %12 = math.rsqrt %11 : vector<1x128xf32>
    %13 = arith.mulf %2, %12 : vector<1x128xf32>
    %14 = arith.mulf %5, %13 : vector<1x128xf32>
    %15 = arith.subf %3, %14 : vector<1x128xf32>
    %c0_9 = arith.constant 0 : index
    %c0_10 = arith.constant 0 : index
    %c0_11 = arith.constant 0 : index
    %c0_12 = arith.constant 0 : index
    %16 = vector.load %arg1[%c0_9, %c0_10, %c0_11, %c0_12] : memref<1x16x16x128xbf16, #tpu.memory_space<vmem>>, vector<1x16x16x128xbf16>
    %17 = arith.extf %16 : vector<1x16x16x128xbf16> to vector<1x16x16x128xf32>
    %18 = vector.shape_cast %13 : vector<1x128xf32> to vector<1x1x1x128xf32>
    %19 = vector.broadcast %18 : vector<1x1x1x128xf32> to vector<1x16x16x128xf32>
    %20 = arith.mulf %17, %19 : vector<1x16x16x128xf32>
    %21 = vector.shape_cast %15 : vector<1x128xf32> to vector<1x1x1x128xf32>
    %22 = vector.broadcast %21 : vector<1x1x1x128xf32> to vector<1x16x16x128xf32>
    %23 = arith.addf %20, %22 : vector<1x16x16x128xf32>
    %cst_13 = arith.constant 0.000000e+00 : f32
    %24 = vector.broadcast %cst_13 : f32 to vector<1x16x16x128xf32>
    %25 = arith.maximumf %23, %24 : vector<1x16x16x128xf32>
    %26 = vector.extract_strided_slice %25 {offsets = [0, 0, 0, 0], sizes = [1, 16, 16, 8], strides = [1, 1, 1, 1]} : vector<1x16x16x128xf32> to vector<1x16x16x8xf32>
    %c0_14 = arith.constant 0 : index
    %c0_15 = arith.constant 0 : index
    %c0_16 = arith.constant 0 : index
    %c0_17 = arith.constant 0 : index
    %27 = vector.load %arg6[%c0_14, %c0_15, %c0_16, %c0_17] : memref<1x16x16x8xf32, #tpu.memory_space<vmem>>, vector<1x16x16x8xf32>
    tpu.vector_store %arg6[%c0_14, %c0_15, %c0_16, %c0_17], %26 {strides = array<i32>} : memref<1x16x16x8xf32, #tpu.memory_space<vmem>>, vector<1x16x16x8xf32>,
    return
  }
  func.func @transform_0(%arg0: i32) -> (i32, i32, i32, i32) {
    %c0_i32 = arith.constant 0 : i32
    %c0_i32_0 = arith.constant 0 : i32
    %c0_i32_1 = arith.constant 0 : i32
    %c0_i32_2 = arith.constant 0 : i32
    return %arg0, %c0_i32, %c0_i32_0, %c0_i32_1 : i32, i32, i32, i32
  }
  func.func @transform_1(%arg0: i32) -> (i32, i32) {
    %c0_i32 = arith.constant 0 : i32
    %c0_i32_0 = arith.constant 0 : i32
    %c0_i32_1 = arith.constant 0 : i32
    return %c0_i32, %c0_i32_0 : i32, i32
  }
  func.func @transform_2(%arg0: i32) -> (i32, i32) {
    %c0_i32 = arith.constant 0 : i32
    %c0_i32_0 = arith.constant 0 : i32
    %c0_i32_1 = arith.constant 0 : i32
    return %c0_i32, %c0_i32_0 : i32, i32
  }
  func.func @transform_3(%arg0: i32) -> (i32, i32) {
    %c0_i32 = arith.constant 0 : i32
    %c0_i32_0 = arith.constant 0 : i32
    %c0_i32_1 = arith.constant 0 : i32
    return %c0_i32, %c0_i32_0 : i32, i32
  }
  func.func @transform_4(%arg0: i32) -> (i32, i32) {
    %c0_i32 = arith.constant 0 : i32
    %c0_i32_0 = arith.constant 0 : i32
    %c0_i32_1 = arith.constant 0 : i32
    return %c0_i32, %c0_i32_0 : i32, i32
  }
  func.func @transform_5(%arg0: i32) -> (i32, i32, i32, i32) {
    %c0_i32 = arith.constant 0 : i32
    %c0_i32_0 = arith.constant 0 : i32
    %c0_i32_1 = arith.constant 0 : i32
    %c0_i32_2 = arith.constant 0 : i32
    return %arg0, %c0_i32, %c0_i32_0, %c0_i32_1 : i32, i32, i32, i32
  }
}

module attributes {stable_mosaic.version = 11 : i64} {
  func.func @_norm_conv_stats_kernel(%arg0: i32, %arg1: memref<1x16x16x128xbf16, #tpu.memory_space<vmem>>, %arg2: memref<1x128xf32, #tpu.memory_space<vmem>>, %arg3: memref<1x128xf32, #tpu.memory_space<vmem>>, %arg4: memref<1x128xf32, #tpu.memory_space<vmem>>, %arg5: memref<1x128xf32, #tpu.memory_space<vmem>>, %arg6: memref<1152x128xbf16, #tpu.memory_space<vmem>>, %arg7: memref<1x16x16x128xbf16, #tpu.memory_space<vmem>>, %arg8: memref<1x1x128xf32, #tpu.memory_space<vmem>>, %arg9: memref<1x1x128xf32, #tpu.memory_space<vmem>>, %arg10: memref<18x18x128xf32, #tpu.memory_space<vmem>>) attributes {dimension_semantics = [#tpu.dimension_semantics<parallel>], iteration_bounds = array<i64: 2>, scalar_prefetch = 0 : i64, scratch_operands = 1 : i64, tpu.core_type = #tpu.core_type<tc>, window_params = [{transform_indices = @transform_0, window_bounds = array<i64: 1, 16, 16, 128>}, {pipeline_mode = #tpu.pipeline_mode<synchronous>, transform_indices = @transform_1, window_bounds = array<i64: 1, 128>}, {pipeline_mode = #tpu.pipeline_mode<synchronous>, transform_indices = @transform_2, window_bounds = array<i64: 1, 128>}, {pipeline_mode = #tpu.pipeline_mode<synchronous>, transform_indices = @transform_3, window_bounds = array<i64: 1, 128>}, {pipeline_mode = #tpu.pipeline_mode<synchronous>, transform_indices = @transform_4, window_bounds = array<i64: 1, 128>}, {pipeline_mode = #tpu.pipeline_mode<synchronous>, transform_indices = @transform_5, window_bounds = array<i64: 1152, 128>}, {transform_indices = @transform_6, window_bounds = array<i64: 1, 16, 16, 128>}, {transform_indices = @transform_7, window_bounds = array<i64: 1, 1, 128>}, {transform_indices = @transform_8, window_bounds = array<i64: 1, 1, 128>}]} {
    %c0 = arith.constant 0 : index
    %c0_0 = arith.constant 0 : index
    %0 = vector.load %arg2[%c0, %c0_0] : memref<1x128xf32, #tpu.memory_space<vmem>>, vector<1x128xf32>
    %c0_1 = arith.constant 0 : index
    %c0_2 = arith.constant 0 : index
    %1 = vector.load %arg3[%c0_1, %c0_2] : memref<1x128xf32, #tpu.memory_space<vmem>>, vector<1x128xf32>
    %c0_3 = arith.constant 0 : index
    %c0_4 = arith.constant 0 : index
    %2 = vector.load %arg4[%c0_3, %c0_4] : memref<1x128xf32, #tpu.memory_space<vmem>>, vector<1x128xf32>
    %c0_5 = arith.constant 0 : index
    %c0_6 = arith.constant 0 : index
    %3 = vector.load %arg5[%c0_5, %c0_6] : memref<1x128xf32, #tpu.memory_space<vmem>>, vector<1x128xf32>
    %cst = arith.constant 0.001953125 : f32
    %4 = vector.broadcast %cst : f32 to vector<1x128xf32>
    %5 = arith.mulf %0, %4 : vector<1x128xf32>
    %cst_7 = arith.constant 0.001953125 : f32
    %6 = vector.broadcast %cst_7 : f32 to vector<1x128xf32>
    %7 = arith.mulf %1, %6 : vector<1x128xf32>
    %8 = arith.mulf %5, %5 : vector<1x128xf32>
    %9 = arith.subf %7, %8 : vector<1x128xf32>
    %cst_8 = arith.constant 9.99999974E-6 : f32
    %10 = vector.broadcast %cst_8 : f32 to vector<1x128xf32>
    %11 = arith.addf %9, %10 : vector<1x128xf32>
    %12 = math.rsqrt %11 : vector<1x128xf32>
    %13 = arith.mulf %2, %12 : vector<1x128xf32>
    %14 = arith.mulf %5, %13 : vector<1x128xf32>
    %15 = arith.subf %3, %14 : vector<1x128xf32>
    %c0_9 = arith.constant 0 : index
    %c0_10 = arith.constant 0 : index
    %c0_11 = arith.constant 0 : index
    %c0_12 = arith.constant 0 : index
    %16 = vector.load %arg1[%c0_9, %c0_10, %c0_11, %c0_12] : memref<1x16x16x128xbf16, #tpu.memory_space<vmem>>, vector<1x16x16x128xbf16>
    %17 = vector.shape_cast %16 : vector<1x16x16x128xbf16> to vector<16x16x128xbf16>
    %18 = arith.extf %17 : vector<16x16x128xbf16> to vector<16x16x128xf32>
    %19 = vector.shape_cast %13 : vector<1x128xf32> to vector<1x1x128xf32>
    %20 = vector.broadcast %19 : vector<1x1x128xf32> to vector<16x16x128xf32>
    %21 = arith.mulf %18, %20 : vector<16x16x128xf32>
    %22 = vector.shape_cast %15 : vector<1x128xf32> to vector<1x1x128xf32>
    %23 = vector.broadcast %22 : vector<1x1x128xf32> to vector<16x16x128xf32>
    %24 = arith.addf %21, %23 : vector<16x16x128xf32>
    %cst_13 = arith.constant 0.000000e+00 : f32
    %25 = vector.broadcast %cst_13 : f32 to vector<16x16x128xf32>
    %26 = arith.maximumf %24, %25 : vector<16x16x128xf32>
    %cst_14 = arith.constant 0.000000e+00 : f32
    %27 = vector.broadcast %cst_14 : f32 to vector<1x18x128xf32>
    %c0_15 = arith.constant 0 : index
    %c0_16 = arith.constant 0 : index
    %c0_17 = arith.constant 0 : index
    %28 = vector.load %arg10[%c0_15, %c0_16, %c0_17] : memref<18x18x128xf32, #tpu.memory_space<vmem>>, vector<1x18x128xf32>
    tpu.vector_store %arg10[%c0_15, %c0_16, %c0_17], %27 {strides = array<i32>} : memref<18x18x128xf32, #tpu.memory_space<vmem>>, vector<1x18x128xf32>,
    %c17 = arith.constant 17 : index
    %c0_18 = arith.constant 0 : index
    %c0_19 = arith.constant 0 : index
    %29 = vector.load %arg10[%c17, %c0_18, %c0_19] : memref<18x18x128xf32, #tpu.memory_space<vmem>>, vector<1x18x128xf32>
    tpu.vector_store %arg10[%c17, %c0_18, %c0_19], %27 {strides = array<i32>} : memref<18x18x128xf32, #tpu.memory_space<vmem>>, vector<1x18x128xf32>,
    %cst_20 = arith.constant 0.000000e+00 : f32
    %30 = vector.broadcast %cst_20 : f32 to vector<16x1x128xf32>
    %c1 = arith.constant 1 : index
    %c0_21 = arith.constant 0 : index
    %c0_22 = arith.constant 0 : index
    %31 = vector.load %arg10[%c1, %c0_21, %c0_22] : memref<18x18x128xf32, #tpu.memory_space<vmem>>, vector<16x1x128xf32>
    tpu.vector_store %arg10[%c1, %c0_21, %c0_22], %30 {strides = array<i32>} : memref<18x18x128xf32, #tpu.memory_space<vmem>>, vector<16x1x128xf32>,
    %c1_23 = arith.constant 1 : index
    %c17_24 = arith.constant 17 : index
    %c0_25 = arith.constant 0 : index
    %32 = vector.load %arg10[%c1_23, %c17_24, %c0_25] : memref<18x18x128xf32, #tpu.memory_space<vmem>>, vector<16x1x128xf32>
    tpu.vector_store %arg10[%c1_23, %c17_24, %c0_25], %30 {strides = array<i32>} : memref<18x18x128xf32, #tpu.memory_space<vmem>>, vector<16x1x128xf32>,
    %c1_26 = arith.constant 1 : index
    %c1_27 = arith.constant 1 : index
    %c0_28 = arith.constant 0 : index
    %33 = vector.load %arg10[%c1_26, %c1_27, %c0_28] : memref<18x18x128xf32, #tpu.memory_space<vmem>>, vector<16x16x128xf32>
    tpu.vector_store %arg10[%c1_26, %c1_27, %c0_28], %26 {strides = array<i32>} : memref<18x18x128xf32, #tpu.memory_space<vmem>>, vector<16x16x128xf32>,
    %c0_29 = arith.constant 0 : index
    %c0_30 = arith.constant 0 : index
    %c0_31 = arith.constant 0 : index
    %34 = vector.load %arg10[%c0_29, %c0_30, %c0_31] : memref<18x18x128xf32, #tpu.memory_space<vmem>>, vector<18x18x128xf32>
    %c0_32 = arith.constant 0 : index
    %c0_33 = arith.constant 0 : index
    %35 = vector.load %arg6[%c0_32, %c0_33] : memref<1152x128xbf16, #tpu.memory_space<vmem>>, vector<1152x128xbf16>
    %36 = vector.extract_strided_slice %34 {offsets = [0, 0, 0], sizes = [16, 16, 128], strides = [1, 1, 1]} : vector<18x18x128xf32> to vector<16x16x128xf32>
    %37 = vector.extract_strided_slice %34 {offsets = [0, 1, 0], sizes = [16, 16, 128], strides = [1, 1, 1]} : vector<18x18x128xf32> to vector<16x16x128xf32>
    %38 = vector.extract_strided_slice %34 {offsets = [0, 2, 0], sizes = [16, 16, 128], strides = [1, 1, 1]} : vector<18x18x128xf32> to vector<16x16x128xf32>
    %39 = vector.extract_strided_slice %34 {offsets = [1, 0, 0], sizes = [16, 16, 128], strides = [1, 1, 1]} : vector<18x18x128xf32> to vector<16x16x128xf32>
    %40 = vector.extract_strided_slice %34 {offsets = [1, 1, 0], sizes = [16, 16, 128], strides = [1, 1, 1]} : vector<18x18x128xf32> to vector<16x16x128xf32>
    %41 = vector.extract_strided_slice %34 {offsets = [1, 2, 0], sizes = [16, 16, 128], strides = [1, 1, 1]} : vector<18x18x128xf32> to vector<16x16x128xf32>
    %42 = vector.extract_strided_slice %34 {offsets = [2, 0, 0], sizes = [16, 16, 128], strides = [1, 1, 1]} : vector<18x18x128xf32> to vector<16x16x128xf32>
    %43 = vector.extract_strided_slice %34 {offsets = [2, 1, 0], sizes = [16, 16, 128], strides = [1, 1, 1]} : vector<18x18x128xf32> to vector<16x16x128xf32>
    %44 = vector.extract_strided_slice %34 {offsets = [2, 2, 0], sizes = [16, 16, 128], strides = [1, 1, 1]} : vector<18x18x128xf32> to vector<16x16x128xf32>
    %45 = tpu.concatenate %36, %37, %38, %39, %40, %41, %42, %43, %44 in 2 : vector<16x16x128xf32>, vector<16x16x128xf32>, vector<16x16x128xf32>, vector<16x16x128xf32>, vector<16x16x128xf32>, vector<16x16x128xf32>, vector<16x16x128xf32>, vector<16x16x128xf32>, vector<16x16x128xf32> -> vector<16x16x1152xf32>
    %46 = vector.shape_cast %45 : vector<16x16x1152xf32> to vector<256x1152xf32>
    %47 = arith.truncf %46 : vector<256x1152xf32> to vector<256x1152xbf16>
    %cst_34 = arith.constant dense<0.000000e+00> : vector<256x128xf32>
    %48 = tpu.matmul %47, %35, %cst_34 {dimension_numbers = #tpu.dot_dimension_numbers<[1], [0], [0], [1], [0, 0, 1, 1], [], []>} : vector<256x1152xbf16>, vector<1152x128xbf16>, vector<256x128xf32> -> vector<256x128xf32>
    %49 = vector.shape_cast %48 : vector<256x128xf32> to vector<1x16x16x128xf32>
    %50 = arith.truncf %49 : vector<1x16x16x128xf32> to vector<1x16x16x128xbf16>
    %c0_35 = arith.constant 0 : index
    %c0_36 = arith.constant 0 : index
    %c0_37 = arith.constant 0 : index
    %c0_38 = arith.constant 0 : index
    %51 = vector.load %arg7[%c0_35, %c0_36, %c0_37, %c0_38] : memref<1x16x16x128xbf16, #tpu.memory_space<vmem>>, vector<1x16x16x128xbf16>
    tpu.vector_store %arg7[%c0_35, %c0_36, %c0_37, %c0_38], %50 {strides = array<i32>} : memref<1x16x16x128xbf16, #tpu.memory_space<vmem>>, vector<1x16x16x128xbf16>,
    %cst_39 = arith.constant dense<0.000000e+00> : vector<128xf32>
    %52 = vector.multi_reduction <add>, %48, %cst_39 [0] : vector<256x128xf32> to vector<128xf32>
    %53 = vector.shape_cast %52 : vector<128xf32> to vector<1x128xf32>
    %54 = vector.shape_cast %53 : vector<1x128xf32> to vector<1x1x128xf32>
    %c0_40 = arith.constant 0 : index
    %c0_41 = arith.constant 0 : index
    %c0_42 = arith.constant 0 : index
    %55 = vector.load %arg8[%c0_40, %c0_41, %c0_42] : memref<1x1x128xf32, #tpu.memory_space<vmem>>, vector<1x1x128xf32>
    tpu.vector_store %arg8[%c0_40, %c0_41, %c0_42], %54 {strides = array<i32>} : memref<1x1x128xf32, #tpu.memory_space<vmem>>, vector<1x1x128xf32>,
    %56 = arith.mulf %48, %48 : vector<256x128xf32>
    %cst_43 = arith.constant dense<0.000000e+00> : vector<128xf32>
    %57 = vector.multi_reduction <add>, %56, %cst_43 [0] : vector<256x128xf32> to vector<128xf32>
    %58 = vector.shape_cast %57 : vector<128xf32> to vector<1x128xf32>
    %59 = vector.shape_cast %58 : vector<1x128xf32> to vector<1x1x128xf32>
    %c0_44 = arith.constant 0 : index
    %c0_45 = arith.constant 0 : index
    %c0_46 = arith.constant 0 : index
    %60 = vector.load %arg9[%c0_44, %c0_45, %c0_46] : memref<1x1x128xf32, #tpu.memory_space<vmem>>, vector<1x1x128xf32>
    tpu.vector_store %arg9[%c0_44, %c0_45, %c0_46], %59 {strides = array<i32>} : memref<1x1x128xf32, #tpu.memory_space<vmem>>, vector<1x1x128xf32>,
    return
  }
  func.func @transform_0(%arg0: i32) -> (i32, i32, i32, i32) {
    %c0_i32 = arith.constant 0 : i32
    %c0_i32_0 = arith.constant 0 : i32
    %c0_i32_1 = arith.constant 0 : i32
    %c0_i32_2 = arith.constant 0 : i32
    return %arg0, %c0_i32, %c0_i32_0, %c0_i32_1 : i32, i32, i32, i32
  }
  func.func @transform_1(%arg0: i32) -> (i32, i32) {
    %c0_i32 = arith.constant 0 : i32
    %c0_i32_0 = arith.constant 0 : i32
    %c0_i32_1 = arith.constant 0 : i32
    return %c0_i32, %c0_i32_0 : i32, i32
  }
  func.func @transform_2(%arg0: i32) -> (i32, i32) {
    %c0_i32 = arith.constant 0 : i32
    %c0_i32_0 = arith.constant 0 : i32
    %c0_i32_1 = arith.constant 0 : i32
    return %c0_i32, %c0_i32_0 : i32, i32
  }
  func.func @transform_3(%arg0: i32) -> (i32, i32) {
    %c0_i32 = arith.constant 0 : i32
    %c0_i32_0 = arith.constant 0 : i32
    %c0_i32_1 = arith.constant 0 : i32
    return %c0_i32, %c0_i32_0 : i32, i32
  }
  func.func @transform_4(%arg0: i32) -> (i32, i32) {
    %c0_i32 = arith.constant 0 : i32
    %c0_i32_0 = arith.constant 0 : i32
    %c0_i32_1 = arith.constant 0 : i32
    return %c0_i32, %c0_i32_0 : i32, i32
  }
  func.func @transform_5(%arg0: i32) -> (i32, i32) {
    %c0_i32 = arith.constant 0 : i32
    %c0_i32_0 = arith.constant 0 : i32
    %c0_i32_1 = arith.constant 0 : i32
    return %c0_i32, %c0_i32_0 : i32, i32
  }
  func.func @transform_6(%arg0: i32) -> (i32, i32, i32, i32) {
    %c0_i32 = arith.constant 0 : i32
    %c0_i32_0 = arith.constant 0 : i32
    %c0_i32_1 = arith.constant 0 : i32
    %c0_i32_2 = arith.constant 0 : i32
    return %arg0, %c0_i32, %c0_i32_0, %c0_i32_1 : i32, i32, i32, i32
  }
  func.func @transform_7(%arg0: i32) -> (i32, i32, i32) {
    %c0_i32 = arith.constant 0 : i32
    %c0_i32_0 = arith.constant 0 : i32
    %c0_i32_1 = arith.constant 0 : i32
    return %arg0, %c0_i32, %c0_i32_0 : i32, i32, i32
  }
  func.func @transform_8(%arg0: i32) -> (i32, i32, i32) {
    %c0_i32 = arith.constant 0 : i32
    %c0_i32_0 = arith.constant 0 : i32
    %c0_i32_1 = arith.constant 0 : i32
    return %arg0, %c0_i32, %c0_i32_0 : i32, i32, i32
  }
}

</mosaic_0001>

<bundles_post_ra>
// kernel: conv_block_forward.5
= control target key start
LH: loop header
LB: loop body
LE: loop exit
PB: predicated region body
PF: predicated region fallthrough
CT: control target
= control target key end

     0   :  { %s641_s18 = smov 0   ;;  %s826_s0 = inlined_call_operand.vmem [shape: bf16[2,16,16,128], index: 0, kind: input, shape index: {}]   ;;  %s827_s1 = inlined_call_operand.vmem [shape: f32[1,128], index: 1, kind: input, shape index: {}]   ;;  %s828_s2 = inlined_call_operand.vmem [shape: f32[1,128], index: 2, kind: input, shape index: {}]   ;;  %s829_s3 = inlined_call_operand.vmem [shape: f32[1,128], index: 3, kind: input, shape index: {}]   ;;  %s830_s4 = inlined_call_operand.vmem [shape: f32[1,128], index: 4, kind: input, shape index: {}]   ;;  %s831_s5 = inlined_call_operand.vmem [shape: f32[2,16,16,8], index: 5, kind: output, shape index: {}]  }
   0x1 LB: > { %s501_s19 = sadd.s32 4294967295, %s609_s18   ;;  %p505_p0 = scmp.ge.s32.totalorder %s609_s18, 1  ;;  %s609_s18 = sphi %s641_s18, %s15_s18  }
   0x2   : > { %p187_p1 = scmp.lt.s32.totalorder %s609_s18, 3 }
   0x4   : > { %p188_p2 = pnand %p505_p0, %p187_p1 }
   0x5   : > { %p215_p3 = scmp.lt.s32.totalorder (!%p188_p2), %s501_s19, 1 }
   0x6   : > { %191 = sbr.rel (%p188_p2) target bundleno = 82 (0x52), region = 40 }
   0xb   : > { %v225_v0 = vld [vmem:[%s827_s1] sm:$0x1]  ;;  %s833_s19 = smov (!%p215_p3, %s501_s19), 1  ;;  %vm413_vm3 = vcmask 64512  }
   0xc   : > { %v226_v1 = vld [vmem:[%s828_s2] sm:$0x1]  ;;  %v229_v2 = vmul.f32 0.001953125, %v225_v0  ;;  %s512_s24 = sshll.u32 %s833_s19, 7  ;;  %s513_s7 = sshll.u32 %s833_s19, 8 }
   0xd   : > { %v230_v3 = vmul.f32 0.001953125, %v226_v1  ;;  %s661_s27 = scalar_lea.vmem %s826_s0, %s512_s24  ;;  %v227_v12 = vld [vmem:[%s829_s3] sm:$0x1]  ;;  %s698_s10 = scalar_lea.vmem %s831_s5, %s513_s7 }
   0xe   : > { %v231_v4 = vmul.f32 %v229_v2, %v229_v2  ;;  %v515_v14 = vld [vmem:[%s661_s27] sm:$0xff]   ;;  %v578_v15 = vld [vmem:[%s661_s27 + $0x8] sm:$0xff]   ;;  %v579_v16 = vld [vmem:[%s661_s27 + $0x10] sm:$0xff]  }
   0xf   : > { %v580_v18 = vld [vmem:[%s661_s27 + $0x18] sm:$0xff]   ;;  %v516_v20 = vunpack.c.l.bf16 %v515_v14  ;;  %v517_v21 = vunpack.c.h.bf16 %v515_v14  ;;  %v520_v22 = vunpack.c.l.bf16 %v578_v15  ;;  %v581_v23 = vld [vmem:[%s661_s27 + $0x20] sm:$0xff]   ;;  %v521_v25 = vunpack.c.h.bf16 %v578_v15  ;;  %v582_v31 = vld [vmem:[%s661_s27 + $0x28] sm:$0xff]  }
  0x10   : > { %v232_v5 = vsub.f32 %v230_v3, %v231_v4  ;;  %v228_v24 = vld [vmem:[%s830_s4] sm:$0x1]  ;;  %v524_v26 = vunpack.c.l.bf16 %v579_v16  ;;  %v525_v27 = vunpack.c.h.bf16 %v579_v16  ;;  %v528_v30 = vunpack.c.l.bf16 %v580_v18  ;;  %v583_v35 = vld [vmem:[%s661_s27 + $0x30] sm:$0xff]   ;;  %v584_v40 = vld [vmem:[%s661_s27 + $0x38] sm:$0xff]  }
  0x11   : > { %v529_v32 = vunpack.c.h.bf16 %v580_v18  ;;  %v532_v33 = vunpack.c.l.bf16 %v581_v23  ;;  %v533_v34 = vunpack.c.h.bf16 %v581_v23  ;;  %v536_v44 = vunpack.c.l.bf16 %v582_v31  ;;  %v585_v61 = vld [vmem:[%s661_s27 + $0x40] sm:$0xff]   ;;  %v587_v15 = vld [vmem:[%s661_s27 + $0x50] sm:$0xff]  }
  0x12   : > { %v233_v6 = vadd.f32 1e-05, %v232_v5  ;;  %v537_v47 = vunpack.c.h.bf16 %v582_v31  ;;  %v540_v48 = vunpack.c.l.bf16 %v583_v35  ;;  %v541_v51 = vunpack.c.h.bf16 %v583_v35 }
  0x13   : > { %v544_v52 = vunpack.c.l.bf16 %v584_v40  ;;  %v545_v5 = vunpack.c.h.bf16 %v584_v40  ;;  %v549_v14 = vunpack.c.h.bf16 %v585_v61 }
  0x14   : > { %601 = vrsqrt.f32 %v233_v6  ;;  %vm240_vm0 = vweird.f32 %v233_v6 }
  0x1a   : > { %v602_v7 = vpop.eup %601 }
  0x1b   : > { %v235_v8 = vmul.f32 %v602_v7, %v233_v6  ;;  %vm241_vm1 = vweird.f32 %v602_v7  ;;  %v586_v6 = vld [vmem:[%s661_s27 + $0x48] sm:$0xff]  }
  0x1c   : > { %vm242_vm2 = vmor %vm240_vm0, %vm241_vm1  ;;  %v553_v23 = vunpack.c.h.bf16 %v586_v6 }
  0x1d   : > { %v236_v9 = vmul.f32 %v602_v7, %v235_v8 }
  0x1f   : > { %v237_v10 = vmul.f32 0.5, %v236_v9 }
  0x21   : > { %v238_v11 = vsub.f32 1.5, %v237_v10  ;;  %v548_v10 = vunpack.c.l.bf16 %v585_v61 }
  0x23   : > { %v239_v13 = vmul.f32 %v602_v7, %v238_v11 }
  0x25   : > { %v243_v17 = vsel %vm242_vm2, %v602_v7, %v239_v13 }
  0x26   : > { %v244_v19 = vmul.f32 %v243_v17, %v227_v12 }
  0x28   : > { %v245_v28 = vmul.f32 %v244_v19, %v229_v2  ;;  %v674_v29 = vperm.slane %v244_v19, 0  ;;  %v552_v19 = vunpack.c.l.bf16 %v586_v6 }
  0x2a   : > { %v246_v36 = vsub.f32 %v228_v24, %v245_v28  ;;  %v314_v37 = vmul.f32 %v516_v20, %v674_v29  ;;  %v315_v38 = vmul.f32 %v517_v21, %v674_v29  ;;  %v316_v39 = vmul.f32 %v520_v22, %v674_v29  ;;  %v588_v24 = vld [vmem:[%s661_s27 + $0x58] sm:$0xff]  }
  0x2b   : > { %v317_v41 = vmul.f32 %v521_v25, %v674_v29  ;;  %v318_v42 = vmul.f32 %v524_v26, %v674_v29  ;;  %v319_v43 = vmul.f32 %v525_v27, %v674_v29  ;;  %v320_v46 = vmul.f32 %v528_v30, %v674_v29 }
  0x2c   : > { %v686_v45 = vperm.slane %v246_v36, 0  ;;  %v321_v49 = vmul.f32 %v529_v32, %v674_v29  ;;  %v322_v50 = vmul.f32 %v532_v33, %v674_v29  ;;  %v323_v59 = vmul.f32 %v533_v34, %v674_v29  ;;  %v589_v34 = vld [vmem:[%s661_s27 + $0x60] sm:$0xff]  }
  0x2d   : > { %v324_v60 = vmul.f32 %v536_v44, %v674_v29  ;;  %v325_v4 = vmul.f32 %v537_v47, %v674_v29  ;;  %v326_v9 = vmul.f32 %v540_v48, %v674_v29  ;;  %v327_v13 = vmul.f32 %v541_v51, %v674_v29 }
  0x2e   : > { %v349_v53 = vadd.f32 %v686_v45, %v314_v37  ;;  %v350_v54 = vadd.f32 %v686_v45, %v315_v38  ;;  %v351_v55 = vadd.f32 %v686_v45, %v316_v39  ;;  %v352_v56 = vadd.f32 %v686_v45, %v317_v41 }
  0x2f   : > { %v353_v57 = vadd.f32 %v686_v45, %v318_v42  ;;  %v354_v58 = vadd.f32 %v686_v45, %v319_v43  ;;  %v355_v1 = vadd.f32 %v686_v45, %v320_v46  ;;  %v356_v3 = vadd.f32 %v686_v45, %v321_v49  ;;  %v590_v43 = vld [vmem:[%s661_s27 + $0x68] sm:$0xff]  }
  0x30   : > { %v381_v62 = vmax.f32 %v349_v53, 0.0  ;;  %v382_v63 = vmax.f32 %v350_v54, 0.0  ;;  %v383_v0 = vmax.f32 %v351_v55, 0.0  ;;  %v384_v2 = vmax.f32 %v352_v56, 0.0  ;;  %v591_v53 = vld [vmem:[%s661_s27 + $0x70] sm:$0xff]  }
  0x31   : > { %v385_v7 = vmax.f32 %v353_v57, 0.0  ;;  %v357_v8 = vadd.f32 %v686_v45, %v322_v50  ;;  %v386_v11 = vmax.f32 %v354_v58, 0.0  ;;  %v358_v12 = vadd.f32 %v686_v45, %v323_v59 }
  0x32   : > { %414 = vst.msk [vmem:[%s698_s10] sm:$0xff] %vm413_vm3, %v381_v62  ;;  %v387_v16 = vmax.f32 %v355_v1, 0.0  ;;  %v359_v17 = vadd.f32 %v686_v45, %v324_v60  ;;  %v328_v18 = vmul.f32 %v544_v52, %v674_v29  ;;  %v388_v20 = vmax.f32 %v356_v3, 0.0  ;;  %v592_v62 = vld [vmem:[%s661_s27 + $0x78] sm:$0xff]  }
  0x33   : > { %415 = vst.msk [vmem:[%s698_s10 + $0x8] sm:$0xff] %vm413_vm3, %v382_v63  ;;  %v360_v21 = vadd.f32 %v686_v45, %v325_v4  ;;  %v329_v22 = vmul.f32 %v545_v5, %v674_v29  ;;  %v389_v25 = vmax.f32 %v357_v8, 0.0  ;;  %v361_v26 = vadd.f32 %v686_v45, %v326_v9 }
  0x34   : > { %416 = vst.msk [vmem:[%s698_s10 + $0x10] sm:$0xff] %vm413_vm3, %v383_v0  ;;  %v330_v27 = vmul.f32 %v548_v10, %v674_v29  ;;  %v556_v28 = vunpack.c.l.bf16 %v587_v15  ;;  %v390_v30 = vmax.f32 %v358_v12, 0.0  ;;  %v362_v31 = vadd.f32 %v686_v45, %v327_v13 }
  0x35   : > { %417 = vst.msk [vmem:[%s698_s10 + $0x18] sm:$0xff] %vm413_vm3, %v384_v2  ;;  %v331_v32 = vmul.f32 %v549_v14, %v674_v29  ;;  %v557_v33 = vunpack.c.h.bf16 %v587_v15  ;;  %v391_v35 = vmax.f32 %v359_v17, 0.0  ;;  %v363_v36 = vadd.f32 %v686_v45, %v328_v18 }
  0x36   : > { %418 = vst.msk [vmem:[%s698_s10 + $0x20] sm:$0xff] %vm413_vm3, %v385_v7  ;;  %v332_v37 = vmul.f32 %v552_v19, %v674_v29  ;;  %v560_v38 = vunpack.c.l.bf16 %v588_v24  ;;  %v392_v39 = vmax.f32 %v360_v21, 0.0  ;;  %v364_v40 = vadd.f32 %v686_v45, %v329_v22 }
  0x37   : > { %419 = vst.msk [vmem:[%s698_s10 + $0x28] sm:$0xff] %vm413_vm3, %v386_v11  ;;  %v333_v41 = vmul.f32 %v553_v23, %v674_v29  ;;  %v561_v42 = vunpack.c.h.bf16 %v588_v24  ;;  %v393_v44 = vmax.f32 %v361_v26, 0.0  ;;  %v365_v46 = vadd.f32 %v686_v45, %v330_v27 }
  0x38   : > { %420 = vst.msk [vmem:[%s698_s10 + $0x30] sm:$0xff] %vm413_vm3, %v387_v16  ;;  %v334_v47 = vmul.f32 %v556_v28, %v674_v29  ;;  %v564_v48 = vunpack.c.l.bf16 %v589_v34  ;;  %v394_v49 = vmax.f32 %v362_v31, 0.0  ;;  %v366_v50 = vadd.f32 %v686_v45, %v331_v32 }
  0x39   : > { %421 = vst.msk [vmem:[%s698_s10 + $0x38] sm:$0xff] %vm413_vm3, %v388_v20  ;;  %v335_v51 = vmul.f32 %v557_v33, %v674_v29  ;;  %v565_v52 = vunpack.c.h.bf16 %v589_v34  ;;  %v395_v54 = vmax.f32 %v363_v36, 0.0  ;;  %v367_v55 = vadd.f32 %v686_v45, %v332_v37 }
  0x3a   : > { %422 = vst.msk [vmem:[%s698_s10 + $0x40] sm:$0xff] %vm413_vm3, %v389_v25  ;;  %v336_v56 = vmul.f32 %v560_v38, %v674_v29  ;;  %v568_v57 = vunpack.c.l.bf16 %v590_v43  ;;  %v396_v58 = vmax.f32 %v364_v40, 0.0  ;;  %v368_v59 = vadd.f32 %v686_v45, %v333_v41 }
  0x3b   : > { %423 = vst.msk [vmem:[%s698_s10 + $0x48] sm:$0xff] %vm413_vm3, %v390_v30  ;;  %v337_v60 = vmul.f32 %v561_v42, %v674_v29  ;;  %v569_v61 = vunpack.c.h.bf16 %v590_v43  ;;  %v397_v63 = vmax.f32 %v365_v46, 0.0  ;;  %v369_v0 = vadd.f32 %v686_v45, %v334_v47 }
  0x3c   : > { %424 = vst.msk [vmem:[%s698_s10 + $0x50] sm:$0xff] %vm413_vm3, %v391_v35  ;;  %v338_v1 = vmul.f32 %v564_v48, %v674_v29  ;;  %v572_v2 = vunpack.c.l.bf16 %v591_v53  ;;  %v398_v3 = vmax.f32 %v366_v50, 0.0  ;;  %v370_v4 = vadd.f32 %v686_v45, %v335_v51 }
  0x3d   : > { %425 = vst.msk [vmem:[%s698_s10 + $0x58] sm:$0xff] %vm413_vm3, %v392_v39  ;;  %v339_v5 = vmul.f32 %v565_v52, %v674_v29  ;;  %v573_v6 = vunpack.c.h.bf16 %v591_v53  ;;  %v399_v7 = vmax.f32 %v367_v55, 0.0  ;;  %v371_v8 = vadd.f32 %v686_v45, %v336_v56 }
  0x3e   : > { %426 = vst.msk [vmem:[%s698_s10 + $0x60] sm:$0xff] %vm413_vm3, %v393_v44  ;;  %v340_v9 = vmul.f32 %v568_v57, %v674_v29  ;;  %v576_v10 = vunpack.c.l.bf16 %v592_v62  ;;  %v400_v11 = vmax.f32 %v368_v59, 0.0  ;;  %v372_v12 = vadd.f32 %v686_v45, %v337_v60 }
  0x3f   : > { %427 = vst.msk [vmem:[%s698_s10 + $0x68] sm:$0xff] %vm413_vm3, %v394_v49  ;;  %v341_v13 = vmul.f32 %v569_v61, %v674_v29  ;;  %v577_v14 = vunpack.c.h.bf16 %v592_v62  ;;  %v401_v15 = vmax.f32 %v369_v0, 0.0  ;;  %v373_v16 = vadd.f32 %v686_v45, %v338_v1 }
  0x40   : > { %428 = vst.msk [vmem:[%s698_s10 + $0x70] sm:$0xff] %vm413_vm3, %v395_v54  ;;  %v342_v17 = vmul.f32 %v572_v2, %v674_v29  ;;  %v402_v18 = vmax.f32 %v370_v4, 0.0  ;;  %v374_v19 = vadd.f32 %v686_v45, %v339_v5  ;;  %v343_v20 = vmul.f32 %v573_v6, %v674_v29 }
  0x41   : > { %429 = vst.msk [vmem:[%s698_s10 + $0x78] sm:$0xff] %vm413_vm3, %v396_v58  ;;  %v403_v21 = vmax.f32 %v371_v8, 0.0  ;;  %v375_v22 = vadd.f32 %v686_v45, %v340_v9  ;;  %v344_v23 = vmul.f32 %v576_v10, %v674_v29  ;;  %v404_v24 = vmax.f32 %v372_v12, 0.0 }
  0x42   : > { %430 = vst.msk [vmem:[%s698_s10 + $0x80] sm:$0xff] %vm413_vm3, %v397_v63  ;;  %v376_v25 = vadd.f32 %v686_v45, %v341_v13  ;;  %v345_v26 = vmul.f32 %v577_v14, %v674_v29  ;;  %v405_v27 = vmax.f32 %v373_v16, 0.0  ;;  %v377_v28 = vadd.f32 %v686_v45, %v342_v17 }
  0x43   : > { %431 = vst.msk [vmem:[%s698_s10 + $0x88] sm:$0xff] %vm413_vm3, %v398_v3  ;;  %v406_v30 = vmax.f32 %v374_v19, 0.0  ;;  %v378_v31 = vadd.f32 %v686_v45, %v343_v20  ;;  %v407_v32 = vmax.f32 %v375_v22, 0.0  ;;  %v379_v29 = vadd.f32 %v686_v45, %v344_v23 }
  0x44   : > { %432 = vst.msk [vmem:[%s698_s10 + $0x90] sm:$0xff] %vm413_vm3, %v399_v7  ;;  %v408_v33 = vmax.f32 %v376_v25, 0.0  ;;  %v380_v34 = vadd.f32 %v686_v45, %v345_v26  ;;  %v409_v35 = vmax.f32 %v377_v28, 0.0 }
  0x45   : > { %433 = vst.msk [vmem:[%s698_s10 + $0x98] sm:$0xff] %vm413_vm3, %v400_v11  ;;  %v410_v36 = vmax.f32 %v378_v31, 0.0  ;;  %v411_v37 = vmax.f32 %v379_v29, 0.0 }
  0x46   : > { %434 = vst.msk [vmem:[%s698_s10 + $0xa0] sm:$0xff] %vm413_vm3, %v401_v15  ;;  %v412_v38 = vmax.f32 %v380_v34, 0.0 }
  0x47   : > { %435 = vst.msk [vmem:[%s698_s10 + $0xa8] sm:$0xff] %vm413_vm3, %v402_v18 }
  0x48   : > { %436 = vst.msk [vmem:[%s698_s10 + $0xb0] sm:$0xff] %vm413_vm3, %v403_v21 }
  0x49   : > { %437 = vst.msk [vmem:[%s698_s10 + $0xb8] sm:$0xff] %vm413_vm3, %v404_v24 }
  0x4a   : > { %438 = vst.msk [vmem:[%s698_s10 + $0xc0] sm:$0xff] %vm413_vm3, %v405_v27 }
  0x4b   : > { %439 = vst.msk [vmem:[%s698_s10 + $0xc8] sm:$0xff] %vm413_vm3, %v406_v30 }
  0x4c   : > { %440 = vst.msk [vmem:[%s698_s10 + $0xd0] sm:$0xff] %vm413_vm3, %v407_v32 }
  0x4d   : > { %441 = vst.msk [vmem:[%s698_s10 + $0xd8] sm:$0xff] %vm413_vm3, %v408_v33 }
  0x4e   : > { %442 = vst.msk [vmem:[%s698_s10 + $0xe0] sm:$0xff] %vm413_vm3, %v409_v35 }
  0x4f   : > { %443 = vst.msk [vmem:[%s698_s10 + $0xe8] sm:$0xff] %vm413_vm3, %v410_v36 }
  0x50   : > { %444 = vst.msk [vmem:[%s698_s10 + $0xf0] sm:$0xff] %vm413_vm3, %v411_v37 }
  0x51   : > { %445 = vst.msk [vmem:[%s698_s10 + $0xf8] sm:$0xff] %vm413_vm3, %v412_v38 }
  0x52 PF: > { %s15_s18 = sadd.s32 1, %s609_s18  }
  0x53   : > { %p12_p4 = scmp.ge.s32.totalorder %s15_s18, 4  }
  0x55   :  { %14 = sbr.rel (!%p12_p4) target bundleno = 1 (0x1), region = 70 }

// kernel: conv_block_forward.3
= control target key start
LH: loop header
LB: loop body
LE: loop exit
PB: predicated region body
PF: predicated region fallthrough
CT: control target
= control target key end

     0   :  { %s2817_s15 = smov 0   ;;  %s3804_s0 = inlined_call_operand.vmem [shape: f32[2,18,18,128], index: 0, kind: input, shape index: {}]   ;;  %s3805_s1 = inlined_call_operand.vmem [shape: bf16[1152,128], index: 1, kind: input, shape index: {}]   ;;  %s3806_s2 = inlined_call_operand.vmem [shape: bf16[2,16,16,128], index: 2, kind: output, shape index: {0}]   ;;  %s3807_s3 = inlined_call_operand.vmem [shape: f32[2,1,128], index: 3, kind: output, shape index: {1}]   ;;  %s3808_s4 = inlined_call_operand.vmem [shape: f32[2,1,128], index: 4, kind: output, shape index: {2}]  }
   0x1 LB: > { %s2285_s16 = sadd.s32 4294967295, %s2790_s15   ;;  %p2289_p0 = scmp.ge.s32.totalorder %s2790_s15, 1  ;;  %s2790_s15 = sphi %s2817_s15, %s15_s15  }
   0x2   : > { %p167_p1 = scmp.lt.s32.totalorder %s2790_s15, 3 }
   0x4   : > { %p168_p2 = pnand %p2289_p0, %p167_p1 }
   0x6   : > { %171 = sbr.rel (%p168_p2) target bundleno = 766 (0x2fe), region = 28 }
   0xb   : > { %v2591_v0 = vld [vmem:[%s3805_s1 + $0x38] sm:$0xff]  ;;  %v2590_v1 = vld [vmem:[%s3805_s1 + $0x30] sm:$0xff]  ;;  %v2589_v2 = vld [vmem:[%s3805_s1 + $0x28] sm:$0xff]  ;;  %p199_p3 = scmp.lt.s32.totalorder %s2285_s16, 1  ;;  %vm461_vm0 = vcmask 1046528   ;;  %vm574_vm1 = vcmask 1045504  }
   0xc   : > { %2751 = vmatpush.bf16.msra.mxu1 %v2591_v0  ;;  %2752 = vmatpush.bf16.msra.mxu2 %v2591_v0  ;;  %v2588_v3 = vld [vmem:[%s3805_s1 + $0x20] sm:$0xff]  ;;  %v2587_v4 = vld [vmem:[%s3805_s1 + $0x18] sm:$0xff]  ;;  %v2586_v5 = vld [vmem:[%s3805_s1 + $0x10] sm:$0xff] }
   0xd   : > { %2753 = vmatpush.bf16.msra.mxu3 %v2591_v0  ;;  %1207 = vmatpush.bf16.msra.mxu0 %v2591_v0  ;;  %s3909_s16 = smov (!%p199_p3, %s2285_s16), 1  ;;  %v2585_v6 = vld [vmem:[%s3805_s1 + $0x8] sm:$0xff]  ;;  %v2584_v7 = vld [vmem:[%s3805_s1] sm:$0xff]  ;;  %v2607_v16 = vld [vmem:[%s3805_s1 + $0xb8] sm:$0xff] }
   0xe   : > { %s2775_s29 = smul.u32 432, %s3909_s16  ;;  %v2615_v17 = vld [vmem:[%s3805_s1 + $0xf8] sm:$0xff]  ;;  %v2606_v24 = vld [vmem:[%s3805_s1 + $0xb0] sm:$0xff]  ;;  %v2605_v28 = vld [vmem:[%s3805_s1 + $0xa8] sm:$0xff]  ;;  %s2583_s26 = sshll.u32 %s3909_s16, 7 }
   0xf   : > { %v2599_v22 = vld [vmem:[%s3805_s1 + $0x78] sm:$0xff]  ;;  %v2614_v25 = vld [vmem:[%s3805_s1 + $0xf0] sm:$0xff]  ;;  %v2613_v29 = vld [vmem:[%s3805_s1 + $0xe8] sm:$0xff]  ;;  %s211_s5 = scalar_lea.vmem %s3807_s3, %s3909_s16  ;;  %s214_s9 = scalar_lea.vmem %s3808_s4, %s3909_s16 }
  0x10   : > { %2754 = vmatpush.bf16.msra.mxu1 %v2590_v1  ;;  %2755 = vmatpush.bf16.msra.mxu2 %v2590_v1  ;;  %s2852_s8 = scalar_lea.vmem %s3804_s0, %s2775_s29  ;;  %v2623_v23 = vld [vmem:[%s3805_s1 + $0x138] sm:$0xff]  ;;  %v2598_v26 = vld [vmem:[%s3805_s1 + $0x70] sm:$0xff]  ;;  %v2597_v30 = vld [vmem:[%s3805_s1 + $0x68] sm:$0xff]  ;;  %s3708_s29 = scalar_lea.vmem %s3806_s2, %s2583_s26 }
  0x11   : > { %2756 = vmatpush.bf16.msra.mxu3 %v2590_v1  ;;  %1208 = vmatpush.bf16.msra.mxu0 %v2590_v1  ;;  %v2858_v8 = vld [vmem:[%s2852_s8 + $0x60] sm:$0xff]  ;;  %v2861_v9 = vld [vmem:[%s2852_s8 + $0x68] sm:$0xff]  ;;  %v2622_v27 = vld [vmem:[%s3805_s1 + $0x130] sm:$0xff] }
  0x12   : > { %v2864_v10 = vld [vmem:[%s2852_s8 + $0xc0] sm:$0xff]  ;;  %v2867_v11 = vld [vmem:[%s2852_s8 + $0xc8] sm:$0xff]  ;;  %v2889_v18 = vpack.c.bf16 %v2861_v9, %v2858_v8  ;;  %v2935_v32 = vld [vmem:[%s2852_s8 + $0x78] sm:$0xff] }
  0x13   : > { %v2870_v12 = vld [vmem:[%s2852_s8 + $0x120] sm:$0xff]  ;;  %v2873_v13 = vld [vmem:[%s2852_s8 + $0x128] sm:$0xff]  ;;  %v2893_v19 = vpack.c.bf16 %v2867_v11, %v2864_v10  ;;  %v2947_v36 = vld [vmem:[%s2852_s8 + $0xd8] sm:$0xff] }
  0x14   : > { %2757 = vmatpush.bf16.msra.mxu1 %v2589_v2  ;;  %2758 = vmatpush.bf16.msra.mxu2 %v2589_v2  ;;  %v2876_v14 = vld [vmem:[%s2852_s8] sm:$0xff]  ;;  %v2879_v15 = vld [vmem:[%s2852_s8 + $0x8] sm:$0xff]  ;;  %3830 = vst [vmem:[#allocation2_spill] sm:$0xff] %v2889_v18  ;;  %v2897_v20 = vpack.c.bf16 %v2873_v13, %v2870_v12  ;;  %v2953_v38 = vld [vmem:[%s2852_s8 + $0x138] sm:$0xff] }
  0x15   : > { %2759 = vmatpush.bf16.msra.mxu3 %v2589_v2  ;;  %1209 = vmatpush.bf16.msra.mxu0 %v2589_v2  ;;  %3831 = vst [vmem:[#allocation3_spill] sm:$0xff] %v2893_v19  ;;  %v721_v21 = vpack.c.bf16 %v2879_v15, %v2876_v14  ;;  %v2621_v31 = vld [vmem:[%s3805_s1 + $0x128] sm:$0xff]  ;;  %v2604_v33 = vld [vmem:[%s3805_s1 + $0xa0] sm:$0xff]  ;;  %v2959_v40 = vld [vmem:[%s2852_s8 + $0x18] sm:$0xff] }
  0x16   : > { %v2612_v34 = vld [vmem:[%s3805_s1 + $0xe0] sm:$0xff]  ;;  %v2603_v44 = vld [vmem:[%s3805_s1 + $0x98] sm:$0xff]  ;;  %v2602_v52 = vld [vmem:[%s3805_s1 + $0x90] sm:$0xff] }
  0x17   : > { %v2944_v35 = vld [vmem:[%s2852_s8 + $0x80] sm:$0xff]  ;;  %v2611_v45 = vld [vmem:[%s3805_s1 + $0xd8] sm:$0xff]  ;;  %v2610_v53 = vld [vmem:[%s3805_s1 + $0xd0] sm:$0xff] }
  0x18   : > { %2760 = vmatpush.bf16.msra.mxu1 %v2588_v3  ;;  %2761 = vmatpush.bf16.msra.mxu2 %v2588_v3  ;;  %v2950_v37 = vld [vmem:[%s2852_s8 + $0xe0] sm:$0xff]  ;;  %v2978_v46 = vpack.c.bf16 %v2944_v35, %v2935_v32  ;;  %v2595_v50 = vld [vmem:[%s3805_s1 + $0x58] sm:$0xff]  ;;  %v2594_v54 = vld [vmem:[%s3805_s1 + $0x50] sm:$0xff] }
  0x19   : > { %2762 = vmatpush.bf16.msra.mxu3 %v2588_v3  ;;  %1210 = vmatpush.bf16.msra.mxu0 %v2588_v3  ;;  %v2956_v39 = vld [vmem:[%s2852_s8 + $0x140] sm:$0xff]  ;;  %v2982_v47 = vpack.c.bf16 %v2950_v37, %v2947_v36  ;;  %v2619_v51 = vld [vmem:[%s3805_s1 + $0x118] sm:$0xff]  ;;  %v2618_v55 = vld [vmem:[%s3805_s1 + $0x110] sm:$0xff] }
  0x1a   : > { %v2962_v41 = vld [vmem:[%s2852_s8 + $0x20] sm:$0xff]  ;;  %3832 = vst [vmem:[#allocation4_spill] sm:$0xff] %v2978_v46  ;;  %v2986_v48 = vpack.c.bf16 %v2956_v39, %v2953_v38  ;;  %v2601_v56 = vld [vmem:[%s3805_s1 + $0x88] sm:$0xff]  ;;  %v3027_v60 = vld [vmem:[%s2852_s8 + $0x90] sm:$0xff] }
  0x1b   : > { %v2596_v42 = vld [vmem:[%s3805_s1 + $0x60] sm:$0xff]  ;;  %3833 = vst [vmem:[#allocation5_spill] sm:$0xff] %v2982_v47  ;;  %v2990_v49 = vpack.c.bf16 %v2962_v41, %v2959_v40  ;;  %v2609_v57 = vld [vmem:[%s3805_s1 + $0xc8] sm:$0xff]  ;;  %v3036_v63 = vld [vmem:[%s2852_s8 + $0x98] sm:$0xff] }
  0x1c   : > { %2763 = vmatpush.bf16.msra.mxu1 %v2587_v4  ;;  %2764 = vmatpush.bf16.msra.mxu2 %v2587_v4  ;;  %v2620_v43 = vld [vmem:[%s3805_s1 + $0x120] sm:$0xff]  ;;  %v2593_v58 = vld [vmem:[%s3805_s1 + $0x48] sm:$0xff]  ;;  %v3039_v0 = vld [vmem:[%s2852_s8 + $0xf0] sm:$0xff] }
  0x1d   : > { %2765 = vmatpush.bf16.msra.mxu3 %v2587_v4  ;;  %1211 = vmatpush.bf16.msra.mxu0 %v2587_v4  ;;  %v2617_v59 = vld [vmem:[%s3805_s1 + $0x108] sm:$0xff]  ;;  %v2600_v61 = vld [vmem:[%s3805_s1 + $0x80] sm:$0xff]  ;;  %v3042_v1 = vld [vmem:[%s2852_s8 + $0xf8] sm:$0xff] }
  0x1e   : > { %v2608_v62 = vld [vmem:[%s3805_s1 + $0xc0] sm:$0xff]  ;;  %v3045_v2 = vld [vmem:[%s2852_s8 + $0x150] sm:$0xff]  ;;  %v3048_v3 = vld [vmem:[%s2852_s8 + $0x158] sm:$0xff] }
  0x1f   : > { %v3051_v4 = vld [vmem:[%s2852_s8 + $0x30] sm:$0xff] }
  0x20   : > { %2766 = vmatpush.bf16.msra.mxu1 %v2586_v5  ;;  %2767 = vmatpush.bf16.msra.mxu2 %v2586_v5 }
  0x21   : > { %2768 = vmatpush.bf16.msra.mxu3 %v2586_v5  ;;  %1212 = vmatpush.bf16.msra.mxu0 %v2586_v5  ;;  %v3054_v5 = vld [vmem:[%s2852_s8 + $0x38] sm:$0xff] }
  0x24   : > { %2769 = vmatpush.bf16.msra.mxu1 %v2585_v6  ;;  %2770 = vmatpush.bf16.msra.mxu2 %v2585_v6 }
  0x25   : > { %2771 = vmatpush.bf16.msra.mxu3 %v2585_v6  ;;  %1213 = vmatpush.bf16.msra.mxu0 %v2585_v6  ;;  %v2592_v6 = vld [vmem:[%s3805_s1 + $0x40] sm:$0xff] }
  0x28   : > { %2772 = vmatpush.bf16.msra.mxu1 %v2584_v7  ;;  %2773 = vmatpush.bf16.msra.mxu2 %v2584_v7 }
  0x29   : > { %2774 = vmatpush.bf16.msra.mxu3 %v2584_v7  ;;  %1214 = vmatpush.bf16.msra.mxu0 %v2584_v7  ;;  %v2616_v7 = vld [vmem:[%s3805_s1 + $0x100] sm:$0xff] }
  0x2b   : > { %1235 = vmatmul.bf16.vlgmr.msra.gmra.mxu1 %v2889_v18  ;;  %1255 = vmatmul.bf16.vlgmr.msra.gmra.mxu2 %v2893_v19 }
  0x2c   : > { %1385 = vmatpush.bf16.msrb.mxu2 %v2607_v16  ;;  %1275 = vmatmul.bf16.vlgmr.msra.gmra.mxu3 %v2897_v20  ;;  %v3064_v16 = vpack.c.bf16 %v3036_v63, %v3027_v60 }
  0x2d   : > { %1474 = vmatpush.bf16.msrb.mxu3 %v2615_v17  ;;  %1215 = vmatmul.bf16.vlgmr.msra.gmra.mxu0 %v721_v21  ;;  %v3068_v17 = vpack.c.bf16 %v3042_v1, %v3039_v0  ;;  %v3072_v21 = vpack.c.bf16 %v3048_v3, %v3045_v2 }
  0x2e   : > { %1296 = vmatpush.bf16.msrb.mxu1 %v2599_v22  ;;  %1563 = vmatpush.bf16.msrb.mxu0 %v2623_v23  ;;  %3834 = vst [vmem:[#allocation6_spill] sm:$0xff] %v3064_v16  ;;  %v3076_v22 = vpack.c.bf16 %v3054_v5, %v3051_v4  ;;  %v2639_v23 = vld [vmem:[%s3805_s1 + $0x1b8] sm:$0xff] }
  0x30   : > { %1386 = vmatpush.bf16.msrb.mxu2 %v2606_v24  ;;  %v2647_v24 = vld [vmem:[%s3805_s1 + $0x1f8] sm:$0xff] }
  0x31   : > { %1475 = vmatpush.bf16.msrb.mxu3 %v2614_v25  ;;  %v2631_v25 = vld [vmem:[%s3805_s1 + $0x178] sm:$0xff] }
  0x32   : > { %1297 = vmatpush.bf16.msrb.mxu1 %v2598_v26  ;;  %1564 = vmatpush.bf16.msrb.mxu0 %v2622_v27  ;;  %v2655_v26 = vld [vmem:[%s3805_s1 + $0x238] sm:$0xff]  ;;  %v3095_v27 = vld [vmem:[%s2852_s8 + $0xa8] sm:$0xff] }
  0x34   : > { %1387 = vmatpush.bf16.msrb.mxu2 %v2605_v28  ;;  %v3098_v28 = vld [vmem:[%s2852_s8 + $0xb0] sm:$0xff] }
  0x35   : > { %1476 = vmatpush.bf16.msrb.mxu3 %v2613_v29  ;;  %v3101_v29 = vld [vmem:[%s2852_s8 + $0x108] sm:$0xff] }
  0x36   : > { %1298 = vmatpush.bf16.msrb.mxu1 %v2597_v30  ;;  %1565 = vmatpush.bf16.msrb.mxu0 %v2621_v31  ;;  %v3104_v30 = vld [vmem:[%s2852_s8 + $0x110] sm:$0xff]  ;;  %v3107_v31 = vld [vmem:[%s2852_s8 + $0x168] sm:$0xff] }
  0x38   : > { %1388 = vmatpush.bf16.msrb.mxu2 %v2604_v33  ;;  %v3110_v33 = vld [vmem:[%s2852_s8 + $0x170] sm:$0xff] }
  0x39   : > { %1477 = vmatpush.bf16.msrb.mxu3 %v2612_v34  ;;  %v3113_v34 = vld [vmem:[%s2852_s8 + $0x48] sm:$0xff] }
  0x3a   : > { %1299 = vmatpush.bf16.msrb.mxu1 %v2596_v42  ;;  %1566 = vmatpush.bf16.msrb.mxu0 %v2620_v43  ;;  %v3116_v42 = vld [vmem:[%s2852_s8 + $0x50] sm:$0xff]  ;;  %v3120_v43 = vpack.c.bf16 %v3098_v28, %v3095_v27 }
  0x3b   : > { %1240 = vmatmul.bf16.gmra.mxu1 %v2978_v46  ;;  %1260 = vmatmul.bf16.gmra.mxu2 %v2982_v47 }
  0x3c   : > { %1389 = vmatpush.bf16.msrb.mxu2 %v2603_v44  ;;  %1280 = vmatmul.bf16.gmra.mxu3 %v2986_v48  ;;  %3835 = vst [vmem:[#allocation7_spill] sm:$0xff] %v3120_v43  ;;  %v3124_v44 = vpack.c.bf16 %v3104_v30, %v3101_v29 }
  0x3d   : > { %1478 = vmatpush.bf16.msrb.mxu3 %v2611_v45  ;;  %1220 = vmatmul.bf16.gmra.mxu0 %v2990_v49  ;;  %v3128_v45 = vpack.c.bf16 %v3110_v33, %v3107_v31 }
  0x3e   : > { %1300 = vmatpush.bf16.msrb.mxu1 %v2595_v50  ;;  %1567 = vmatpush.bf16.msrb.mxu0 %v2619_v51  ;;  %v3132_v50 = vpack.c.bf16 %v3116_v42, %v3113_v34  ;;  %v217_v51 = vld [vmem:[%s2852_s8 + $0x10] sm:$0x3] }
  0x40   : > { %1390 = vmatpush.bf16.msrb.mxu2 %v2602_v52  ;;  %v220_v52 = vld [vmem:[%s2852_s8 + $0x28] sm:$0x3] }
  0x41   : > { %1479 = vmatpush.bf16.msrb.mxu3 %v2610_v53  ;;  %v462_v53 = vrot.slane %v2876_v14, 1 }
  0x42   : > { %1301 = vmatpush.bf16.msrb.mxu1 %v2594_v54  ;;  %1568 = vmatpush.bf16.msrb.mxu0 %v2618_v55  ;;  %v463_v54 = vrot.slane %v2879_v15, 1  ;;  %v575_v55 = vrot.slane %v2876_v14, 2 }
  0x44   : > { %1391 = vmatpush.bf16.msrb.mxu2 %v2601_v56  ;;  %v576_v56 = vrot.slane %v2879_v15, 2 }
  0x45   : > { %1480 = vmatpush.bf16.msrb.mxu3 %v2609_v57  ;;  %v467_v57 = vrot.slane %v2959_v40, 1 }
  0x46   : > { %1302 = vmatpush.bf16.msrb.mxu1 %v2593_v58  ;;  %1569 = vmatpush.bf16.msrb.mxu0 %v2617_v59  ;;  %v465_v58 = vrot.slane %v217_v51, 1  ;;  %v578_v59 = vrot.slane %v217_v51, 2 }
  0x48   : > { %1392 = vmatpush.bf16.msrb.mxu2 %v2600_v61  ;;  %v468_v61 = vrot.slane %v2962_v41, 1  ;;  %v579_v14 = vsel %vm574_vm1, %v576_v56, %v578_v59  ;;  %v583_v59 = vrot.slane %v220_v52, 2 }
  0x49   : > { %1481 = vmatpush.bf16.msrb.mxu3 %v2608_v62  ;;  %v470_v62 = vrot.slane %v220_v52, 1 }
  0x4a   : > { %1303 = vmatpush.bf16.msrb.mxu1 %v2592_v6  ;;  %1570 = vmatpush.bf16.msrb.mxu0 %v2616_v7  ;;  %v464_v6 = vsel %vm461_vm0, %v462_v53, %v463_v54  ;;  %v466_v7 = vsel %vm461_vm0, %v463_v54, %v465_v58  ;;  %v469_v15 = vsel %vm461_vm0, %v467_v57, %v468_v61  ;;  %v2638_v53 = vld [vmem:[%s3805_s1 + $0x1b0] sm:$0xff]  ;;  %v223_v57 = vld [vmem:[%s2852_s8 + $0x40] sm:$0x3]  ;;  %v581_v58 = vrot.slane %v2962_v41, 2 }
  0x4b   : > { %1245 = vmatmul.bf16.gmra.mxu1 %v3064_v16  ;;  %1265 = vmatmul.bf16.gmra.mxu2 %v3068_v17  ;;  %v2646_v54 = vld [vmem:[%s3805_s1 + $0x1f0] sm:$0xff] }
  0x4c   : > { %1285 = vmatmul.bf16.gmra.mxu3 %v3072_v21  ;;  %1741 = vmatpush.bf16.msra.mxu2 %v2639_v23  ;;  %v577_v23 = vsel %vm574_vm1, %v575_v55, %v576_v56  ;;  %v2630_v55 = vld [vmem:[%s3805_s1 + $0x170] sm:$0xff] }
  0x4d   : > { %1225 = vmatmul.bf16.gmra.mxu0 %v3076_v22  ;;  %1830 = vmatpush.bf16.msra.mxu3 %v2647_v24  ;;  %v471_v24 = vsel %vm461_vm0, %v468_v61, %v470_v62  ;;  %v2654_v56 = vld [vmem:[%s3805_s1 + $0x230] sm:$0xff]  ;;  %v472_v61 = vrot.slane %v3051_v4, 1  ;;  %v473_v62 = vrot.slane %v3054_v5, 1 }
  0x4e   : > { %1652 = vmatpush.bf16.msra.mxu1 %v2631_v25  ;;  %1919 = vmatpush.bf16.msra.mxu0 %v2655_v26  ;;  %v722_v25 = vpack.c.bf16 %v466_v7, %v464_v6  ;;  %v723_v26 = vpack.c.bf16 %v579_v14, %v577_v23  ;;  %v725_v51 = vpack.c.bf16 %v471_v24, %v469_v15  ;;  %v475_v6 = vrot.slane %v223_v57, 1 }
  0x4f   : > { %v584_v23 = vsel %vm574_vm1, %v581_v58, %v583_v59  ;;  %v474_v14 = vsel %vm461_vm0, %v472_v61, %v473_v62  ;;  %v482_v24 = vrot.slane %v2858_v8, 1  ;;  %v588_v59 = vrot.slane %v223_v57, 2 }
  0x50   : > { %1742 = vmatpush.bf16.msra.mxu2 %v2638_v53  ;;  %v476_v15 = vsel %vm461_vm0, %v473_v62, %v475_v6  ;;  %v478_v61 = vrot.slane %v3116_v42, 1  ;;  %v488_v57 = vrot.slane %v2944_v35, 1 }
  0x51   : > { %1831 = vmatpush.bf16.msra.mxu3 %v2646_v54  ;;  %v3178_v52 = vpack.c.bf16 %v476_v15, %v474_v14  ;;  %v596_v14 = vrot.slane %v2861_v9, 2 }
  0x52   : > { %1653 = vmatpush.bf16.msra.mxu1 %v2630_v55  ;;  %1920 = vmatpush.bf16.msra.mxu0 %v2654_v56  ;;  %v226_v56 = vld [vmem:[%s2852_s8 + $0x58] sm:$0x3] }
  0x53   : > { %v480_v62 = vrot.slane %v226_v56, 1 }
  0x5b   : > { %1250 = vmatmul.bf16.gmra.mxu1 %v3120_v43  ;;  %1270 = vmatmul.bf16.gmra.mxu2 %v3124_v44 }
  0x5c   : > { %1290 = vmatmul.bf16.gmra.mxu3 %v3128_v45 }
  0x5d   : > { %1230 = vmatmul.bf16.gmra.mxu0 %v3132_v50 }
  0x6b   : > { %1304 = vmatmul.bf16.vlgmr.msrb.gmra.mxu1 %v722_v25  ;;  %1393 = vmatmul.bf16.vlgmr.msrb.gmra.mxu2 %v723_v26  ;;  %v229_v25 = vld [vmem:[%s2852_s8 + $0x70] sm:$0x3] }
  0x6c   : > { %1482 = vmatmul.bf16.vlgmr.msrb.gmra.mxu3 %v2990_v49  ;;  %v580_v49 = vrot.slane %v2959_v40, 2  ;;  %v483_v40 = vrot.slane %v2861_v9, 1  ;;  %v485_v26 = vrot.slane %v229_v25, 1 }
  0x6d   : > { %1571 = vmatmul.bf16.vlgmr.msrb.gmra.mxu0 %v725_v51 }
  0x6e   : > { %v582_v7 = vsel %vm574_vm1, %v580_v49, %v581_v58  ;;  %v484_v53 = vsel %vm461_vm0, %v482_v24, %v483_v40  ;;  %v486_v54 = vsel %vm461_vm0, %v483_v40, %v485_v26  ;;  %v585_v49 = vrot.slane %v3051_v4, 2 }
  0x6f   : > { %v3176_v41 = vpack.c.bf16 %v584_v23, %v582_v7  ;;  %v3186_v55 = vpack.c.bf16 %v486_v54, %v484_v53  ;;  %v586_v58 = vrot.slane %v3054_v5, 2  ;;  %v595_v23 = vrot.slane %v2858_v8, 2  ;;  %v232_v53 = vld [vmem:[%s2852_s8 + $0x88] sm:$0x3] }
  0x70   : > { %v481_v4 = vsel %vm461_vm0, %v478_v61, %v480_v62  ;;  %v487_v5 = vrot.slane %v2935_v32, 1  ;;  %v598_v40 = vrot.slane %v229_v25, 2  ;;  %v2637_v25 = vld [vmem:[%s3805_s1 + $0x1a8] sm:$0xff] }
  0x71   : > { %3836 = vst [vmem:[#allocation8_spill] sm:$0xff] %v3186_v55  ;;  %v587_v6 = vsel %vm574_vm1, %v585_v49, %v586_v58  ;;  %v589_v7 = vsel %vm574_vm1, %v586_v58, %v588_v59  ;;  %v597_v54 = vsel %vm574_vm1, %v595_v23, %v596_v14  ;;  %v490_v49 = vrot.slane %v232_v53, 1  ;;  %1743 = vmatpush.bf16.msra.mxu2 %v2637_v25  ;;  %v2629_v62 = vld [vmem:[%s3805_s1 + $0x168] sm:$0xff] }
  0x72   : > { %v3201_v24 = vpack.c.bf16 %v589_v7, %v587_v6  ;;  %v599_v8 = vsel %vm574_vm1, %v596_v14, %v598_v40  ;;  %v489_v58 = vsel %vm461_vm0, %v487_v5, %v488_v57  ;;  %v590_v6 = vrot.slane %v3113_v34, 2  ;;  %1654 = vmatpush.bf16.msra.mxu1 %v2629_v62  ;;  %v2653_v14 = vld [vmem:[%s3805_s1 + $0x228] sm:$0xff] }
  0x73   : > { %v3208_v9 = vpack.c.bf16 %v599_v8, %v597_v54  ;;  %v491_v59 = vsel %vm461_vm0, %v488_v57, %v490_v49  ;;  %v591_v7 = vrot.slane %v3116_v42, 2  ;;  %v593_v23 = vrot.slane %v226_v56, 2  ;;  %1921 = vmatpush.bf16.msra.mxu0 %v2653_v14  ;;  %v235_v54 = vld [vmem:[%s2852_s8 + $0xa0] sm:$0x3]  ;;  %v238_v14 = vld [vmem:[%s2852_s8 + $0xb8] sm:$0x3] }
  0x74   : > { %v600_v5 = vrot.slane %v2935_v32, 2  ;;  %v601_v57 = vrot.slane %v2944_v35, 2  ;;  %v492_v40 = vrot.slane %v3027_v60, 1  ;;  %v603_v56 = vrot.slane %v232_v53, 2 }
  0x75   : > { %3837 = vst [vmem:[#allocation9_spill] sm:$0xff] %v3208_v9  ;;  %v605_v25 = vrot.slane %v3027_v60, 2  ;;  %v497_v62 = vrot.slane %v3095_v27, 1 }
  0x76   : > { %v602_v8 = vsel %vm574_vm1, %v600_v5, %v601_v57  ;;  %v604_v49 = vsel %vm574_vm1, %v601_v57, %v603_v56  ;;  %v500_v57 = vrot.slane %v238_v14, 1 }
  0x7b   : > { %1309 = vmatmul.bf16.gmra.mxu1 %v725_v51  ;;  %1398 = vmatmul.bf16.gmra.mxu2 %v3176_v41  ;;  %v477_v51 = vrot.slane %v3113_v34, 1  ;;  %v493_v34 = vrot.slane %v3036_v63, 1 }
  0x7c   : > { %1487 = vmatmul.bf16.gmra.mxu3 %v3076_v22 }
  0x7d   : > { %1576 = vmatmul.bf16.gmra.mxu0 %v3178_v52  ;;  %v479_v15 = vsel %vm461_vm0, %v477_v51, %v478_v61  ;;  %v3219_v51 = vpack.c.bf16 %v491_v59, %v489_v58  ;;  %v2645_v61 = vld [vmem:[%s3805_s1 + $0x1e8] sm:$0xff]  ;;  %v495_v58 = vrot.slane %v235_v54, 1  ;;  %v3243_v59 = vpack.c.bf16 %v604_v49, %v602_v8 }
  0x7e   : > { %v3203_v26 = vpack.c.bf16 %v481_v4, %v479_v15  ;;  %1832 = vmatpush.bf16.msra.mxu3 %v2645_v61  ;;  %v592_v15 = vsel %vm574_vm1, %v590_v6, %v591_v7  ;;  %v594_v4 = vsel %vm574_vm1, %v591_v7, %v593_v23  ;;  %v494_v32 = vsel %vm461_vm0, %v492_v40, %v493_v34 }
  0x7f   : > { %3838 = vst [vmem:[#allocation10_spill] sm:$0xff] %v3219_v51  ;;  %v3238_v42 = vpack.c.bf16 %v594_v4, %v592_v15  ;;  %v496_v35 = vsel %vm461_vm0, %v493_v34, %v495_v58  ;;  %v606_v61 = vrot.slane %v3036_v63, 2  ;;  %v498_v6 = vrot.slane %v3098_v28, 1  ;;  %v2636_v34 = vld [vmem:[%s3805_s1 + $0x1a0] sm:$0xff] }
  0x80   : > { %3839 = vst [vmem:[#allocation11_spill] sm:$0xff] %v3243_v59  ;;  %v3251_v53 = vpack.c.bf16 %v496_v35, %v494_v32  ;;  %v608_v7 = vrot.slane %v235_v54, 2  ;;  %v2644_v54 = vld [vmem:[%s3805_s1 + $0x1e0] sm:$0xff]  ;;  %1744 = vmatpush.bf16.msra.mxu2 %v2636_v34 }
  0x81   : > { %v607_v4 = vsel %vm574_vm1, %v605_v25, %v606_v61  ;;  %v499_v60 = vsel %vm461_vm0, %v497_v62, %v498_v6  ;;  %v501_v63 = vsel %vm461_vm0, %v498_v6, %v500_v57  ;;  %v2628_v58 = vld [vmem:[%s3805_s1 + $0x160] sm:$0xff]  ;;  %v611_v62 = vrot.slane %v3098_v28, 2 }
  0x82   : > { %3840 = vst [vmem:[#allocation12_spill] sm:$0xff] %v3251_v53  ;;  %v609_v5 = vsel %vm574_vm1, %v606_v61, %v608_v7  ;;  %v3275_v56 = vpack.c.bf16 %v501_v63, %v499_v60  ;;  %1833 = vmatpush.bf16.msra.mxu3 %v2644_v54  ;;  %1655 = vmatpush.bf16.msra.mxu1 %v2628_v58  ;;  %v2652_v25 = vld [vmem:[%s3805_s1 + $0x220] sm:$0xff]  ;;  %v610_v61 = vrot.slane %v3095_v27, 2  ;;  %v502_v7 = vrot.slane %v2864_v10, 1  ;;  %v241_v63 = vld [vmem:[%s2852_s8 + $0xd0] sm:$0x3] }
  0x83   : > { %v3264_v40 = vpack.c.bf16 %v609_v5, %v607_v4  ;;  %1922 = vmatpush.bf16.msra.mxu0 %v2652_v25  ;;  %v503_v4 = vrot.slane %v2867_v11, 1  ;;  %v613_v57 = vrot.slane %v238_v14, 2  ;;  %v505_v58 = vrot.slane %v241_v63, 1 }
  0x84   : > { %3842 = vst [vmem:[#allocation14_spill] sm:$0xff] %v3275_v56  ;;  %v612_v54 = vsel %vm574_vm1, %v610_v61, %v611_v62 }
  0x85   : > { %3841 = vst [vmem:[#allocation13_spill] sm:$0xff] %v3264_v40  ;;  %v614_v27 = vsel %vm574_vm1, %v611_v62, %v613_v57  ;;  %v504_v25 = vsel %vm461_vm0, %v502_v7, %v503_v4  ;;  %v506_v14 = vsel %vm461_vm0, %v503_v4, %v505_v58  ;;  %v616_v7 = vrot.slane %v2867_v11, 2 }
  0x86   : > { %v3309_v28 = vpack.c.bf16 %v614_v27, %v612_v54  ;;  %v615_v27 = vrot.slane %v2864_v10, 2  ;;  %v507_v58 = vrot.slane %v2947_v36, 1 }
  0x88   : > { %3845 = vst [vmem:[#allocation17_spill] sm:$0xff] %v3309_v28 }
  0x8b   : > { %1314 = vmatmul.bf16.gmra.mxu1 %v3178_v52  ;;  %1403 = vmatmul.bf16.gmra.mxu2 %v3201_v24 }
  0x8c   : > { %1492 = vmatmul.bf16.gmra.mxu3 %v3132_v50 }
  0x8d   : > { %1581 = vmatmul.bf16.gmra.mxu0 %v3203_v26 }
  0x9b   : > { %1319 = vmatmul.bf16.gmra.mxu1 %v3203_v26  ;;  %1408 = vmatmul.bf16.gmra.mxu2 %v3238_v42 }
  0x9c   : > { %1497 = vmatmul.bf16.gmra.mxu3 %v2889_v18 }
  0x9d   : > { %1586 = vmatmul.bf16.gmra.mxu0 %v3186_v55 }
  0xa8   : > { %v3257_v23 = vpop.f32.mrf.mxu1 }
  0xaa   : > { %v3260_v15 = vpop.f32.mrf.mxu0 }
  0xab   : > { %1324 = vmatmul.bf16.gmra.mxu1 %v3186_v55  ;;  %1413 = vmatmul.bf16.gmra.mxu2 %v3208_v9 }
  0xac   : > { %1502 = vmatmul.bf16.gmra.mxu3 %v2978_v46 }
  0xad   : > { %1591 = vmatmul.bf16.gmra.mxu0 %v3219_v51 }
  0xae   : > { %v3280_v8 = vpop.f32.mrf.mxu2 }
  0xaf   : > { %v3282_v49 = vpop.f32.mrf.mxu3 }
  0xb0   : > { %3843 = vst [vmem:[#allocation15_spill] sm:$0xff] %v3282_v49  ;;  %v3287_v32 = vpop.f32.mrf.mxu1  ;;  %v508_v49 = vrot.slane %v2950_v37, 1 }
  0xb2   : > { %v3289_v35 = vpop.f32.mrf.mxu0  ;;  %v509_v9 = vsel %vm461_vm0, %v507_v58, %v508_v49 }
  0xb6   : > { %v3296_v6 = vpop.f32.mrf.mxu2 }
  0xb7   : > { %v3300_v5 = vpop.f32.mrf.mxu3 }
  0xb8   : > { %3844 = vst [vmem:[#allocation16_spill] sm:$0xff] %v3300_v5  ;;  %v3302_v60 = vpop.f32.mrf.mxu1  ;;  %v3317_v5 = vpack.c.bf16 %v506_v14, %v504_v25  ;;  %v618_v14 = vrot.slane %v241_v63, 2 }
  0xba   : > { %v3305_v34 = vpop.f32.mrf.mxu0  ;;  %3846 = vst [vmem:[#allocation18_spill] sm:$0xff] %v3317_v5  ;;  %v619_v10 = vsel %vm574_vm1, %v616_v7, %v618_v14 }
  0xbb   : > { %1329 = vmatmul.bf16.gmra.mxu1 %v3219_v51  ;;  %1418 = vmatmul.bf16.gmra.mxu2 %v3243_v59  ;;  %v617_v51 = vsel %vm574_vm1, %v615_v27, %v616_v7  ;;  %v2635_v27 = vld [vmem:[%s3805_s1 + $0x198] sm:$0xff] }
  0xbc   : > { %1507 = vmatmul.bf16.gmra.mxu3 %v3064_v16  ;;  %v3342_v11 = vpack.c.bf16 %v619_v10, %v617_v51  ;;  %v2643_v51 = vld [vmem:[%s3805_s1 + $0x1d8] sm:$0xff]  ;;  %1745 = vmatpush.bf16.msra.mxu2 %v2635_v27  ;;  %v621_v27 = vrot.slane %v2950_v37, 2 }
  0xbd   : > { %1596 = vmatmul.bf16.gmra.mxu0 %v3251_v53  ;;  %1834 = vmatpush.bf16.msra.mxu3 %v2643_v51  ;;  %v2651_v10 = vld [vmem:[%s3805_s1 + $0x218] sm:$0xff] }
  0xbe   : > { %v3319_v61 = vpop.f32.mrf.mxu2  ;;  %3850 = vst [vmem:[#allocation22_spill] sm:$0xff] %v3342_v11  ;;  %1923 = vmatpush.bf16.msra.mxu0 %v2651_v10 }
  0xbf   : > { %v3321_v62 = vpop.f32.mrf.mxu3 }
  0xc0   : > { %3847 = vst [vmem:[#allocation19_spill] sm:$0xff] %v3321_v62  ;;  %v3323_v57 = vpop.f32.mrf.mxu1  ;;  %v244_v62 = vld [vmem:[%s2852_s8 + $0xe8] sm:$0x3] }
  0xc1   : > { %v510_v46 = vrot.slane %v244_v62, 1 }
  0xc2   : > { %v3325_v54 = vpop.f32.mrf.mxu0 }
  0xc3   : > { %v511_v63 = vsel %vm461_vm0, %v508_v49, %v510_v46 }
  0xc4   : > { %v3353_v7 = vpack.c.bf16 %v511_v63, %v509_v9  ;;  %v2627_v9 = vld [vmem:[%s3805_s1 + $0x158] sm:$0xff]  ;;  %v620_v63 = vrot.slane %v2947_v36, 2 }
  0xc5   : > { %1656 = vmatpush.bf16.msra.mxu1 %v2627_v9 }
  0xc6   : > { %v3329_v4 = vpop.f32.mrf.mxu2  ;;  %v622_v9 = vsel %vm574_vm1, %v620_v63, %v621_v27 }
  0xc7   : > { %3848 = vst [vmem:[#allocation20_spill] sm:$0xff] %v3329_v4  ;;  %v3333_v25 = vpop.f32.mrf.mxu3 }
  0xc8   : > { %3849 = vst [vmem:[#allocation21_spill] sm:$0xff] %v3333_v25  ;;  %v3335_v16 = vpop.f32.mrf.mxu1  ;;  %v513_v25 = vrot.slane %v3042_v1, 1 }
  0xca   : > { %v3338_v59 = vpop.f32.mrf.mxu0 }
  0xcb   : > { %1334 = vmatmul.bf16.gmra.mxu1 %v3251_v53  ;;  %1423 = vmatmul.bf16.gmra.mxu2 %v3264_v40  ;;  %v623_v40 = vrot.slane %v244_v62, 2 }
  0xcc   : > { %1512 = vmatmul.bf16.gmra.mxu3 %v3120_v43 }
  0xcd   : > { %1601 = vmatmul.bf16.gmra.mxu0 %v3275_v56  ;;  %v624_v36 = vsel %vm574_vm1, %v621_v27, %v623_v40 }
  0xce   : > { %v3358_v14 = vpop.f32.mrf.mxu2  ;;  %v3387_v37 = vpack.c.bf16 %v624_v36, %v622_v9  ;;  %v625_v36 = vrot.slane %v3039_v0, 2 }
  0xcf   : > { %3851 = vst [vmem:[#allocation23_spill] sm:$0xff] %v3358_v14  ;;  %v3360_v46 = vpop.f32.mrf.mxu3  ;;  %v247_v14 = vld [vmem:[%s2852_s8 + $0x100] sm:$0x3] }
  0xd0   : > { %3852 = vst [vmem:[#allocation24_spill] sm:$0xff] %v3360_v46  ;;  %v3362_v49 = vpop.f32.mrf.mxu1  ;;  %v512_v46 = vrot.slane %v3039_v0, 1  ;;  %v515_v10 = vrot.slane %v247_v14, 1 }
  0xd2   : > { %v3364_v58 = vpop.f32.mrf.mxu0  ;;  %v516_v62 = vsel %vm461_vm0, %v513_v25, %v515_v10  ;;  %v517_v10 = vrot.slane %v3101_v29, 1 }
  0xd6   : > { %v3374_v51 = vpop.f32.mrf.mxu2 }
  0xd7   : > { %3853 = vst [vmem:[#allocation25_spill] sm:$0xff] %v3374_v51  ;;  %v3378_v43 = vpop.f32.mrf.mxu3  ;;  %v514_v51 = vsel %vm461_vm0, %v512_v46, %v513_v25  ;;  %v626_v46 = vrot.slane %v3042_v1, 2 }
  0xd8   : > { %3854 = vst [vmem:[#allocation26_spill] sm:$0xff] %v3378_v43  ;;  %v3380_v53 = vpop.f32.mrf.mxu1  ;;  %v3395_v43 = vpack.c.bf16 %v516_v62, %v514_v51  ;;  %v628_v62 = vrot.slane %v247_v14, 2 }
  0xd9   : > { %v627_v18 = vsel %vm574_vm1, %v625_v36, %v626_v46 }
  0xda   : > { %v3383_v55 = vpop.f32.mrf.mxu0  ;;  %v629_v0 = vsel %vm574_vm1, %v626_v46, %v628_v62 }
  0xdb   : > { %1339 = vmatmul.bf16.gmra.mxu1 %v3275_v56  ;;  %1428 = vmatmul.bf16.gmra.mxu2 %v3309_v28  ;;  %v250_v56 = vld [vmem:[%s2852_s8 + $0x118] sm:$0x3]  ;;  %v3417_v1 = vpack.c.bf16 %v629_v0, %v627_v18  ;;  %v2642_v18 = vld [vmem:[%s3805_s1 + $0x1d0] sm:$0xff] }
  0xdc   : > { %1517 = vmatmul.bf16.gmra.mxu3 %v2893_v19  ;;  %v518_v19 = vrot.slane %v3104_v30, 1  ;;  %v520_v4 = vrot.slane %v250_v56, 1 }
  0xdd   : > { %1606 = vmatmul.bf16.gmra.mxu0 %v3317_v5  ;;  %1835 = vmatpush.bf16.msra.mxu3 %v2642_v18  ;;  %v631_v18 = vrot.slane %v3104_v30, 2 }
  0xde   : > { %v3397_v63 = vpop.f32.mrf.mxu2  ;;  %v521_v14 = vsel %vm461_vm0, %v518_v19, %v520_v4 }
  0xdf   : > { %3855 = vst [vmem:[#allocation27_spill] sm:$0xff] %v3397_v63  ;;  %v3399_v40 = vpop.f32.mrf.mxu3 }
  0xe0   : > { %3856 = vst [vmem:[#allocation28_spill] sm:$0xff] %v3399_v40  ;;  %v3401_v27 = vpop.f32.mrf.mxu1 }
  0xe2   : > { %v3403_v9 = vpop.f32.mrf.mxu0 }
  0xe6   : > { %v3407_v25 = vpop.f32.mrf.mxu2 }
  0xe7   : > { %3857 = vst [vmem:[#allocation29_spill] sm:$0xff] %v3407_v25  ;;  %v3411_v51 = vpop.f32.mrf.mxu3  ;;  %v519_v25 = vsel %vm461_vm0, %v517_v10, %v518_v19 }
  0xe8   : > { %3858 = vst [vmem:[#allocation30_spill] sm:$0xff] %v3411_v51  ;;  %v1305_v28 = vpop.f32.mrf.mxu1  ;;  %v633_v51 = vrot.slane %v250_v56, 2 }
  0xe9   : > { %v1306_v40 = vadd.f32 %v1305_v28, %v3260_v15  ;;  %v2634_v15 = vld [vmem:[%s3805_s1 + $0x190] sm:$0xff]  ;;  %v3428_v28 = vpack.c.bf16 %v521_v14, %v519_v25 }
  0xea   : > { %v1572_v63 = vpop.f32.mrf.mxu0  ;;  %1746 = vmatpush.bf16.msra.mxu2 %v2634_v15  ;;  %v2626_v25 = vld [vmem:[%s3805_s1 + $0x150] sm:$0xff] }
  0xeb   : > { %1344 = vmatmul.bf16.gmra.mxu1 %v3317_v5  ;;  %1433 = vmatmul.bf16.gmra.mxu2 %v3342_v11  ;;  %v2650_v14 = vld [vmem:[%s3805_s1 + $0x210] sm:$0xff] }
  0xec   : > { %1522 = vmatmul.bf16.gmra.mxu3 %v2982_v47  ;;  %1657 = vmatpush.bf16.msra.mxu1 %v2626_v25  ;;  %v253_v11 = vld [vmem:[%s2852_s8 + $0x130] sm:$0x3] }
  0xed   : > { %1611 = vmatmul.bf16.gmra.mxu0 %v3353_v7  ;;  %v525_v30 = vrot.slane %v253_v11, 1 }
  0xee   : > { %v1394_v36 = vpop.f32.mrf.mxu2  ;;  %1924 = vmatpush.bf16.msra.mxu0 %v2650_v14 }
  0xef   : > { %v1395_v46 = vadd.f32 %v1394_v36, %v1306_v40  ;;  %v1483_v10 = vpop.f32.mrf.mxu3  ;;  %v630_v40 = vrot.slane %v3101_v29, 2  ;;  %v634_v29 = vsel %vm574_vm1, %v631_v18, %v633_v51 }
  0xf0   : > { %v1307_v19 = vpop.f32.mrf.mxu1 }
  0xf1   : > { %v1484_v4 = vadd.f32 %v1483_v10, %v1395_v46  ;;  %v1308_v62 = vadd.f32 %v1307_v19, %v3289_v35  ;;  %v522_v35 = vrot.slane %v2870_v12, 1  ;;  %v523_v46 = vrot.slane %v2873_v13, 1 }
  0xf2   : > { %v1574_v0 = vpop.f32.mrf.mxu0 }
  0xf3   : > { %v3440_v15 = vadd.f32 %v1572_v63, %v1484_v4  ;;  %v632_v63 = vsel %vm574_vm1, %v630_v40, %v631_v18 }
  0xf4   : > { %v3450_v4 = vpack.c.bf16 %v634_v29, %v632_v63 }
  0xf6   : > { %v1396_v36 = vpop.f32.mrf.mxu2 }
  0xf7   : > { %v1397_v10 = vadd.f32 %v1396_v36, %v1308_v62  ;;  %v1485_v19 = vpop.f32.mrf.mxu3  ;;  %v524_v62 = vsel %vm461_vm0, %v522_v35, %v523_v46 }
  0xf8   : > { %v1310_v47 = vpop.f32.mrf.mxu1 }
  0xf9   : > { %v1486_v5 = vadd.f32 %v1485_v19, %v1397_v10  ;;  %v1311_v25 = vadd.f32 %v1310_v47, %v3305_v34  ;;  %v526_v47 = vsel %vm461_vm0, %v523_v46, %v525_v30  ;;  %v527_v46 = vrot.slane %v2953_v38, 1 }
  0xfa   : > { %v1577_v14 = vpop.f32.mrf.mxu0  ;;  %v3460_v34 = vpack.c.bf16 %v526_v47, %v524_v62  ;;  %v528_v30 = vrot.slane %v2956_v39, 1  ;;  %v638_v47 = vrot.slane %v253_v11, 2 }
  0xfb   : > { %1349 = vmatmul.bf16.gmra.mxu1 %v3353_v7  ;;  %1438 = vmatmul.bf16.gmra.mxu2 %v3387_v37  ;;  %v3455_v56 = vadd.f32 %v1574_v0, %v1486_v5  ;;  %v635_v5 = vrot.slane %v2870_v12, 2  ;;  %v636_v0 = vrot.slane %v2873_v13, 2 }
  0xfc   : > { %1527 = vmatmul.bf16.gmra.mxu3 %v3068_v17 }
  0xfd   : > { %3859 = vst [vmem:[#allocation31_spill] sm:$0xff] %v3455_v56  ;;  %1616 = vmatmul.bf16.gmra.mxu0 %v3395_v43  ;;  %v256_v56 = vld [vmem:[%s2852_s8 + $0x148] sm:$0x3]  ;;  %v639_v12 = vsel %vm574_vm1, %v636_v0, %v638_v47 }
  0xfe   : > { %v1399_v51 = vpop.f32.mrf.mxu2  ;;  %v530_v13 = vrot.slane %v256_v56, 1 }
  0xff   : > { %v1400_v40 = vadd.f32 %v1399_v51, %v1311_v25  ;;  %v1488_v18 = vpop.f32.mrf.mxu3 }
 0x100   : > { %v1312_v36 = vpop.f32.mrf.mxu1 }
 0x101   : > { %v1489_v10 = vadd.f32 %v1488_v18, %v1400_v40  ;;  %v1313_v19 = vadd.f32 %v1312_v36, %v3325_v54 }
 0x102   : > { %v1579_v63 = vpop.f32.mrf.mxu0 }
 0x103   : > { %v3463_v35 = vadd.f32 %v1577_v14, %v1489_v10  ;;  %v637_v14 = vsel %vm574_vm1, %v635_v5, %v636_v0  ;;  %v529_v10 = vsel %vm461_vm0, %v527_v46, %v528_v30  ;;  %v2641_v5 = vld [vmem:[%s3805_s1 + $0x1c8] sm:$0xff] }
 0x104   : > { %v3473_v36 = vpack.c.bf16 %v639_v12, %v637_v14  ;;  %1836 = vmatpush.bf16.msra.mxu3 %v2641_v5  ;;  %v641_v12 = vrot.slane %v2956_v39, 2  ;;  %v643_v5 = vrot.slane %v256_v56, 2 }
 0x106   : > { %v1401_v29 = vpop.f32.mrf.mxu2 }
 0x107   : > { %v1402_v62 = vadd.f32 %v1401_v29, %v1313_v19  ;;  %v1490_v25 = vpop.f32.mrf.mxu3  ;;  %v531_v19 = vsel %vm461_vm0, %v528_v30, %v530_v13  ;;  %v2625_v30 = vld [vmem:[%s3805_s1 + $0x148] sm:$0xff] }
 0x108   : > { %v1315_v51 = vpop.f32.mrf.mxu1  ;;  %v3489_v0 = vpack.c.bf16 %v531_v19, %v529_v10  ;;  %1658 = vmatpush.bf16.msra.mxu1 %v2625_v30  ;;  %v533_v10 = vrot.slane %v3048_v3, 1 }
 0x109   : > { %v1491_v40 = vadd.f32 %v1490_v25, %v1402_v62  ;;  %v1316_v54 = vadd.f32 %v1315_v51, %v3338_v59  ;;  %v2633_v59 = vld [vmem:[%s3805_s1 + $0x188] sm:$0xff] }
 0x10a   : > { %v1582_v18 = vpop.f32.mrf.mxu0  ;;  %1747 = vmatpush.bf16.msra.mxu2 %v2633_v59 }
 0x10b   : > { %1354 = vmatmul.bf16.gmra.mxu1 %v3395_v43  ;;  %1443 = vmatmul.bf16.gmra.mxu2 %v3417_v1  ;;  %v3478_v11 = vadd.f32 %v1579_v63, %v1491_v40  ;;  %v2649_v40 = vld [vmem:[%s3805_s1 + $0x208] sm:$0xff] }
 0x10c   : > { %1532 = vmatmul.bf16.gmra.mxu3 %v3124_v44  ;;  %1925 = vmatpush.bf16.msra.mxu0 %v2649_v40 }
 0x10d   : > { %1621 = vmatmul.bf16.gmra.mxu0 %v3428_v28 }
 0x10e   : > { %v1404_v29 = vpop.f32.mrf.mxu2 }
 0x10f   : > { %v1405_v63 = vadd.f32 %v1404_v29, %v1316_v54  ;;  %v1493_v46 = vpop.f32.mrf.mxu3  ;;  %v640_v54 = vrot.slane %v2953_v38, 2  ;;  %v644_v38 = vsel %vm574_vm1, %v641_v12, %v643_v5 }
 0x110   : > { %v1317_v62 = vpop.f32.mrf.mxu1 }
 0x111   : > { %v1494_v25 = vadd.f32 %v1493_v46, %v1405_v63  ;;  %v1318_v47 = vadd.f32 %v1317_v62, %v3364_v58  ;;  %v532_v58 = vrot.slane %v3045_v2, 1  ;;  %v259_v63 = vld [vmem:[%s2852_s8 + $0x160] sm:$0x3] }
 0x112   : > { %v1584_v51 = vpop.f32.mrf.mxu0  ;;  %v535_v39 = vrot.slane %v259_v63, 1 }
 0x113   : > { %v3498_v14 = vadd.f32 %v1582_v18, %v1494_v25  ;;  %v642_v18 = vsel %vm574_vm1, %v640_v54, %v641_v12 }
 0x114   : > { %v3508_v25 = vpack.c.bf16 %v644_v38, %v642_v18  ;;  %v538_v38 = vrot.slane %v3110_v33, 1 }
 0x116   : > { %v1406_v13 = vpop.f32.mrf.mxu2 }
 0x117   : > { %v1407_v59 = vadd.f32 %v1406_v13, %v1318_v47  ;;  %v1495_v19 = vpop.f32.mrf.mxu3  ;;  %v534_v47 = vsel %vm461_vm0, %v532_v58, %v533_v10 }
 0x118   : > { %v1320_v29 = vpop.f32.mrf.mxu1 }
 0x119   : > { %v1496_v46 = vadd.f32 %v1495_v19, %v1407_v59  ;;  %v1321_v62 = vadd.f32 %v1320_v29, %v3383_v55  ;;  %v536_v55 = vsel %vm461_vm0, %v533_v10, %v535_v39  ;;  %v537_v10 = vrot.slane %v3107_v31, 1 }
 0x11a   : > { %v1587_v30 = vpop.f32.mrf.mxu0  ;;  %v3518_v40 = vpack.c.bf16 %v536_v55, %v534_v47  ;;  %v648_v47 = vrot.slane %v259_v63, 2  ;;  %v2632_v63 = vld [vmem:[%s3805_s1 + $0x180] sm:$0xff] }
 0x11b   : > { %1359 = vmatmul.bf16.gmra.mxu1 %v3428_v28  ;;  %1448 = vmatmul.bf16.gmra.mxu2 %v3450_v4  ;;  %v3513_v56 = vadd.f32 %v1584_v51, %v1496_v46  ;;  %v645_v51 = vrot.slane %v3045_v2, 2  ;;  %v646_v46 = vrot.slane %v3048_v3, 2  ;;  %v539_v3 = vsel %vm461_vm0, %v537_v10, %v538_v38 }
 0x11c   : > { %1537 = vmatmul.bf16.gmra.mxu3 %v2897_v20  ;;  %1748 = vmatpush.bf16.msra.mxu2 %v2632_v63 }
 0x11d   : > { %1626 = vmatmul.bf16.gmra.mxu0 %v3460_v34 }
 0x11e   : > { %v1409_v54 = vpop.f32.mrf.mxu2 }
 0x11f   : > { %v1410_v12 = vadd.f32 %v1409_v54, %v1321_v62  ;;  %v1498_v13 = vpop.f32.mrf.mxu3  ;;  %v262_v54 = vld [vmem:[%s2852_s8 + $0x178] sm:$0x3] }
 0x120   : > { %v1322_v59 = vpop.f32.mrf.mxu1  ;;  %v540_v2 = vrot.slane %v262_v54, 1 }
 0x121   : > { %v1499_v19 = vadd.f32 %v1498_v13, %v1410_v12  ;;  %v1323_v5 = vadd.f32 %v1322_v59, %v3403_v9  ;;  %v647_v9 = vsel %vm574_vm1, %v645_v51, %v646_v46  ;;  %v2640_v51 = vld [vmem:[%s3805_s1 + $0x1c0] sm:$0xff] }
 0x122   : > { %v1589_v29 = vpop.f32.mrf.mxu0  ;;  %1837 = vmatpush.bf16.msra.mxu3 %v2640_v51  ;;  %v653_v51 = vrot.slane %v262_v54, 2 }
 0x123   : > { %v3521_v58 = vadd.f32 %v1587_v30, %v1499_v19  ;;  %v649_v30 = vsel %vm574_vm1, %v646_v46, %v648_v47 }
 0x124   : > { %v3530_v59 = vpack.c.bf16 %v649_v30, %v647_v9  ;;  %v2648_v9 = vld [vmem:[%s3805_s1 + $0x200] sm:$0xff]  ;;  %v651_v30 = vrot.slane %v3110_v33, 2 }
 0x125   : > { %1926 = vmatpush.bf16.msra.mxu0 %v2648_v9 }
 0x126   : > { %v1411_v18 = vpop.f32.mrf.mxu2 }
 0x127   : > { %v1412_v39 = vadd.f32 %v1411_v18, %v1323_v5  ;;  %v1500_v62 = vpop.f32.mrf.mxu3  ;;  %v541_v5 = vsel %vm461_vm0, %v538_v38, %v540_v2  ;;  %v2624_v38 = vld [vmem:[%s3805_s1 + $0x140] sm:$0xff] }
 0x128   : > { %v1325_v55 = vpop.f32.mrf.mxu1  ;;  %v3547_v18 = vpack.c.bf16 %v541_v5, %v539_v3  ;;  %1659 = vmatpush.bf16.msra.mxu1 %v2624_v38  ;;  %v654_v38 = vsel %vm574_vm1, %v651_v30, %v653_v51 }
 0x129   : > { %v1501_v12 = vadd.f32 %v1500_v62, %v1412_v39  ;;  %v1326_v46 = vadd.f32 %v1325_v55, %v3257_v23  ;;  %v650_v55 = vrot.slane %v3107_v31, 2 }
 0x12a   : > { %v1592_v13 = vpop.f32.mrf.mxu0 }
 0x12b   : > { %1364 = vmatmul.bf16.gmra.mxu1 %v3460_v34  ;;  %1453 = vmatmul.bf16.gmra.mxu2 %v3473_v36  ;;  %v3535_v19 = vadd.f32 %v1589_v29, %v1501_v12 }
 0x12c   : > { %1542 = vmatmul.bf16.gmra.mxu3 %v2986_v48 }
 0x12d   : > { %1631 = vmatmul.bf16.gmra.mxu0 %v3489_v0 }
 0x12e   : > { %v1414_v29 = vpop.f32.mrf.mxu2 }
 0x12f   : > { %v1415_v10 = vadd.f32 %v1414_v29, %v1326_v46  ;;  %v1503_v39 = vpop.f32.mrf.mxu3 }
 0x130   : > { %v1327_v62 = vpop.f32.mrf.mxu1 }
 0x131   : > { %v1504_v47 = vadd.f32 %v1503_v39, %v1415_v10  ;;  %v1328_v2 = vadd.f32 %v1327_v62, %v3287_v32  ;;  %v652_v39 = vsel %vm574_vm1, %v650_v55, %v651_v30 }
 0x132   : > { %v1594_v12 = vpop.f32.mrf.mxu0  ;;  %v3562_v9 = vpack.c.bf16 %v654_v38, %v652_v39  ;;  %v3585_v39 = vld [vmem:[%s2852_s8 + $0x188] sm:$0xff]  ;;  %v3588_v38 = vld [vmem:[%s2852_s8 + $0x190] sm:$0x3] }
 0x133   : > { %v3555_v23 = vadd.f32 %v1592_v13, %v1504_v47 }
 0x136   : > { %v1416_v3 = vpop.f32.mrf.mxu2 }
 0x137   : > { %v1417_v63 = vadd.f32 %v1416_v3, %v1328_v2  ;;  %v1505_v5 = vpop.f32.mrf.mxu3 }
 0x138   : > { %v1330_v46 = vpop.f32.mrf.mxu1 }
 0x139   : > { %v1506_v29 = vadd.f32 %v1505_v5, %v1417_v63  ;;  %v1331_v33 = vadd.f32 %v1330_v46, %v3302_v60 }
 0x13a   : > { %v1597_v10 = vpop.f32.mrf.mxu0 }
 0x13b   : > { %1369 = vmatmul.bf16.gmra.mxu1 %v3489_v0  ;;  %1458 = vmatmul.bf16.gmra.mxu2 %v3508_v25  ;;  %v3566_v31 = vadd.f32 %v1594_v12, %v1506_v29 }
 0x13c   : > { %1547 = vmatmul.bf16.gmra.mxu3 %v3072_v21 }
 0x13d   : > { %1636 = vmatmul.bf16.gmra.mxu0 %v3518_v40 }
 0x13e   : > { %v1419_v32 = vpop.f32.mrf.mxu2 }
 0x13f   : > { %v1420_v54 = vadd.f32 %v1419_v32, %v1331_v33  ;;  %v1508_v13 = vpop.f32.mrf.mxu3 }
 0x140   : > { %v1332_v62 = vpop.f32.mrf.mxu1 }
 0x141   : > { %v1509_v47 = vadd.f32 %v1508_v13, %v1420_v54  ;;  %v1333_v2 = vadd.f32 %v1332_v62, %v3323_v57 }
 0x142   : > { %v1599_v55 = vpop.f32.mrf.mxu0 }
 0x143   : > { %v3571_v30 = vadd.f32 %v1597_v10, %v1509_v47  ;;  %v3582_v10 = vld [vmem:[%s2852_s8 + $0x180] sm:$0xff] }
 0x144   : > { %v690_v47 = vrot.slane %v3582_v10, 1 }
 0x145   : > { %3860 = vst [vmem:[#allocation32_spill] sm:$0xff] %v3571_v30 }
 0x146   : > { %v1421_v12 = vpop.f32.mrf.mxu2 }
 0x147   : > { %v1422_v3 = vadd.f32 %v1421_v12, %v1333_v2  ;;  %v1510_v63 = vpop.f32.mrf.mxu3  ;;  %v693_v2 = vrot.slane %v3588_v38, 1 }
 0x148   : > { %v1335_v5 = vpop.f32.mrf.mxu1 }
 0x149   : > { %v1511_v51 = vadd.f32 %v1510_v63, %v1422_v3  ;;  %v1336_v46 = vadd.f32 %v1335_v5, %v3335_v16 }
 0x14a   : > { %v1602_v29 = vpop.f32.mrf.mxu0 }
 0x14b   : > { %1374 = vmatmul.bf16.gmra.mxu1 %v3518_v40  ;;  %1463 = vmatmul.bf16.gmra.mxu2 %v3530_v59  ;;  %v3576_v60 = vadd.f32 %v1599_v55, %v1511_v51  ;;  %v691_v55 = vrot.slane %v3585_v39, 1 }
 0x14c   : > { %1552 = vmatmul.bf16.gmra.mxu3 %v3128_v45 }
 0x14d   : > { %3861 = vst [vmem:[#allocation33_spill] sm:$0xff] %v3576_v60  ;;  %1641 = vmatmul.bf16.gmra.mxu0 %v3547_v18  ;;  %v692_v3 = vsel %vm461_vm0, %v690_v47, %v691_v55  ;;  %v694_v63 = vsel %vm461_vm0, %v691_v55, %v693_v2 }
 0x14e   : > { %v1424_v57 = vpop.f32.mrf.mxu2 }
 0x14f   : > { %v1425_v33 = vadd.f32 %v1424_v57, %v1336_v46  ;;  %v1513_v32 = vpop.f32.mrf.mxu3 }
 0x150   : > { %v1337_v54 = vpop.f32.mrf.mxu1 }
 0x151   : > { %v1514_v13 = vadd.f32 %v1513_v32, %v1425_v33  ;;  %v1338_v16 = vadd.f32 %v1337_v54, %v3362_v49  ;;  %v3600_v33 = vpack.c.bf16 %v3585_v39, %v3582_v10  ;;  %v3602_v32 = vpack.c.bf16 %v694_v63, %v692_v3 }
 0x152   : > { %v1604_v62 = vpop.f32.mrf.mxu0 }
 0x153   : > { %v3593_v12 = vadd.f32 %v1602_v29, %v1514_v13 }
 0x156   : > { %v1426_v5 = vpop.f32.mrf.mxu2 }
 0x157   : > { %v1427_v51 = vadd.f32 %v1426_v5, %v1338_v16  ;;  %v1515_v46 = vpop.f32.mrf.mxu3 }
 0x158   : > { %v1340_v57 = vpop.f32.mrf.mxu1 }
 0x159   : > { %v1516_v60 = vadd.f32 %v1515_v46, %v1427_v51  ;;  %v1341_v29 = vadd.f32 %v1340_v57, %v3380_v53 }
 0x15a   : > { %v1607_v30 = vpop.f32.mrf.mxu0 }
 0x15b   : > { %1379 = vmatmul.bf16.gmra.mxu1 %v3547_v18  ;;  %1468 = vmatmul.bf16.gmra.mxu2 %v3562_v9  ;;  %v3606_v49 = vadd.f32 %v1604_v62, %v1516_v60 }
 0x15c   : > { %1557 = vmatmul.bf16.gmra.mxu3 %v3600_v33 }
 0x15d   : > { %3862 = vst [vmem:[#allocation34_spill] sm:$0xff] %v3606_v49  ;;  %1646 = vmatmul.bf16.gmra.mxu0 %v3602_v32 }
 0x15e   : > { %v1429_v54 = vpop.f32.mrf.mxu2 }
 0x15f   : > { %v1430_v13 = vadd.f32 %v1429_v54, %v1341_v29  ;;  %v1518_v47 = vpop.f32.mrf.mxu3 }
 0x160   : > { %v1342_v55 = vpop.f32.mrf.mxu1 }
 0x161   : > { %v1519_v2 = vadd.f32 %v1518_v47, %v1430_v13  ;;  %v1343_v63 = vadd.f32 %v1342_v55, %v3401_v27 }
 0x162   : > { %v1609_v16 = vpop.f32.mrf.mxu0 }
 0x163   : > { %v3611_v3 = vadd.f32 %v1607_v30, %v1519_v2 }
 0x166   : > { %v1431_v5 = vpop.f32.mrf.mxu2 }
 0x167   : > { %v1432_v51 = vadd.f32 %v1431_v5, %v1343_v63  ;;  %v1520_v60 = vpop.f32.mrf.mxu3 }
 0x168   : > { %v1345_v62 = vpop.f32.mrf.mxu1 }
 0x169   : > { %v1521_v46 = vadd.f32 %v1520_v60, %v1432_v51  ;;  %v1346_v30 = vadd.f32 %v1345_v62, %v3280_v8 }
 0x16a   : > { %v1612_v49 = vpop.f32.mrf.mxu0 }
 0x16b   : > { %1660 = vmatmul.bf16.vlgmr.msra.gmra.mxu1 %v3176_v41  ;;  %1749 = vmatmul.bf16.vlgmr.msra.gmra.mxu2 %v3076_v22  ;;  %v3616_v53 = vadd.f32 %v1609_v16, %v1521_v46 }
 0x16c   : > { %1838 = vmatmul.bf16.vlgmr.msra.gmra.mxu3 %v3178_v52 }
 0x16d   : > { %1927 = vmatmul.bf16.vlgmr.msra.gmra.mxu0 %v3201_v24 }
 0x16e   : > { %v1434_v57 = vpop.f32.mrf.mxu2 }
 0x16f   : > { %v1435_v27 = vadd.f32 %v1434_v57, %v1346_v30  ;;  %v1523_v29 = vpop.f32.mrf.mxu3 }
 0x170   : > { %v1347_v54 = vpop.f32.mrf.mxu1 }
 0x171   : > { %v1524_v13 = vadd.f32 %v1523_v29, %v1435_v27  ;;  %v1348_v41 = vadd.f32 %v1347_v54, %v3296_v6  ;;  %v3863_v27 = vld [vmem:[#allocation20_spill] sm:$0xff] }
 0x172   : > { %v1614_v47 = vpop.f32.mrf.mxu0 }
 0x173   : > { %v3621_v55 = vadd.f32 %v1612_v49, %v1524_v13 }
 0x176   : > { %v1436_v2 = vpop.f32.mrf.mxu2 }
 0x177   : > { %v1437_v22 = vadd.f32 %v1436_v2, %v1348_v41  ;;  %v1525_v16 = vpop.f32.mrf.mxu3  ;;  %v3864_v41 = vld [vmem:[#allocation2_spill] sm:$0xff]  ;;  %v3865_v2 = vld [vmem:[#allocation8_spill] sm:$0xff] }
 0x178   : > { %v1350_v63 = vpop.f32.mrf.mxu1 }
 0x179   : > { %v1526_v5 = vadd.f32 %v1525_v16, %v1437_v22  ;;  %v1351_v49 = vadd.f32 %v1350_v63, %v3319_v61  ;;  %v3866_v22 = vld [vmem:[#allocation9_spill] sm:$0xff]  ;;  %v3867_v16 = vld [vmem:[#allocation23_spill] sm:$0xff] }
 0x17a   : > { %v1617_v52 = vpop.f32.mrf.mxu0 }
 0x17b   : > { %1665 = vmatmul.bf16.gmra.mxu1 %v3201_v24  ;;  %1754 = vmatmul.bf16.gmra.mxu2 %v3132_v50  ;;  %v3626_v8 = vadd.f32 %v1614_v47, %v1526_v5 }
 0x17c   : > { %1843 = vmatmul.bf16.gmra.mxu3 %v3203_v26 }
 0x17d   : > { %1932 = vmatmul.bf16.gmra.mxu0 %v3238_v42 }
 0x17e   : > { %v1439_v51 = vpop.f32.mrf.mxu2 }
 0x17f   : > { %v1440_v6 = vadd.f32 %v1439_v51, %v1351_v49  ;;  %v1528_v60 = vpop.f32.mrf.mxu3 }
 0x180   : > { %v1352_v62 = vpop.f32.mrf.mxu1 }
 0x181   : > { %v1529_v46 = vadd.f32 %v1528_v60, %v1440_v6  ;;  %v1353_v24 = vadd.f32 %v1352_v62, %v3863_v27 }
 0x182   : > { %v1619_v30 = vpop.f32.mrf.mxu0 }
 0x183   : > { %v3631_v57 = vadd.f32 %v1617_v52, %v1529_v46  ;;  %v3868_v46 = vld [vmem:[#allocation25_spill] sm:$0xff] }
 0x186   : > { %v1441_v29 = vpop.f32.mrf.mxu2 }
 0x187   : > { %v1442_v50 = vadd.f32 %v1441_v29, %v1353_v24  ;;  %v1530_v54 = vpop.f32.mrf.mxu3 }
 0x188   : > { %v1355_v13 = vpop.f32.mrf.mxu1 }
 0x189   : > { %v1531_v47 = vadd.f32 %v1530_v54, %v1442_v50  ;;  %v1356_v63 = vadd.f32 %v1355_v13, %v3867_v16 }
 0x18a   : > { %v1622_v26 = vpop.f32.mrf.mxu0 }
 0x18b   : > { %1670 = vmatmul.bf16.gmra.mxu1 %v3238_v42  ;;  %1759 = vmatmul.bf16.gmra.mxu2 %v3864_v41  ;;  %v3636_v61 = vadd.f32 %v1619_v30, %v1531_v47  ;;  %v3869_v47 = vld [vmem:[#allocation4_spill] sm:$0xff]  ;;  %v3870_v41 = vld [vmem:[#allocation10_spill] sm:$0xff] }
 0x18c   : > { %1848 = vmatmul.bf16.gmra.mxu3 %v3865_v2  ;;  %v3871_v2 = vld [vmem:[#allocation11_spill] sm:$0xff] }
 0x18d   : > { %1937 = vmatmul.bf16.gmra.mxu0 %v3866_v22 }
 0x18e   : > { %v1444_v5 = vpop.f32.mrf.mxu2 }
 0x18f   : > { %v1445_v52 = vadd.f32 %v1444_v5, %v1356_v63  ;;  %v1533_v49 = vpop.f32.mrf.mxu3 }
 0x190   : > { %v1357_v51 = vpop.f32.mrf.mxu1 }
 0x191   : > { %v1534_v6 = vadd.f32 %v1533_v49, %v1445_v52  ;;  %v1358_v42 = vadd.f32 %v1357_v51, %v3868_v46 }
 0x192   : > { %v1624_v60 = vpop.f32.mrf.mxu0 }
 0x193   : > { %v3641_v62 = vadd.f32 %v1622_v26, %v1534_v6  ;;  %v3872_v26 = vld [vmem:[#allocation27_spill] sm:$0xff] }
 0x196   : > { %v1446_v27 = vpop.f32.mrf.mxu2 }
 0x197   : > { %v1447_v24 = vadd.f32 %v1446_v27, %v1358_v42  ;;  %v1535_v30 = vpop.f32.mrf.mxu3  ;;  %v3874_v42 = vld [vmem:[#allocation29_spill] sm:$0xff] }
 0x198   : > { %v1360_v29 = vpop.f32.mrf.mxu1 }
 0x199   : > { %v1536_v50 = vadd.f32 %v1535_v30, %v1447_v24  ;;  %v1361_v16 = vadd.f32 %v1360_v29, %v3872_v26  ;;  %v3877_v26 = vld [vmem:[#allocation12_spill] sm:$0xff] }
 0x19a   : > { %v1627_v54 = vpop.f32.mrf.mxu0 }
 0x19b   : > { %1675 = vmatmul.bf16.gmra.mxu1 %v3866_v22  ;;  %1764 = vmatmul.bf16.gmra.mxu2 %v3869_v47  ;;  %v3646_v13 = vadd.f32 %v1624_v60, %v1536_v50 }
 0x19c   : > { %1853 = vmatmul.bf16.gmra.mxu3 %v3870_v41  ;;  %v3875_v41 = vld [vmem:[#allocation6_spill] sm:$0xff] }
 0x19d   : > { %1942 = vmatmul.bf16.gmra.mxu0 %v3871_v2 }
 0x19e   : > { %v1449_v63 = vpop.f32.mrf.mxu2 }
 0x19f   : > { %v1450_v5 = vadd.f32 %v1449_v63, %v1361_v16  ;;  %v1538_v52 = vpop.f32.mrf.mxu3  ;;  %v3878_v16 = vld [vmem:[#allocation13_spill] sm:$0xff] }
 0x1a0   : > { %v1362_v49 = vpop.f32.mrf.mxu1 }
 0x1a1   : > { %v1539_v51 = vadd.f32 %v1538_v52, %v1450_v5  ;;  %v1363_v22 = vadd.f32 %v1362_v49, %v3874_v42 }
 0x1a2   : > { %v1629_v6 = vpop.f32.mrf.mxu0 }
 0x1a3   : > { %v3651_v46 = vadd.f32 %v1627_v54, %v1539_v51  ;;  %v3879_v54 = vld [vmem:[#allocation15_spill] sm:$0xff] }
 0x1a5   : > { %3873 = vst [vmem:[#allocation20_spill] sm:$0xff] %v3651_v46  ;;  %v3882_v46 = vld [vmem:[#allocation7_spill] sm:$0xff] }
 0x1a6   : > { %v1451_v27 = vpop.f32.mrf.mxu2 }
 0x1a7   : > { %v1452_v24 = vadd.f32 %v1451_v27, %v1363_v22  ;;  %v1540_v60 = vpop.f32.mrf.mxu3 }
 0x1a8   : > { %v1365_v30 = vpop.f32.mrf.mxu1 }
 0x1a9   : > { %v1541_v50 = vadd.f32 %v1540_v60, %v1452_v24  ;;  %v1366_v63 = vadd.f32 %v1365_v30, %v3879_v54  ;;  %v3881_v24 = vld [vmem:[#allocation16_spill] sm:$0xff]  ;;  %v3884_v54 = vld [vmem:[#allocation14_spill] sm:$0xff] }
 0x1aa   : > { %v1632_v47 = vpop.f32.mrf.mxu0 }
 0x1ab   : > { %1680 = vmatmul.bf16.gmra.mxu1 %v3871_v2  ;;  %1769 = vmatmul.bf16.gmra.mxu2 %v3875_v41  ;;  %v3656_v29 = vadd.f32 %v1629_v6, %v1541_v50 }
 0x1ac   : > { %1858 = vmatmul.bf16.gmra.mxu3 %v3877_v26 }
 0x1ad   : > { %3876 = vst [vmem:[#allocation2_spill] sm:$0xff] %v3656_v29  ;;  %1947 = vmatmul.bf16.gmra.mxu0 %v3878_v16 }
 0x1ae   : > { %v1454_v5 = vpop.f32.mrf.mxu2 }
 0x1af   : > { %v1455_v52 = vadd.f32 %v1454_v5, %v1366_v63  ;;  %v1543_v49 = vpop.f32.mrf.mxu3  ;;  %v3885_v63 = vld [vmem:[#allocation17_spill] sm:$0xff] }
 0x1b0   : > { %v1367_v51 = vpop.f32.mrf.mxu1 }
 0x1b1   : > { %v1544_v42 = vadd.f32 %v1543_v49, %v1455_v52  ;;  %v1368_v2 = vadd.f32 %v1367_v51, %v3881_v24 }
 0x1b2   : > { %v1634_v22 = vpop.f32.mrf.mxu0 }
 0x1b3   : > { %v3661_v27 = vadd.f32 %v1632_v47, %v1544_v42  ;;  %v3886_v47 = vld [vmem:[#allocation19_spill] sm:$0xff] }
 0x1b5   : > { %3880 = vst [vmem:[#allocation8_spill] sm:$0xff] %v3661_v27  ;;  %v3889_v27 = vld [vmem:[#allocation3_spill] sm:$0xff] }
 0x1b6   : > { %v1456_v60 = vpop.f32.mrf.mxu2 }
 0x1b7   : > { %v1457_v41 = vadd.f32 %v1456_v60, %v1368_v2  ;;  %v1545_v6 = vpop.f32.mrf.mxu3 }
 0x1b8   : > { %v1370_v50 = vpop.f32.mrf.mxu1 }
 0x1b9   : > { %v1546_v29 = vadd.f32 %v1545_v6, %v1457_v41  ;;  %v1371_v5 = vadd.f32 %v1370_v50, %v3886_v47  ;;  %v3888_v41 = vld [vmem:[#allocation21_spill] sm:$0xff]  ;;  %v3891_v47 = vld [vmem:[#allocation18_spill] sm:$0xff] }
 0x1ba   : > { %v1637_v26 = vpop.f32.mrf.mxu0 }
 0x1bb   : > { %1685 = vmatmul.bf16.gmra.mxu1 %v3878_v16  ;;  %1774 = vmatmul.bf16.gmra.mxu2 %v3882_v46  ;;  %v3666_v30 = vadd.f32 %v1634_v22, %v1546_v29 }
 0x1bc   : > { %1863 = vmatmul.bf16.gmra.mxu3 %v3884_v54 }
 0x1bd   : > { %3883 = vst [vmem:[#allocation9_spill] sm:$0xff] %v3666_v30  ;;  %1952 = vmatmul.bf16.gmra.mxu0 %v3885_v63 }
 0x1be   : > { %v1459_v52 = vpop.f32.mrf.mxu2 }
 0x1bf   : > { %v1460_v49 = vadd.f32 %v1459_v52, %v1371_v5  ;;  %v1548_v51 = vpop.f32.mrf.mxu3  ;;  %v3892_v5 = vld [vmem:[#allocation22_spill] sm:$0xff] }
 0x1c0   : > { %v1372_v42 = vpop.f32.mrf.mxu1 }
 0x1c1   : > { %v1549_v24 = vadd.f32 %v1548_v51, %v1460_v49  ;;  %v1373_v16 = vadd.f32 %v1372_v42, %v3888_v41 }
 0x1c2   : > { %v1639_v2 = vpop.f32.mrf.mxu0 }
 0x1c3   : > { %v3671_v60 = vadd.f32 %v1637_v26, %v1549_v24  ;;  %v3893_v26 = vld [vmem:[#allocation24_spill] sm:$0xff] }
 0x1c5   : > { %3887 = vst [vmem:[#allocation23_spill] sm:$0xff] %v3671_v60  ;;  %v3895_v60 = vld [vmem:[#allocation5_spill] sm:$0xff] }
 0x1c6   : > { %v1461_v6 = vpop.f32.mrf.mxu2 }
 0x1c7   : > { %v1462_v46 = vadd.f32 %v1461_v6, %v1373_v16  ;;  %v1550_v29 = vpop.f32.mrf.mxu3 }
 0x1c8   : > { %v1375_v22 = vpop.f32.mrf.mxu1 }
 0x1c9   : > { %v1551_v30 = vadd.f32 %v1550_v29, %v1462_v46  ;;  %v1376_v52 = vadd.f32 %v1375_v22, %v3893_v26  ;;  %v3894_v46 = vld [vmem:[#allocation26_spill] sm:$0xff] }
 0x1ca   : > { %v1642_v54 = vpop.f32.mrf.mxu0 }
 0x1cb   : > { %1690 = vmatmul.bf16.gmra.mxu1 %v3885_v63  ;;  %1779 = vmatmul.bf16.gmra.mxu2 %v3889_v27  ;;  %v3676_v50 = vadd.f32 %v1639_v2, %v1551_v30 }
 0x1cc   : > { %1868 = vmatmul.bf16.gmra.mxu3 %v3891_v47 }
 0x1cd   : > { %3890 = vst [vmem:[#allocation25_spill] sm:$0xff] %v3676_v50  ;;  %1957 = vmatmul.bf16.gmra.mxu0 %v3892_v5 }
 0x1ce   : > { %v1464_v49 = vpop.f32.mrf.mxu2 }
 0x1cf   : > { %v1465_v51 = vadd.f32 %v1464_v49, %v1376_v52  ;;  %v1553_v42 = vpop.f32.mrf.mxu3 }
 0x1d0   : > { %v1377_v24 = vpop.f32.mrf.mxu1 }
 0x1d1   : > { %v1554_v41 = vadd.f32 %v1553_v42, %v1465_v51  ;;  %v1378_v63 = vadd.f32 %v1377_v24, %v3894_v46 }
 0x1d2   : > { %v1644_v16 = vpop.f32.mrf.mxu0 }
 0x1d3   : > { %v3681_v6 = vadd.f32 %v1642_v54, %v1554_v41  ;;  %v3896_v54 = vld [vmem:[#allocation28_spill] sm:$0xff] }
 0x1d6   : > { %v1466_v29 = vpop.f32.mrf.mxu2 }
 0x1d7   : > { %v1467_v27 = vadd.f32 %v1466_v29, %v1378_v63  ;;  %v1555_v30 = vpop.f32.mrf.mxu3  ;;  %v3897_v63 = vld [vmem:[#allocation30_spill] sm:$0xff] }
 0x1d8   : > { %v1380_v2 = vpop.f32.mrf.mxu1 }
 0x1d9   : > { %v1556_v50 = vadd.f32 %v1555_v30, %v1467_v27  ;;  %v1381_v26 = vadd.f32 %v1380_v2, %v3896_v54 }
 0x1da   : > { %v1647_v47 = vpop.f32.mrf.mxu0 }
 0x1db   : > { %1695 = vmatmul.bf16.gmra.mxu1 %v3892_v5  ;;  %1784 = vmatmul.bf16.gmra.mxu2 %v3895_v60  ;;  %v3686_v22 = vadd.f32 %v1644_v16, %v1556_v50 }
 0x1dc   : > { %1873 = vmatmul.bf16.gmra.mxu3 %v3353_v7 }
 0x1dd   : > { %1962 = vmatmul.bf16.gmra.mxu0 %v3387_v37 }
 0x1de   : > { %v1469_v52 = vpop.f32.mrf.mxu2 }
 0x1df   : > { %v1470_v49 = vadd.f32 %v1469_v52, %v1381_v26  ;;  %v1558_v51 = vpop.f32.mrf.mxu3 }
 0x1e0   : > { %v1382_v42 = vpop.f32.mrf.mxu1 }
 0x1e1   : > { %v1559_v24 = vadd.f32 %v1558_v51, %v1470_v49  ;;  %v1383_v5 = vadd.f32 %v1382_v42, %v3897_v63  ;;  %v3898_v42 = vld [vmem:[#allocation31_spill] sm:$0xff] }
 0x1e2   : > { %v1649_v41 = vpop.f32.mrf.mxu0 }
 0x1e3   : > { %v3691_v46 = vadd.f32 %v1647_v47, %v1559_v24 }
 0x1e6   : > { %v1471_v29 = vpop.f32.mrf.mxu2 }
 0x1e7   : > { %v1472_v60 = vadd.f32 %v1471_v29, %v1383_v5  ;;  %v1560_v50 = vpop.f32.mrf.mxu3 }
 0x1e8   : > { %v1661_v16 = vpop.f32.mrf.mxu1 }
 0x1e9   : > { %v1561_v27 = vadd.f32 %v1560_v50, %v1472_v60  ;;  %v1662_v2 = vadd.f32 %v1661_v16, %v3440_v15 }
 0x1ea   : > { %v1928_v7 = vpop.f32.mrf.mxu0 }
 0x1eb   : > { %1700 = vmatmul.bf16.gmra.mxu1 %v3387_v37  ;;  %1789 = vmatmul.bf16.gmra.mxu2 %v3068_v17  ;;  %v3696_v30 = vadd.f32 %v1649_v41, %v1561_v27 }
 0x1ec   : > { %1878 = vmatmul.bf16.gmra.mxu3 %v3395_v43 }
 0x1ed   : > { %1967 = vmatmul.bf16.gmra.mxu0 %v3417_v1 }
 0x1ee   : > { %v1750_v47 = vpop.f32.mrf.mxu2 }
 0x1ef   : > { %v1839_v54 = vpop.f32.mrf.mxu3  ;;  %v1751_v26 = vadd.f32 %v1750_v47, %v1662_v2 }
 0x1f0   : > { %v1663_v52 = vpop.f32.mrf.mxu1 }
 0x1f1   : > { %v1840_v51 = vadd.f32 %v1839_v54, %v1751_v26  ;;  %v1664_v24 = vadd.f32 %v1663_v52, %v3898_v42 }
 0x1f2   : > { %v1930_v49 = vpop.f32.mrf.mxu0 }
 0x1f3   : > { %v1929_v41 = vadd.f32 %v1928_v7, %v1840_v51 }
 0x1f5   : > { %v2110_v15 = vmul.f32 %v1929_v41, %v1929_v41 }
 0x1f6   : > { %v1752_v37 = vpop.f32.mrf.mxu2 }
 0x1f7   : > { %v1753_v63 = vadd.f32 %v1752_v37, %v1664_v24  ;;  %v1841_v17 = vpop.f32.mrf.mxu3 }
 0x1f8   : > { %v1666_v5 = vpop.f32.mrf.mxu1 }
 0x1f9   : > { %v1842_v29 = vadd.f32 %v1841_v17, %v1753_v63  ;;  %v1667_v7 = vadd.f32 %v1666_v5, %v3463_v35 }
 0x1fa   : > { %v1933_v43 = vpop.f32.mrf.mxu0 }
 0x1fb   : > { %v1931_v60 = vadd.f32 %v1930_v49, %v1842_v29  ;;  %1705 = vmatmul.bf16.gmra.mxu1 %v3417_v1  ;;  %1794 = vmatmul.bf16.gmra.mxu2 %v3124_v44 }
 0x1fc   : > { %1883 = vmatmul.bf16.gmra.mxu3 %v3428_v28 }
 0x1fd   : > { %1972 = vmatmul.bf16.gmra.mxu0 %v3450_v4  ;;  %v2659_v50 = vpack.c.bf16 %v1931_v60, %v1929_v41  ;;  %v2072_v16 = vadd.f32 %v1931_v60, %v1929_v41  ;;  %v2111_v27 = vmul.f32 %v1931_v60, %v1931_v60 }
 0x1fe   : > { %v1755_v2 = vpop.f32.mrf.mxu2 }
 0x1ff   : > { %2660 = vst [vmem:[%s3708_s29] sm:$0xff] %v2659_v50   ;;  %v2142_v1 = vadd.f32 %v2111_v27, %v2110_v15  ;;  %v1756_v44 = vadd.f32 %v1755_v2, %v1667_v7  ;;  %v1844_v47 = vpop.f32.mrf.mxu3 }
 0x200   : > { %v1668_v54 = vpop.f32.mrf.mxu1 }
 0x201   : > { %v1845_v26 = vadd.f32 %v1844_v47, %v1756_v44  ;;  %v1669_v28 = vadd.f32 %v1668_v54, %v3478_v11 }
 0x202   : > { %v1935_v52 = vpop.f32.mrf.mxu0 }
 0x203   : > { %v1934_v49 = vadd.f32 %v1933_v43, %v1845_v26 }
 0x205   : > { %v2073_v51 = vadd.f32 %v2072_v16, %v1934_v49  ;;  %v2112_v42 = vmul.f32 %v1934_v49, %v1934_v49 }
 0x206   : > { %v1757_v24 = vpop.f32.mrf.mxu2 }
 0x207   : > { %v2143_v37 = vadd.f32 %v2142_v1, %v2112_v42  ;;  %v1758_v63 = vadd.f32 %v1757_v24, %v1669_v28  ;;  %v1846_v17 = vpop.f32.mrf.mxu3 }
 0x208   : > { %v1671_v41 = vpop.f32.mrf.mxu1 }
 0x209   : > { %v1847_v35 = vadd.f32 %v1846_v17, %v1758_v63  ;;  %v1672_v15 = vadd.f32 %v1671_v41, %v3498_v14 }
 0x20a   : > { %v1938_v5 = vpop.f32.mrf.mxu0 }
 0x20b   : > { %v1936_v29 = vadd.f32 %v1935_v52, %v1847_v35  ;;  %1710 = vmatmul.bf16.gmra.mxu1 %v3450_v4  ;;  %1799 = vmatmul.bf16.gmra.mxu2 %v2897_v20 }
 0x20c   : > { %1888 = vmatmul.bf16.gmra.mxu3 %v3460_v34 }
 0x20d   : > { %1977 = vmatmul.bf16.gmra.mxu0 %v3473_v36  ;;  %v2664_v43 = vpack.c.bf16 %v1936_v29, %v1934_v49  ;;  %v2074_v60 = vadd.f32 %v2073_v51, %v1936_v29  ;;  %v2113_v11 = vmul.f32 %v1936_v29, %v1936_v29 }
 0x20e   : > { %v1760_v50 = vpop.f32.mrf.mxu2 }
 0x20f   : > { %2736 = vst [vmem:[%s3708_s29 + $0x8] sm:$0xff] %v2664_v43   ;;  %v2144_v16 = vadd.f32 %v2143_v37, %v2113_v11  ;;  %v1761_v27 = vadd.f32 %v1760_v50, %v1672_v15  ;;  %v1849_v7 = vpop.f32.mrf.mxu3  ;;  %v697_v50 = vrot.slane %v3582_v10, 2 }
 0x210   : > { %v1673_v2 = vpop.f32.mrf.mxu1 }
 0x211   : > { %v1850_v1 = vadd.f32 %v1849_v7, %v1761_v27  ;;  %v1674_v34 = vadd.f32 %v1673_v2, %v3513_v56 }
 0x212   : > { %v1940_v44 = vpop.f32.mrf.mxu0 }
 0x213   : > { %v1939_v4 = vadd.f32 %v1938_v5, %v1850_v1 }
 0x215   : > { %v2075_v47 = vadd.f32 %v2074_v60, %v1939_v4  ;;  %v2114_v20 = vmul.f32 %v1939_v4, %v1939_v4 }
 0x216   : > { %v1762_v54 = vpop.f32.mrf.mxu2 }
 0x217   : > { %v2145_v26 = vadd.f32 %v2144_v16, %v2114_v20  ;;  %v1763_v52 = vadd.f32 %v1762_v54, %v1674_v34  ;;  %v1851_v49 = vpop.f32.mrf.mxu3  ;;  %v698_v16 = vrot.slane %v3585_v39, 2 }
 0x218   : > { %v1676_v51 = vpop.f32.mrf.mxu1 }
 0x219   : > { %v1852_v14 = vadd.f32 %v1851_v49, %v1763_v52  ;;  %v1677_v63 = vadd.f32 %v1676_v51, %v3521_v58 }
 0x21a   : > { %v1943_v42 = vpop.f32.mrf.mxu0 }
 0x21b   : > { %v1941_v28 = vadd.f32 %v1940_v44, %v1852_v14  ;;  %1715 = vmatmul.bf16.gmra.mxu1 %v3473_v36  ;;  %1804 = vmatmul.bf16.gmra.mxu2 %v2986_v48 }
 0x21c   : > { %1893 = vmatmul.bf16.gmra.mxu3 %v3489_v0 }
 0x21d   : > { %1982 = vmatmul.bf16.gmra.mxu0 %v3508_v25  ;;  %v2669_v24 = vpack.c.bf16 %v1941_v28, %v1939_v4  ;;  %v2076_v37 = vadd.f32 %v2075_v47, %v1941_v28  ;;  %v2115_v56 = vmul.f32 %v1941_v28, %v1941_v28  ;;  %v700_v4 = vrot.slane %v3588_v38, 2 }
 0x21e   : > { %v1765_v17 = vpop.f32.mrf.mxu2 }
 0x21f   : > { %2737 = vst [vmem:[%s3708_s29 + $0x10] sm:$0xff] %v2669_v24   ;;  %v2146_v41 = vadd.f32 %v2145_v26, %v2115_v56  ;;  %v1766_v35 = vadd.f32 %v1765_v17, %v1677_v63  ;;  %v1854_v5 = vpop.f32.mrf.mxu3  ;;  %v701_v10 = vsel %vm574_vm1, %v698_v16, %v700_v4 }
 0x220   : > { %v1678_v29 = vpop.f32.mrf.mxu1 }
 0x221   : > { %v1855_v43 = vadd.f32 %v1854_v5, %v1766_v35  ;;  %v1679_v0 = vadd.f32 %v1678_v29, %v3535_v19  ;;  %v699_v19 = vsel %vm574_vm1, %v697_v50, %v698_v16 }
 0x222   : > { %v1945_v60 = vpop.f32.mrf.mxu0  ;;  %v3738_v39 = vpack.c.bf16 %v701_v10, %v699_v19 }
 0x223   : > { %v1944_v36 = vadd.f32 %v1943_v42, %v1855_v43 }
 0x225   : > { %v2077_v11 = vadd.f32 %v2076_v37, %v1944_v36  ;;  %v2116_v48 = vmul.f32 %v1944_v36, %v1944_v36 }
 0x226   : > { %v1767_v15 = vpop.f32.mrf.mxu2 }
 0x227   : > { %v2147_v27 = vadd.f32 %v2146_v41, %v2116_v48  ;;  %v1768_v58 = vadd.f32 %v1767_v15, %v1679_v0  ;;  %v1856_v7 = vpop.f32.mrf.mxu3 }
 0x228   : > { %v1681_v2 = vpop.f32.mrf.mxu1 }
 0x229   : > { %v1857_v1 = vadd.f32 %v1856_v7, %v1768_v58  ;;  %v1682_v38 = vadd.f32 %v1681_v2, %v3555_v23 }
 0x22a   : > { %v1948_v44 = vpop.f32.mrf.mxu0 }
 0x22b   : > { %v1946_v47 = vadd.f32 %v1945_v60, %v1857_v1  ;;  %1720 = vmatmul.bf16.gmra.mxu1 %v3508_v25  ;;  %1809 = vmatmul.bf16.gmra.mxu2 %v3072_v21  ;;  %v3899_v60 = vld [vmem:[#allocation32_spill] sm:$0xff] }
 0x22c   : > { %1898 = vmatmul.bf16.gmra.mxu3 %v3518_v40 }
 0x22d   : > { %1987 = vmatmul.bf16.gmra.mxu0 %v3530_v59  ;;  %v2674_v20 = vpack.c.bf16 %v1946_v47, %v1944_v36  ;;  %v2078_v34 = vadd.f32 %v2077_v11, %v1946_v47  ;;  %v2117_v54 = vmul.f32 %v1946_v47, %v1946_v47 }
 0x22e   : > { %v1770_v26 = vpop.f32.mrf.mxu2 }
 0x22f   : > { %2738 = vst [vmem:[%s3708_s29 + $0x18] sm:$0xff] %v2674_v20   ;;  %v2148_v25 = vadd.f32 %v2147_v27, %v2117_v54  ;;  %v1771_v52 = vadd.f32 %v1770_v26, %v1682_v38  ;;  %v1859_v21 = vpop.f32.mrf.mxu3 }
 0x230   : > { %v1683_v49 = vpop.f32.mrf.mxu1 }
 0x231   : > { %v1860_v51 = vadd.f32 %v1859_v21, %v1771_v52  ;;  %v1684_v24 = vadd.f32 %v1683_v49, %v3566_v31  ;;  %v267_v52 = vld [vmem:[%s2852_s8 + $0x1a0] sm:$0xff]  ;;  %v268_v21 = vld [vmem:[%s2852_s8 + $0x1a8] sm:$0x3] }
 0x232   : > { %v1950_v14 = vpop.f32.mrf.mxu0 }
 0x233   : > { %v1949_v42 = vadd.f32 %v1948_v44, %v1860_v51 }
 0x235   : > { %v2079_v28 = vadd.f32 %v2078_v34, %v1949_v42  ;;  %v2118_v40 = vmul.f32 %v1949_v42, %v1949_v42  ;;  %v266_v34 = vld [vmem:[%s2852_s8 + $0x198] sm:$0xff] }
 0x236   : > { %v1772_v37 = vpop.f32.mrf.mxu2 }
 0x237   : > { %v2149_v56 = vadd.f32 %v2148_v25, %v2118_v40  ;;  %v1773_v63 = vadd.f32 %v1772_v37, %v1684_v24  ;;  %v1861_v17 = vpop.f32.mrf.mxu3  ;;  %v714_v40 = vrot.slane %v266_v34, 2  ;;  %v710_v24 = vrot.slane %v268_v21, 1 }
 0x238   : > { %v1686_v41 = vpop.f32.mrf.mxu1 }
 0x239   : > { %v1862_v23 = vadd.f32 %v1861_v17, %v1773_v63  ;;  %v1687_v36 = vadd.f32 %v1686_v41, %v3899_v60  ;;  %v717_v63 = vrot.slane %v268_v21, 2 }
 0x23a   : > { %v1953_v35 = vpop.f32.mrf.mxu0 }
 0x23b   : > { %v1951_v5 = vadd.f32 %v1950_v14, %v1862_v23  ;;  %1725 = vmatmul.bf16.gmra.mxu1 %v3530_v59  ;;  %1814 = vmatmul.bf16.gmra.mxu2 %v3128_v45 }
 0x23c   : > { %1903 = vmatmul.bf16.gmra.mxu3 %v3547_v18  ;;  %v3900_v18 = vld [vmem:[#allocation33_spill] sm:$0xff] }
 0x23d   : > { %1992 = vmatmul.bf16.gmra.mxu0 %v3562_v9  ;;  %v2679_v29 = vpack.c.bf16 %v1951_v5, %v1949_v42  ;;  %v2080_v43 = vadd.f32 %v2079_v28, %v1951_v5  ;;  %v2119_v31 = vmul.f32 %v1951_v5, %v1951_v5 }
 0x23e   : > { %v1775_v11 = vpop.f32.mrf.mxu2 }
 0x23f   : > { %2739 = vst [vmem:[%s3708_s29 + $0x20] sm:$0xff] %v2679_v29   ;;  %v2150_v48 = vadd.f32 %v2149_v56, %v2119_v31  ;;  %v1776_v0 = vadd.f32 %v1775_v11, %v1687_v36  ;;  %v1864_v15 = vpop.f32.mrf.mxu3  ;;  %v3901_v29 = vld [vmem:[#allocation34_spill] sm:$0xff] }
 0x240   : > { %v1688_v50 = vpop.f32.mrf.mxu1 }
 0x241   : > { %v1865_v16 = vadd.f32 %v1864_v15, %v1776_v0  ;;  %v1689_v7 = vadd.f32 %v1688_v50, %v3900_v18  ;;  %v772_v0 = vpack.c.bf16 %v267_v52, %v266_v34 }
 0x242   : > { %v1955_v27 = vpop.f32.mrf.mxu0 }
 0x243   : > { %v1954_v59 = vadd.f32 %v1953_v35, %v1865_v16 }
 0x245   : > { %v2081_v45 = vadd.f32 %v2080_v43, %v1954_v59  ;;  %v2120_v58 = vmul.f32 %v1954_v59, %v1954_v59 }
 0x246   : > { %v1777_v2 = vpop.f32.mrf.mxu2 }
 0x247   : > { %v2151_v1 = vadd.f32 %v2150_v48, %v2120_v58  ;;  %v1778_v44 = vadd.f32 %v1777_v2, %v1689_v7  ;;  %v1866_v4 = vpop.f32.mrf.mxu3 }
 0x248   : > { %v1691_v47 = vpop.f32.mrf.mxu1 }
 0x249   : > { %v1867_v19 = vadd.f32 %v1866_v4, %v1778_v44  ;;  %v1692_v25 = vadd.f32 %v1691_v47, %v3593_v12 }
 0x24a   : > { %v1958_v10 = vpop.f32.mrf.mxu0 }
 0x24b   : > { %v1956_v20 = vadd.f32 %v1955_v27, %v1867_v19  ;;  %1730 = vmatmul.bf16.gmra.mxu1 %v3562_v9  ;;  %1819 = vmatmul.bf16.gmra.mxu2 %v3600_v33  ;;  %v707_v9 = vrot.slane %v266_v34, 1  ;;  %v708_v33 = vrot.slane %v267_v52, 1 }
 0x24c   : > { %1908 = vmatmul.bf16.gmra.mxu3 %v3602_v32  ;;  %v715_v32 = vrot.slane %v267_v52, 2 }
 0x24d   : > { %1997 = vmatmul.bf16.gmra.mxu0 %v3738_v39  ;;  %v2684_v54 = vpack.c.bf16 %v1956_v20, %v1954_v59  ;;  %v2082_v38 = vadd.f32 %v2081_v45, %v1956_v20  ;;  %v2121_v26 = vmul.f32 %v1956_v20, %v1956_v20  ;;  %v709_v41 = vsel %vm461_vm0, %v707_v9, %v708_v33 }
 0x24e   : > { %v1780_v49 = vpop.f32.mrf.mxu2  ;;  %v711_v12 = vsel %vm461_vm0, %v708_v33, %v710_v24  ;;  %v716_v23 = vsel %vm574_vm1, %v714_v40, %v715_v32  ;;  %v718_v31 = vsel %vm574_vm1, %v715_v32, %v717_v63 }
 0x24f   : > { %2740 = vst [vmem:[%s3708_s29 + $0x28] sm:$0xff] %v2684_v54   ;;  %v2152_v51 = vadd.f32 %v2151_v1, %v2121_v26  ;;  %v1781_v14 = vadd.f32 %v1780_v49, %v1692_v25  ;;  %v1869_v42 = vpop.f32.mrf.mxu3  ;;  %v773_v50 = vpack.c.bf16 %v711_v12, %v709_v41  ;;  %v774_v16 = vpack.c.bf16 %v718_v31, %v716_v23 }
 0x250   : > { %v1693_v28 = vpop.f32.mrf.mxu1 }
 0x251   : > { %v1870_v37 = vadd.f32 %v1869_v42, %v1781_v14  ;;  %v1694_v43 = vadd.f32 %v1693_v28, %v3901_v29 }
 0x252   : > { %v1960_v56 = vpop.f32.mrf.mxu0 }
 0x253   : > { %v1959_v17 = vadd.f32 %v1958_v10, %v1870_v37 }
 0x255   : > { %v2083_v35 = vadd.f32 %v2082_v38, %v1959_v17  ;;  %v2122_v5 = vmul.f32 %v1959_v17, %v1959_v17 }
 0x256   : > { %v1782_v60 = vpop.f32.mrf.mxu2 }
 0x257   : > { %v2153_v36 = vadd.f32 %v2152_v51, %v2122_v5  ;;  %v1783_v11 = vadd.f32 %v1782_v60, %v1694_v43  ;;  %v1871_v48 = vpop.f32.mrf.mxu3 }
 0x258   : > { %v1696_v15 = vpop.f32.mrf.mxu1 }
 0x259   : > { %v1872_v27 = vadd.f32 %v1871_v48, %v1783_v11  ;;  %v1697_v2 = vadd.f32 %v1696_v15, %v3611_v3 }
 0x25a   : > { %v1963_v59 = vpop.f32.mrf.mxu0 }
 0x25b   : > { %v1961_v45 = vadd.f32 %v1960_v56, %v1872_v27  ;;  %1735 = vmatmul.bf16.gmra.mxu1 %v3738_v39  ;;  %1824 = vmatmul.bf16.gmra.mxu2 %v772_v0 }
 0x25c   : > { %1913 = vmatmul.bf16.gmra.mxu3 %v773_v50 }
 0x25d   : > { %2002 = vmatmul.bf16.gmra.mxu0 %v774_v16  ;;  %v2689_v58 = vpack.c.bf16 %v1961_v45, %v1959_v17  ;;  %v2084_v18 = vadd.f32 %v2083_v35, %v1961_v45  ;;  %v2123_v7 = vmul.f32 %v1961_v45, %v1961_v45 }
 0x25e   : > { %v1785_v1 = vpop.f32.mrf.mxu2 }
 0x25f   : > { %2741 = vst [vmem:[%s3708_s29 + $0x30] sm:$0xff] %v2689_v58   ;;  %v2154_v44 = vadd.f32 %v2153_v36, %v2123_v7  ;;  %v1786_v4 = vadd.f32 %v1785_v1, %v1697_v2  ;;  %v1874_v47 = vpop.f32.mrf.mxu3 }
 0x260   : > { %v1698_v19 = vpop.f32.mrf.mxu1 }
 0x261   : > { %v1875_v10 = vadd.f32 %v1874_v47, %v1786_v4  ;;  %v1699_v38 = vadd.f32 %v1698_v19, %v3616_v53 }
 0x262   : > { %v1965_v20 = vpop.f32.mrf.mxu0 }
 0x263   : > { %v1964_v34 = vadd.f32 %v1963_v59, %v1875_v10 }
 0x265   : > { %v2085_v54 = vadd.f32 %v2084_v18, %v1964_v34  ;;  %v2124_v39 = vmul.f32 %v1964_v34, %v1964_v34 }
 0x266   : > { %v1787_v26 = vpop.f32.mrf.mxu2 }
 0x267   : > { %v2155_v25 = vadd.f32 %v2154_v44, %v2124_v39  ;;  %v1788_v52 = vadd.f32 %v1787_v26, %v1699_v38  ;;  %v1876_v21 = vpop.f32.mrf.mxu3 }
 0x268   : > { %v1701_v49 = vpop.f32.mrf.mxu1 }
 0x269   : > { %v1877_v3 = vadd.f32 %v1876_v21, %v1788_v52  ;;  %v1702_v33 = vadd.f32 %v1701_v49, %v3621_v55 }
 0x26a   : > { %v1968_v51 = vpop.f32.mrf.mxu0 }
 0x26b   : > { %v1966_v14 = vadd.f32 %v1965_v20, %v1877_v3 }
 0x26d   : > { %v2694_v42 = vpack.c.bf16 %v1966_v14, %v1964_v34  ;;  %v2086_v9 = vadd.f32 %v2085_v54, %v1966_v14  ;;  %v2125_v28 = vmul.f32 %v1966_v14, %v1966_v14 }
 0x26e   : > { %v1790_v40 = vpop.f32.mrf.mxu2 }
 0x26f   : > { %2742 = vst [vmem:[%s3708_s29 + $0x38] sm:$0xff] %v2694_v42   ;;  %v2156_v32 = vadd.f32 %v2155_v25, %v2125_v28  ;;  %v1791_v24 = vadd.f32 %v1790_v40, %v1702_v33  ;;  %v1879_v37 = vpop.f32.mrf.mxu3 }
 0x270   : > { %v1703_v56 = vpop.f32.mrf.mxu1 }
 0x271   : > { %v1880_v53 = vadd.f32 %v1879_v37, %v1791_v24  ;;  %v1704_v23 = vadd.f32 %v1703_v56, %v3626_v8 }
 0x272   : > { %v1970_v63 = vpop.f32.mrf.mxu0 }
 0x273   : > { %v1969_v17 = vadd.f32 %v1968_v51, %v1880_v53 }
 0x275   : > { %v2087_v41 = vadd.f32 %v2086_v9, %v1969_v17  ;;  %v2126_v12 = vmul.f32 %v1969_v17, %v1969_v17 }
 0x276   : > { %v1792_v35 = vpop.f32.mrf.mxu2 }
 0x277   : > { %v2157_v5 = vadd.f32 %v2156_v32, %v2126_v12  ;;  %v1793_v29 = vadd.f32 %v1792_v35, %v1704_v23  ;;  %v1881_v43 = vpop.f32.mrf.mxu3  ;;  %v3902_v12 = vld [vmem:[#allocation20_spill] sm:$0xff] }
 0x278   : > { %v1706_v31 = vpop.f32.mrf.mxu1 }
 0x279   : > { %v1882_v55 = vadd.f32 %v1881_v43, %v1793_v29  ;;  %v1707_v15 = vadd.f32 %v1706_v31, %v3631_v57 }
 0x27a   : > { %v1973_v60 = vpop.f32.mrf.mxu0 }
 0x27b   : > { %v1971_v36 = vadd.f32 %v1970_v63, %v1882_v55 }
 0x27d   : > { %v2699_v11 = vpack.c.bf16 %v1971_v36, %v1969_v17  ;;  %v2088_v48 = vadd.f32 %v2087_v41, %v1971_v36  ;;  %v2127_v0 = vmul.f32 %v1971_v36, %v1971_v36 }
 0x27e   : > { %v1795_v50 = vpop.f32.mrf.mxu2 }
 0x27f   : > { %2743 = vst [vmem:[%s3708_s29 + $0x40] sm:$0xff] %v2699_v11   ;;  %v2158_v16 = vadd.f32 %v2157_v5, %v2127_v0  ;;  %v1796_v27 = vadd.f32 %v1795_v50, %v1707_v15  ;;  %v1884_v59 = vpop.f32.mrf.mxu3 }
 0x280   : > { %v1708_v45 = vpop.f32.mrf.mxu1 }
 0x281   : > { %v1885_v8 = vadd.f32 %v1884_v59, %v1796_v27  ;;  %v1709_v1 = vadd.f32 %v1708_v45, %v3636_v61 }
 0x282   : > { %v1975_v58 = vpop.f32.mrf.mxu0 }
 0x283   : > { %v1974_v18 = vadd.f32 %v1973_v60, %v1885_v8 }
 0x285   : > { %v2089_v7 = vadd.f32 %v2088_v48, %v1974_v18  ;;  %v2128_v2 = vmul.f32 %v1974_v18, %v1974_v18  ;;  %v3903_v48 = vld [vmem:[#allocation2_spill] sm:$0xff] }
 0x286   : > { %v1797_v44 = vpop.f32.mrf.mxu2 }
 0x287   : > { %v2159_v4 = vadd.f32 %v2158_v16, %v2128_v2  ;;  %v1798_v47 = vadd.f32 %v1797_v44, %v1709_v1  ;;  %v1886_v19 = vpop.f32.mrf.mxu3  ;;  %v3904_v1 = vld [vmem:[#allocation8_spill] sm:$0xff] }
 0x288   : > { %v1711_v10 = vpop.f32.mrf.mxu1 }
 0x289   : > { %v1887_v57 = vadd.f32 %v1886_v19, %v1798_v47  ;;  %v1712_v26 = vadd.f32 %v1711_v10, %v3641_v62 }
 0x28a   : > { %v1978_v20 = vpop.f32.mrf.mxu0 }
 0x28b   : > { %v1976_v34 = vadd.f32 %v1975_v58, %v1887_v57 }
 0x28d   : > { %v2704_v54 = vpack.c.bf16 %v1976_v34, %v1974_v18  ;;  %v2090_v39 = vadd.f32 %v2089_v7, %v1976_v34  ;;  %v2129_v38 = vmul.f32 %v1976_v34, %v1976_v34 }
 0x28e   : > { %v1800_v25 = vpop.f32.mrf.mxu2 }
 0x28f   : > { %2744 = vst [vmem:[%s3708_s29 + $0x48] sm:$0xff] %v2704_v54   ;;  %v2160_v52 = vadd.f32 %v2159_v4, %v2129_v38  ;;  %v1801_v21 = vadd.f32 %v1800_v25, %v1712_v26  ;;  %v1889_v49 = vpop.f32.mrf.mxu3  ;;  %v3905_v26 = vld [vmem:[#allocation9_spill] sm:$0xff] }
 0x290   : > { %v1713_v3 = vpop.f32.mrf.mxu1 }
 0x291   : > { %v1890_v61 = vadd.f32 %v1889_v49, %v1801_v21  ;;  %v1714_v28 = vadd.f32 %v1713_v3, %v3646_v13 }
 0x292   : > { %v1980_v51 = vpop.f32.mrf.mxu0 }
 0x293   : > { %v1979_v14 = vadd.f32 %v1978_v20, %v1890_v61 }
 0x295   : > { %v2091_v42 = vadd.f32 %v2090_v39, %v1979_v14  ;;  %v2130_v9 = vmul.f32 %v1979_v14, %v1979_v14 }
 0x296   : > { %v1802_v33 = vpop.f32.mrf.mxu2 }
 0x297   : > { %v2161_v40 = vadd.f32 %v2160_v52, %v2130_v9  ;;  %v1803_v32 = vadd.f32 %v1802_v33, %v1714_v28  ;;  %v1891_v24 = vpop.f32.mrf.mxu3 }
 0x298   : > { %v1716_v37 = vpop.f32.mrf.mxu1 }
 0x299   : > { %v1892_v62 = vadd.f32 %v1891_v24, %v1803_v32  ;;  %v1717_v23 = vadd.f32 %v1716_v37, %v3902_v12 }
 0x29a   : > { %v1983_v56 = vpop.f32.mrf.mxu0 }
 0x29b   : > { %v1981_v53 = vadd.f32 %v1980_v51, %v1892_v62 }
 0x29d   : > { %v2709_v63 = vpack.c.bf16 %v1981_v53, %v1979_v14  ;;  %v2092_v17 = vadd.f32 %v2091_v42, %v1981_v53  ;;  %v2131_v41 = vmul.f32 %v1981_v53, %v1981_v53 }
 0x29e   : > { %v1805_v35 = vpop.f32.mrf.mxu2 }
 0x29f   : > { %2745 = vst [vmem:[%s3708_s29 + $0x50] sm:$0xff] %v2709_v63   ;;  %v2162_v5 = vadd.f32 %v2161_v40, %v2131_v41  ;;  %v1806_v29 = vadd.f32 %v1805_v35, %v1717_v23  ;;  %v1894_v43 = vpop.f32.mrf.mxu3  ;;  %v3906_v40 = vld [vmem:[#allocation23_spill] sm:$0xff]  ;;  %v3907_v35 = vld [vmem:[#allocation25_spill] sm:$0xff] }
 0x2a0   : > { %v1718_v31 = vpop.f32.mrf.mxu1 }
 0x2a1   : > { %v1895_v13 = vadd.f32 %v1894_v43, %v1806_v29  ;;  %v1719_v0 = vadd.f32 %v1718_v31, %v3903_v48 }
 0x2a2   : > { %v1985_v55 = vpop.f32.mrf.mxu0 }
 0x2a3   : > { %v1984_v60 = vadd.f32 %v1983_v56, %v1895_v13 }
 0x2a5   : > { %v2093_v36 = vadd.f32 %v2092_v17, %v1984_v60  ;;  %v2132_v11 = vmul.f32 %v1984_v60, %v1984_v60 }
 0x2a6   : > { %v1807_v15 = vpop.f32.mrf.mxu2 }
 0x2a7   : > { %v2163_v50 = vadd.f32 %v2162_v5, %v2132_v11  ;;  %v1808_v16 = vadd.f32 %v1807_v15, %v1719_v0  ;;  %v1896_v27 = vpop.f32.mrf.mxu3 }
 0x2a8   : > { %v1721_v59 = vpop.f32.mrf.mxu1 }
 0x2a9   : > { %v1897_v45 = vadd.f32 %v1896_v27, %v1808_v16  ;;  %v1722_v44 = vadd.f32 %v1721_v59, %v3904_v1 }
 0x2aa   : > { %v1988_v8 = vpop.f32.mrf.mxu0 }
 0x2ab   : > { %v1986_v58 = vadd.f32 %v1985_v55, %v1897_v45 }
 0x2ad   : > { %v2714_v18 = vpack.c.bf16 %v1986_v58, %v1984_v60  ;;  %v2094_v7 = vadd.f32 %v2093_v36, %v1986_v58  ;;  %v2133_v2 = vmul.f32 %v1986_v58, %v1986_v58 }
 0x2ae   : > { %v1810_v4 = vpop.f32.mrf.mxu2 }
 0x2af   : > { %2746 = vst [vmem:[%s3708_s29 + $0x58] sm:$0xff] %v2714_v18   ;;  %v2164_v47 = vadd.f32 %v2163_v50, %v2133_v2  ;;  %v1811_v19 = vadd.f32 %v1810_v4, %v1722_v44  ;;  %v1899_v10 = vpop.f32.mrf.mxu3 }
 0x2b0   : > { %v1723_v57 = vpop.f32.mrf.mxu1 }
 0x2b1   : > { %v1900_v20 = vadd.f32 %v1899_v10, %v1811_v19  ;;  %v1724_v25 = vadd.f32 %v1723_v57, %v3905_v26 }
 0x2b2   : > { %v1990_v34 = vpop.f32.mrf.mxu0 }
 0x2b3   : > { %v1989_v54 = vadd.f32 %v1988_v8, %v1900_v20 }
 0x2b5   : > { %v2095_v39 = vadd.f32 %v2094_v7, %v1989_v54  ;;  %v2134_v38 = vmul.f32 %v1989_v54, %v1989_v54 }
 0x2b6   : > { %v1812_v52 = vpop.f32.mrf.mxu2 }
 0x2b7   : > { %v2165_v21 = vadd.f32 %v2164_v47, %v2134_v38  ;;  %v1813_v49 = vadd.f32 %v1812_v52, %v1724_v25  ;;  %v1901_v3 = vpop.f32.mrf.mxu3 }
 0x2b8   : > { %v1726_v61 = vpop.f32.mrf.mxu1 }
 0x2b9   : > { %v1902_v51 = vadd.f32 %v1901_v3, %v1813_v49  ;;  %v1727_v32 = vadd.f32 %v1726_v61, %v3906_v40 }
 0x2ba   : > { %v1993_v14 = vpop.f32.mrf.mxu0 }
 0x2bb   : > { %v1991_v42 = vadd.f32 %v1990_v34, %v1902_v51 }
 0x2bd   : > { %v2719_v9 = vpack.c.bf16 %v1991_v42, %v1989_v54  ;;  %v2096_v28 = vadd.f32 %v2095_v39, %v1991_v42  ;;  %v2135_v33 = vmul.f32 %v1991_v42, %v1991_v42 }
 0x2be   : > { %v1815_v24 = vpop.f32.mrf.mxu2 }
 0x2bf   : > { %2747 = vst [vmem:[%s3708_s29 + $0x60] sm:$0xff] %v2719_v9   ;;  %v2166_v37 = vadd.f32 %v2165_v21, %v2135_v33  ;;  %v1816_v62 = vadd.f32 %v1815_v24, %v1727_v32  ;;  %v1904_v56 = vpop.f32.mrf.mxu3 }
 0x2c0   : > { %v1728_v53 = vpop.f32.mrf.mxu1 }
 0x2c1   : > { %v1905_v63 = vadd.f32 %v1904_v56, %v1816_v62  ;;  %v1729_v5 = vadd.f32 %v1728_v53, %v3907_v35 }
 0x2c2   : > { %v1995_v17 = vpop.f32.mrf.mxu0 }
 0x2c3   : > { %v1994_v41 = vadd.f32 %v1993_v14, %v1905_v63 }
 0x2c5   : > { %v2097_v12 = vadd.f32 %v2096_v28, %v1994_v41  ;;  %v2136_v23 = vmul.f32 %v1994_v41, %v1994_v41 }
 0x2c6   : > { %v1817_v29 = vpop.f32.mrf.mxu2 }
 0x2c7   : > { %v2167_v43 = vadd.f32 %v2166_v37, %v2136_v23  ;;  %v1818_v31 = vadd.f32 %v1817_v29, %v1729_v5  ;;  %v1906_v13 = vpop.f32.mrf.mxu3 }
 0x2c8   : > { %v1731_v55 = vpop.f32.mrf.mxu1 }
 0x2c9   : > { %v1907_v60 = vadd.f32 %v1906_v13, %v1818_v31  ;;  %v1732_v50 = vadd.f32 %v1731_v55, %v3681_v6 }
 0x2ca   : > { %v1998_v11 = vpop.f32.mrf.mxu0 }
 0x2cb   : > { %v1996_v36 = vadd.f32 %v1995_v17, %v1907_v60 }
 0x2cd   : > { %v2724_v48 = vpack.c.bf16 %v1996_v36, %v1994_v41  ;;  %v2098_v0 = vadd.f32 %v2097_v12, %v1996_v36  ;;  %v2137_v15 = vmul.f32 %v1996_v36, %v1996_v36 }
 0x2ce   : > { %v1820_v16 = vpop.f32.mrf.mxu2 }
 0x2cf   : > { %2748 = vst [vmem:[%s3708_s29 + $0x68] sm:$0xff] %v2724_v48   ;;  %v2168_v27 = vadd.f32 %v2167_v43, %v2137_v15  ;;  %v1821_v59 = vadd.f32 %v1820_v16, %v1732_v50  ;;  %v1909_v45 = vpop.f32.mrf.mxu3 }
 0x2d0   : > { %v1733_v8 = vpop.f32.mrf.mxu1 }
 0x2d1   : > { %v1910_v58 = vadd.f32 %v1909_v45, %v1821_v59  ;;  %v1734_v1 = vadd.f32 %v1733_v8, %v3686_v22 }
 0x2d2   : > { %v2000_v44 = vpop.f32.mrf.mxu0 }
 0x2d3   : > { %v1999_v18 = vadd.f32 %v1998_v11, %v1910_v58 }
 0x2d5   : > { %v2099_v7 = vadd.f32 %v2098_v0, %v1999_v18  ;;  %v2138_v2 = vmul.f32 %v1999_v18, %v1999_v18 }
 0x2d6   : > { %v1822_v4 = vpop.f32.mrf.mxu2 }
 0x2d7   : > { %v2169_v47 = vadd.f32 %v2168_v27, %v2138_v2  ;;  %v1823_v19 = vadd.f32 %v1822_v4, %v1734_v1  ;;  %v1911_v10 = vpop.f32.mrf.mxu3 }
 0x2d8   : > { %v1736_v57 = vpop.f32.mrf.mxu1 }
 0x2d9   : > { %v1912_v6 = vadd.f32 %v1911_v10, %v1823_v19  ;;  %v1737_v38 = vadd.f32 %v1736_v57, %v3691_v46 }
 0x2da   : > { %v2003_v49 = vpop.f32.mrf.mxu0 }
 0x2db   : > { %v2001_v20 = vadd.f32 %v2000_v44, %v1912_v6 }
 0x2dd   : > { %v2729_v34 = vpack.c.bf16 %v2001_v20, %v1999_v18  ;;  %v2100_v54 = vadd.f32 %v2099_v7, %v2001_v20  ;;  %v2139_v39 = vmul.f32 %v2001_v20, %v2001_v20 }
 0x2de   : > { %v1825_v26 = vpop.f32.mrf.mxu2 }
 0x2df   : > { %2749 = vst [vmem:[%s3708_s29 + $0x70] sm:$0xff] %v2729_v34   ;;  %v2170_v25 = vadd.f32 %v2169_v47, %v2139_v39  ;;  %v1826_v52 = vadd.f32 %v1825_v26, %v1737_v38  ;;  %v1914_v21 = vpop.f32.mrf.mxu3 }
 0x2e0   : > { %v1738_v3 = vpop.f32.mrf.mxu1 }
 0x2e1   : > { %v1915_v22 = vadd.f32 %v1914_v21, %v1826_v52  ;;  %v1739_v42 = vadd.f32 %v1738_v3, %v3696_v30 }
 0x2e2   : > { %v2005_v46 = vpop.f32.mrf.mxu0 }
 0x2e3   : > { %v2004_v61 = vadd.f32 %v2003_v49, %v1915_v22 }
 0x2e5   : > { %v2101_v51 = vadd.f32 %v2100_v54, %v2004_v61  ;;  %v2140_v14 = vmul.f32 %v2004_v61, %v2004_v61 }
 0x2e6   : > { %v1827_v9 = vpop.f32.mrf.mxu2 }
 0x2e7   : > { %v2171_v28 = vadd.f32 %v2170_v25, %v2140_v14  ;;  %v1828_v33 = vadd.f32 %v1827_v9, %v1739_v42  ;;  %v1916_v40 = vpop.f32.mrf.mxu3 }
 0x2e9   : > { %v1917_v32 = vadd.f32 %v1916_v40, %v1828_v33 }
 0x2eb   : > { %v2006_v24 = vadd.f32 %v2005_v46, %v1917_v32 }
 0x2ed   : > { %v2734_v37 = vpack.c.bf16 %v2006_v24, %v2004_v61  ;;  %v2102_v62 = vadd.f32 %v2101_v51, %v2006_v24  ;;  %v2141_v56 = vmul.f32 %v2006_v24, %v2006_v24 }
 0x2ef   : > { %2750 = vst [vmem:[%s3708_s29 + $0x78] sm:$0xff] %v2734_v37   ;;  %v2103_v53 = vrot.slane %v2102_v62, 4  ;;  %v2172_v63 = vadd.f32 %v2171_v28, %v2141_v56 }
 0x2f1   : > { %v2104_v17 = vadd.f32 %v2103_v53, %v2102_v62  ;;  %v2173_v41 = vrot.slane %v2172_v63, 4 }
 0x2f3   : > { %v2105_v12 = vrot.slane %v2104_v17, 2  ;;  %v2174_v23 = vadd.f32 %v2173_v41, %v2172_v63 }
 0x2f5   : > { %v2106_v30 = vadd.f32 %v2105_v12, %v2104_v17  ;;  %v2175_v35 = vrot.slane %v2174_v23, 2 }
 0x2f7   : > { %v2107_v5 = vrot.slane %v2106_v30, 1  ;;  %v2176_v29 = vadd.f32 %v2175_v35, %v2174_v23 }
 0x2f9   : > { %v2108_v43 = vadd.f32 %v2107_v5, %v2106_v30  ;;  %v2177_v31 = vrot.slane %v2176_v29, 1 }
 0x2fb   : > { %2109 = vst [vmem:[%s211_s5] sm:$0x1] %v2108_v43  ;;  %v2178_v13 = vadd.f32 %v2177_v31, %v2176_v29 }
 0x2fd   : > { %2179 = vst [vmem:[%s214_s9] sm:$0x1] %v2178_v13 }
 0x2fe PF: > { %s15_s15 = sadd.s32 1, %s2790_s15  }
 0x2ff   : > { %p12_p4 = scmp.ge.s32.totalorder %s15_s15, 4  }
 0x301   :  { %14 = sbr.rel (!%p12_p4) target bundleno = 1 (0x1), region = 82 }

// kernel: conv_block_forward.4
= control target key start
LH: loop header
LB: loop body
LE: loop exit
PB: predicated region body
PF: predicated region fallthrough
CT: control target
= control target key end

     0   :  { %s3291_s27 = smov 0   ;;  %s4359_s0 = inlined_call_operand.vmem [shape: bf16[2,16,16,128], index: 0, kind: input, shape index: {}]   ;;  %s4360_s1 = inlined_call_operand.vmem [shape: f32[1,128], index: 1, kind: input, shape index: {}]   ;;  %s4361_s2 = inlined_call_operand.vmem [shape: f32[1,128], index: 2, kind: input, shape index: {}]   ;;  %s4362_s3 = inlined_call_operand.vmem [shape: f32[1,128], index: 3, kind: input, shape index: {}]   ;;  %s4363_s4 = inlined_call_operand.vmem [shape: f32[1,128], index: 4, kind: input, shape index: {}]   ;;  %s4364_s5 = inlined_call_operand.vmem [shape: bf16[1152,128], index: 5, kind: input, shape index: {}]   ;;  %s4365_s6 = inlined_call_operand.vmem [shape: bf16[2,16,16,128], index: 6, kind: output, shape index: {0}]   ;;  %s4366_s7 = inlined_call_operand.vmem [shape: f32[2,1,128], index: 7, kind: output, shape index: {1}]   ;;  %s4367_s8 = inlined_call_operand.vmem [shape: f32[2,1,128], index: 8, kind: output, shape index: {2}]  }
   0x1 LB: > { %s2653_s28 = sadd.s32 4294967295, %s3242_s27   ;;  %p2657_p0 = scmp.ge.s32.totalorder %s3242_s27, 1  ;;  %s3242_s27 = sphi %s3291_s27, %s19_s27  }
   0x2   : > { %p267_p1 = scmp.lt.s32.totalorder %s3242_s27, 3 }
   0x4   : > { %p268_p2 = pnand %p2657_p0, %p267_p1 }
   0x6   : > { %271 = sbr.rel (%p268_p2) target bundleno = 786 (0x312), region = 44 }
   0xb   : > { %v2961_v0 = vld [vmem:[%s4364_s5 + $0x38] sm:$0xff]  ;;  %v2960_v1 = vld [vmem:[%s4364_s5 + $0x30] sm:$0xff]  ;;  %v323_v2 = vld [vmem:[%s4360_s1] sm:$0x1]  ;;  %v3244_v9 = vmov 0.0   ;;  %p307_p3 = scmp.lt.s32.totalorder %s2653_s28, 1 }
   0xc   : > { %3200 = vmatpush.bf16.msra.mxu1 %v2961_v0  ;;  %3201 = vmatpush.bf16.msra.mxu2 %v2961_v0  ;;  %v324_v3 = vld [vmem:[%s4361_s2] sm:$0x1]  ;;  %v3311_v4 = vmul.f32 0.001953125, %v323_v2  ;;  %v2959_v6 = vld [vmem:[%s4364_s5 + $0x28] sm:$0xff]  ;;  %522 = vst [vmem:[#allocation2 + $0x60] sm:$0x1] %v3244_v9 }
   0xd   : > { %3202 = vmatpush.bf16.msra.mxu3 %v2961_v0  ;;  %1575 = vmatpush.bf16.msra.mxu0 %v2961_v0  ;;  %v328_v5 = vmul.f32 0.001953125, %v324_v3  ;;  %v2958_v10 = vld [vmem:[%s4364_s5 + $0x20] sm:$0xff]  ;;  %511 = vst [vmem:[#allocation2] sm:$0xff] %v3244_v9  ;;  %v2957_v12 = vld [vmem:[%s4364_s5 + $0x18] sm:$0xff]  ;;  %s4479_s28 = smov (!%p307_p3, %s2653_s28), 1  ;;  %v2956_v14 = vld [vmem:[%s4364_s5 + $0x10] sm:$0xff] }
   0xe   : > { %v329_v7 = vmul.f32 %v3311_v4, %v3311_v4  ;;  %513 = vst [vmem:[#allocation2 + $0x10] sm:$0x3] %v3244_v9  ;;  %s2952_s23 = sshll.u32 %s4479_s28, 7  ;;  %v2955_v17 = vld [vmem:[%s4364_s5 + $0x8] sm:$0xff]  ;;  %v2954_v20 = vld [vmem:[%s4364_s5] sm:$0xff]  ;;  %v2977_v29 = vld [vmem:[%s4364_s5 + $0xb8] sm:$0xff]  ;;  %s319_s20 = scalar_lea.vmem %s4366_s7, %s4479_s28 }
   0xf   : > { %517 = vst [vmem:[#allocation2 + $0x1a8] sm:$0x3] %v3244_v9  ;;  %s3354_s30 = scalar_lea.vmem %s4359_s0, %s2952_s23  ;;  %v325_v21 = vld [vmem:[%s4362_s3] sm:$0x1]  ;;  %v2985_v30 = vld [vmem:[%s4364_s5 + $0xf8] sm:$0xff]  ;;  %v2976_v36 = vld [vmem:[%s4364_s5 + $0xb0] sm:$0xff]  ;;  %s4269_s18 = scalar_lea.vmem %s4365_s6, %s2952_s23 }
  0x10   : > { %3203 = vmatpush.bf16.msra.mxu1 %v2960_v1  ;;  %3204 = vmatpush.bf16.msra.mxu2 %v2960_v1  ;;  %v330_v8 = vsub.f32 %v328_v5, %v329_v7  ;;  %519 = vst [vmem:[#allocation2 + $0x18] sm:$0x1] %v3244_v9  ;;  %v3172_v23 = vld [vmem:[%s3354_s30 + $0x18] sm:$0xff]   ;;  %v326_v31 = vld [vmem:[%s4363_s4] sm:$0x1]  ;;  %v2984_v37 = vld [vmem:[%s4364_s5 + $0xf0] sm:$0xff]  ;;  %s322_s24 = scalar_lea.vmem %s4367_s8, %s4479_s28 }
  0x11   : > { %3205 = vmatpush.bf16.msra.mxu3 %v2960_v1  ;;  %1576 = vmatpush.bf16.msra.mxu0 %v2960_v1  ;;  %520 = vst [vmem:[#allocation2 + $0x30] sm:$0x1] %v3244_v9  ;;  %v3040_v26 = vunpack.c.l.bf16 %v3172_v23  ;;  %v3041_v27 = vunpack.c.h.bf16 %v3172_v23  ;;  %v3176_v28 = vld [vmem:[%s3354_s30 + $0x38] sm:$0xff]   ;;  %v2968_v40 = vld [vmem:[%s4364_s5 + $0x70] sm:$0xff]  ;;  %v3173_v41 = vld [vmem:[%s3354_s30 + $0x20] sm:$0xff]   ;;  %v3245_v48 = vmov 0.0|0.0  }
  0x12   : > { %v331_v11 = vadd.f32 1e-05, %v330_v8  ;;  %521 = vst [vmem:[#allocation2 + $0x48] sm:$0x1] %v3244_v9  ;;  %v2969_v32 = vld [vmem:[%s4364_s5 + $0x78] sm:$0xff]  ;;  %v3056_v38 = vunpack.c.l.bf16 %v3176_v28  ;;  %v3057_v45 = vunpack.c.h.bf16 %v3176_v28  ;;  %v3177_v49 = vld [vmem:[%s3354_s30 + $0x40] sm:$0xff]   ;;  %v3044_v51 = vunpack.c.l.bf16 %v3173_v41 }
  0x13   : > { %523 = vst [vmem:[#allocation2 + $0x78] sm:$0x1] %v3244_v9  ;;  %v3180_v35 = vld [vmem:[%s3354_s30 + $0x58] sm:$0xff]   ;;  %v3045_v53 = vunpack.c.h.bf16 %v3173_v41  ;;  %v3060_v57 = vunpack.c.l.bf16 %v3177_v49  ;;  %v3181_v58 = vld [vmem:[%s3354_s30 + $0x60] sm:$0xff]   ;;  %v3061_v0 = vunpack.c.h.bf16 %v3177_v49  ;;  %v3170_v41 = vld [vmem:[%s3354_s30 + $0x8] sm:$0xff]   ;;  %vm942_vm3 = vcmask 1045504  }
  0x14   : > { %3206 = vmatpush.bf16.msra.mxu1 %v2959_v6  ;;  %3207 = vmatpush.bf16.msra.mxu2 %v2959_v6  ;;  %3233 = vrsqrt.f32 %v331_v11  ;;  %524 = vst [vmem:[#allocation2 + $0x90] sm:$0x1] %v3244_v9  ;;  %vm338_vm0 = vweird.f32 %v331_v11  ;;  %v2993_v39 = vld [vmem:[%s4364_s5 + $0x138] sm:$0xff]  ;;  %v3072_v46 = vunpack.c.l.bf16 %v3180_v35  ;;  %v3073_v47 = vunpack.c.h.bf16 %v3180_v35  ;;  %v3027_v1 = vld [vmem:[%s3354_s30] sm:$0xff]  }
  0x15   : > { %3208 = vmatpush.bf16.msra.mxu3 %v2959_v6  ;;  %1577 = vmatpush.bf16.msra.mxu0 %v2959_v6  ;;  %525 = vst [vmem:[#allocation2 + $0xa8] sm:$0x1] %v3244_v9  ;;  %v3077_v7 = vunpack.c.h.bf16 %v3181_v58  ;;  %vm829_vm4 = vcmask 1046528  }
  0x16   : > { %526 = vst [vmem:[#allocation2 + $0xc0] sm:$0x1] %v3244_v9 }
  0x17   : > { %527 = vst [vmem:[#allocation2 + $0xd8] sm:$0x1] %v3244_v9 }
  0x18   : > { %3209 = vmatpush.bf16.msra.mxu1 %v2958_v10  ;;  %3210 = vmatpush.bf16.msra.mxu2 %v2958_v10  ;;  %528 = vst [vmem:[#allocation2 + $0xf0] sm:$0x1] %v3244_v9 }
  0x19   : > { %3211 = vmatpush.bf16.msra.mxu3 %v2958_v10  ;;  %1578 = vmatpush.bf16.msra.mxu0 %v2958_v10  ;;  %529 = vst [vmem:[#allocation2 + $0x108] sm:$0x1] %v3244_v9 }
  0x1a   : > { %v3234_v13 = vpop.eup %3233  ;;  %530 = vst [vmem:[#allocation2 + $0x120] sm:$0x1] %v3244_v9 }
  0x1b   : > { %v333_v15 = vmul.f32 %v3234_v13, %v331_v11  ;;  %vm339_vm1 = vweird.f32 %v3234_v13  ;;  %531 = vst [vmem:[#allocation2 + $0x138] sm:$0x1] %v3244_v9  ;;  %v3028_v11 = vunpack.c.l.bf16 %v3027_v1 }
  0x1c   : > { %3212 = vmatpush.bf16.msra.mxu1 %v2957_v12  ;;  %3213 = vmatpush.bf16.msra.mxu2 %v2957_v12  ;;  %vm340_vm2 = vmor %vm338_vm0, %vm339_vm1  ;;  %532 = vst [vmem:[#allocation2 + $0x150] sm:$0x1] %v3244_v9 }
  0x1d   : > { %3214 = vmatpush.bf16.msra.mxu3 %v2957_v12  ;;  %1579 = vmatpush.bf16.msra.mxu0 %v2957_v12  ;;  %v334_v16 = vmul.f32 %v3234_v13, %v333_v15  ;;  %533 = vst [vmem:[#allocation2 + $0x168] sm:$0x1] %v3244_v9  ;;  %v3174_v12 = vld [vmem:[%s3354_s30 + $0x28] sm:$0xff]   ;;  %v3029_v15 = vunpack.c.h.bf16 %v3027_v1  ;;  %v3033_v1 = vunpack.c.h.bf16 %v3170_v41 }
  0x1e   : > { %534 = vst [vmem:[#allocation2 + $0x180] sm:$0x1] %v3244_v9  ;;  %v3049_v28 = vunpack.c.h.bf16 %v3174_v12 }
  0x1f   : > { %v335_v18 = vmul.f32 0.5, %v334_v16  ;;  %535 = vst [vmem:[#allocation2 + $0x29] sm:$0x1] %v3244_v9  ;;  %v3178_v16 = vld [vmem:[%s3354_s30 + $0x48] sm:$0xff]  }
  0x20   : > { %3215 = vmatpush.bf16.msra.mxu1 %v2956_v14  ;;  %3216 = vmatpush.bf16.msra.mxu2 %v2956_v14  ;;  %536 = vst [vmem:[#allocation2 + $0x41] sm:$0x1] %v3244_v9 }
  0x21   : > { %3217 = vmatpush.bf16.msra.mxu3 %v2956_v14  ;;  %1580 = vmatpush.bf16.msra.mxu0 %v2956_v14  ;;  %v336_v19 = vsub.f32 1.5, %v335_v18  ;;  %537 = vst [vmem:[#allocation2 + $0x59] sm:$0x1] %v3244_v9 }
  0x22   : > { %538 = vst [vmem:[#allocation2 + $0x71] sm:$0x1] %v3244_v9 }
  0x23   : > { %v337_v22 = vmul.f32 %v3234_v13, %v336_v19  ;;  %539 = vst [vmem:[#allocation2 + $0x89] sm:$0x1] %v3244_v9 }
  0x24   : > { %3218 = vmatpush.bf16.msra.mxu1 %v2955_v17  ;;  %3219 = vmatpush.bf16.msra.mxu2 %v2955_v17  ;;  %540 = vst [vmem:[#allocation2 + $0xa1] sm:$0x1] %v3244_v9 }
  0x25   : > { %3220 = vmatpush.bf16.msra.mxu3 %v2955_v17  ;;  %1581 = vmatpush.bf16.msra.mxu0 %v2955_v17  ;;  %v341_v24 = vsel %vm340_vm2, %v3234_v13, %v337_v22  ;;  %541 = vst [vmem:[#allocation2 + $0xb9] sm:$0x1] %v3244_v9 }
  0x26   : > { %v342_v25 = vmul.f32 %v341_v24, %v325_v21  ;;  %542 = vst [vmem:[#allocation2 + $0xd1] sm:$0x1] %v3244_v9  ;;  %v3440_v21 = vld [vmem:[%s3354_s30 + $0x68] sm:$0xff]  }
  0x27   : > { %543 = vst [vmem:[#allocation2 + $0xe9] sm:$0x1] %v3244_v9 }
  0x28   : > { %3221 = vmatpush.bf16.msra.mxu1 %v2954_v20  ;;  %3222 = vmatpush.bf16.msra.mxu2 %v2954_v20  ;;  %v343_v33 = vmul.f32 %v342_v25, %v3311_v4  ;;  %v3385_v34 = vperm.slane %v342_v25, 0  ;;  %544 = vst [vmem:[#allocation2 + $0x101] sm:$0x1] %v3244_v9  ;;  %v3076_v4 = vunpack.c.l.bf16 %v3181_v58  ;;  %v2975_v25 = vld [vmem:[%s4364_s5 + $0xa8] sm:$0xff]  ;;  %v3032_v58 = vunpack.c.l.bf16 %v3170_v41  ;;  %v2965_v41 = vld [vmem:[%s4364_s5 + $0x58] sm:$0xff] }
  0x29   : > { %3223 = vmatpush.bf16.msra.mxu3 %v2954_v20  ;;  %1582 = vmatpush.bf16.msra.mxu0 %v2954_v20  ;;  %545 = vst [vmem:[#allocation2 + $0x119] sm:$0x1] %v3244_v9  ;;  %v3048_v20 = vunpack.c.l.bf16 %v3174_v12 }
  0x2a   : > { %v344_v42 = vsub.f32 %v326_v31, %v343_v33  ;;  %v418_v43 = vmul.f32 %v3040_v26, %v3385_v34  ;;  %v419_v44 = vmul.f32 %v3041_v27, %v3385_v34  ;;  %v426_v52 = vmul.f32 %v3056_v38, %v3385_v34  ;;  %546 = vst [vmem:[#allocation2 + $0x131] sm:$0x1] %v3244_v9  ;;  %v2983_v26 = vld [vmem:[%s4364_s5 + $0xe8] sm:$0xff]  ;;  %v2992_v27 = vld [vmem:[%s4364_s5 + $0x130] sm:$0xff]  ;;  %v2974_v38 = vld [vmem:[%s4364_s5 + $0xa0] sm:$0xff] }
  0x2b   : > { %v427_v56 = vmul.f32 %v3057_v45, %v3385_v34  ;;  %v434_v59 = vmul.f32 %v3072_v46, %v3385_v34  ;;  %v435_v60 = vmul.f32 %v3073_v47, %v3385_v34  ;;  %v420_v63 = vmul.f32 %v3044_v51, %v3385_v34  ;;  %547 = vst [vmem:[#allocation2 + $0x149] sm:$0x1] %v3244_v9  ;;  %v2991_v45 = vld [vmem:[%s4364_s5 + $0x128] sm:$0xff] }
  0x2c   : > { %1753 = vmatpush.bf16.msrb.mxu2 %v2977_v29  ;;  %1664 = vmatpush.bf16.msrb.mxu1 %v2969_v32  ;;  %v3408_v50 = vperm.slane %v344_v42, 0  ;;  %v421_v3 = vmul.f32 %v3045_v53, %v3385_v34  ;;  %v428_v6 = vmul.f32 %v3060_v57, %v3385_v34  ;;  %v429_v14 = vmul.f32 %v3061_v0, %v3385_v34  ;;  %v2967_v32 = vld [vmem:[%s4364_s5 + $0x68] sm:$0xff] }
  0x2d   : > { %1842 = vmatpush.bf16.msrb.mxu3 %v2985_v30  ;;  %1583 = vmatmul.bf16.vlgmr.msra.gmra.mxu0 %v3245_v48  ;;  %v436_v19 = vmul.f32 %v3076_v4, %v3385_v34  ;;  %548 = vst [vmem:[#allocation2 + $0x161] sm:$0x1] %v3244_v9  ;;  %v437_v24 = vmul.f32 %v3077_v7, %v3385_v34  ;;  %v3064_v33 = vunpack.c.l.bf16 %v3178_v16  ;;  %v3080_v47 = vunpack.c.l.bf16 %v3440_v21 }
  0x2e   : > { %1931 = vmatpush.bf16.msrb.mxu0 %v2993_v39  ;;  %v453_v54 = vadd.f32 %v3408_v50, %v418_v43  ;;  %v454_v55 = vadd.f32 %v3408_v50, %v419_v44  ;;  %v461_v2 = vadd.f32 %v3408_v50, %v426_v52  ;;  %v462_v5 = vadd.f32 %v3408_v50, %v427_v56  ;;  %v2982_v39 = vld [vmem:[%s4364_s5 + $0xe0] sm:$0xff] }
  0x2f   : > { %v469_v8 = vadd.f32 %v3408_v50, %v434_v59  ;;  %v470_v10 = vadd.f32 %v3408_v50, %v435_v60  ;;  %v455_v13 = vadd.f32 %v3408_v50, %v420_v63  ;;  %v456_v18 = vadd.f32 %v3408_v50, %v421_v3  ;;  %549 = vst [vmem:[#allocation2 + $0x179] sm:$0x1] %v3244_v9  ;;  %v2966_v52 = vld [vmem:[%s4364_s5 + $0x60] sm:$0xff] }
  0x30   : > { %1754 = vmatpush.bf16.msrb.mxu2 %v2976_v36  ;;  %1665 = vmatpush.bf16.msrb.mxu1 %v2968_v40  ;;  %v485_v61 = vmax.f32 %v453_v54, 0.0  ;;  %v486_v62 = vmax.f32 %v454_v55, 0.0  ;;  %v493_v17 = vmax.f32 %v461_v2, 0.0  ;;  %v494_v22 = vmax.f32 %v462_v5, 0.0  ;;  %550 = vst [vmem:[#allocation2 + $0x191] sm:$0x1] %v3244_v9 }
  0x31   : > { %1843 = vmatpush.bf16.msrb.mxu3 %v2984_v37  ;;  %v463_v23 = vadd.f32 %v3408_v50, %v428_v6  ;;  %v501_v29 = vmax.f32 %v469_v8, 0.0  ;;  %v502_v30 = vmax.f32 %v470_v10, 0.0  ;;  %v412_v31 = vmul.f32 %v3028_v11, %v3385_v34 }
  0x32   : > { %557 = vst [vmem:[#allocation2 + $0x61] sm:$0xff] %v485_v61  ;;  %v487_v35 = vmax.f32 %v455_v13, 0.0  ;;  %v464_v36 = vadd.f32 %v3408_v50, %v429_v14  ;;  %v413_v37 = vmul.f32 %v3029_v15, %v3385_v34  ;;  %v3065_v40 = vunpack.c.h.bf16 %v3178_v16  ;;  %1932 = vmatpush.bf16.msrb.mxu0 %v2992_v27 }
  0x33   : > { %558 = vst [vmem:[#allocation2 + $0x69] sm:$0xff] %v486_v62  ;;  %v488_v43 = vmax.f32 %v456_v18, 0.0  ;;  %v471_v44 = vadd.f32 %v3408_v50, %v436_v19  ;;  %v422_v46 = vmul.f32 %v3048_v20, %v3385_v34  ;;  %v495_v49 = vmax.f32 %v463_v23, 0.0  ;;  %v3175_v23 = vld [vmem:[%s3354_s30 + $0x30] sm:$0xff]  }
  0x34   : > { %1755 = vmatpush.bf16.msrb.mxu2 %v2975_v25  ;;  %565 = vst [vmem:[#allocation2 + $0xc1] sm:$0xff] %v493_v17  ;;  %1666 = vmatpush.bf16.msrb.mxu1 %v2967_v32  ;;  %v472_v51 = vadd.f32 %v3408_v50, %v437_v24  ;;  %v423_v53 = vmul.f32 %v3049_v28, %v3385_v34  ;;  %v3081_v54 = vunpack.c.h.bf16 %v3440_v21  ;;  %v496_v59 = vmax.f32 %v464_v36, 0.0  ;;  %v3179_v28 = vld [vmem:[%s3354_s30 + $0x50] sm:$0xff]   ;;  %v2973_v36 = vld [vmem:[%s4364_s5 + $0x98] sm:$0xff] }
  0x35   : > { %1844 = vmatpush.bf16.msrb.mxu3 %v2983_v26  ;;  %566 = vst [vmem:[#allocation2 + $0xc9] sm:$0xff] %v494_v22  ;;  %v447_v56 = vadd.f32 %v3408_v50, %v412_v31  ;;  %v430_v57 = vmul.f32 %v3064_v33, %v3385_v34  ;;  %v448_v60 = vadd.f32 %v3408_v50, %v413_v37  ;;  %v503_v62 = vmax.f32 %v471_v44, 0.0  ;;  %v2981_v37 = vld [vmem:[%s4364_s5 + $0xd8] sm:$0xff] }
  0x36   : > { %573 = vst [vmem:[#allocation2 + $0x121] sm:$0xff] %v501_v29  ;;  %v431_v61 = vmul.f32 %v3065_v40, %v3385_v34  ;;  %1933 = vmatpush.bf16.msrb.mxu0 %v2991_v45  ;;  %v457_v63 = vadd.f32 %v3408_v50, %v422_v46  ;;  %v438_v0 = vmul.f32 %v3080_v47, %v3385_v34  ;;  %v504_v2 = vmax.f32 %v472_v51, 0.0  ;;  %v2990_v40 = vld [vmem:[%s4364_s5 + $0x120] sm:$0xff]  ;;  %v2972_v46 = vld [vmem:[%s4364_s5 + $0x90] sm:$0xff] }
  0x37   : > { %574 = vst [vmem:[#allocation2 + $0x129] sm:$0xff] %v502_v30  ;;  %v458_v3 = vadd.f32 %v3408_v50, %v423_v53  ;;  %v439_v4 = vmul.f32 %v3081_v54, %v3385_v34  ;;  %v479_v5 = vmax.f32 %v447_v56, 0.0  ;;  %v465_v6 = vadd.f32 %v3408_v50, %v430_v57  ;;  %v2980_v47 = vld [vmem:[%s4364_s5 + $0xd0] sm:$0xff] }
  0x38   : > { %1756 = vmatpush.bf16.msrb.mxu2 %v2974_v38  ;;  %559 = vst [vmem:[#allocation2 + $0x79] sm:$0xff] %v487_v35  ;;  %1667 = vmatpush.bf16.msrb.mxu1 %v2966_v52  ;;  %v414_v7 = vmul.f32 %v3032_v58, %v3385_v34  ;;  %v480_v10 = vmax.f32 %v448_v60, 0.0  ;;  %v466_v11 = vadd.f32 %v3408_v50, %v431_v61  ;;  %v489_v14 = vmax.f32 %v457_v63, 0.0  ;;  %v2989_v52 = vld [vmem:[%s4364_s5 + $0x118] sm:$0xff]  ;;  %v2964_v57 = vld [vmem:[%s4364_s5 + $0x50] sm:$0xff] }
  0x39   : > { %v3469_v42 = vld [vmem:[#allocation2 + $0x60] sm:$0xff]  ;;  %1845 = vmatpush.bf16.msrb.mxu3 %v2982_v39  ;;  %560 = vst [vmem:[#allocation2 + $0x81] sm:$0xff] %v488_v43  ;;  %v415_v12 = vmul.f32 %v3033_v1, %v3385_v34  ;;  %v473_v15 = vadd.f32 %v3408_v50, %v438_v0  ;;  %v490_v18 = vmax.f32 %v458_v3, 0.0  ;;  %v474_v19 = vadd.f32 %v3408_v50, %v439_v4 }
  0x3a   : > { %v3477_v48 = vld [vmem:[#allocation2 + $0x68] sm:$0xff]  ;;  %567 = vst [vmem:[#allocation2 + $0xd9] sm:$0xff] %v495_v49  ;;  %v497_v21 = vmax.f32 %v465_v6, 0.0  ;;  %v449_v22 = vadd.f32 %v3408_v50, %v414_v7  ;;  %v498_v25 = vmax.f32 %v466_v11, 0.0  ;;  %v3052_v27 = vunpack.c.l.bf16 %v3175_v23  ;;  %1934 = vmatpush.bf16.msrb.mxu0 %v2990_v40  ;;  %v3171_v6 = vld [vmem:[%s3354_s30 + $0x10] sm:$0xff]  }
  0x3b   : > { %v3487_v55 = vpack.c.bf16 %v3477_v48, %v3469_v42  ;;  %v3500_v8 = vld [vmem:[#allocation2 + $0xc0] sm:$0xff]  ;;  %568 = vst [vmem:[#allocation2 + $0xe1] sm:$0xff] %v496_v59  ;;  %v450_v26 = vadd.f32 %v3408_v50, %v415_v12  ;;  %v505_v30 = vmax.f32 %v473_v15, 0.0  ;;  %v3053_v31 = vunpack.c.h.bf16 %v3175_v23  ;;  %v3183_v59 = vld [vmem:[%s3354_s30 + $0x70] sm:$0xff]  }
  0x3c   : > { %v3504_v13 = vld [vmem:[#allocation2 + $0xc8] sm:$0xff]  ;;  %575 = vst [vmem:[#allocation2 + $0x139] sm:$0xff] %v503_v62  ;;  %v3068_v32 = vunpack.c.l.bf16 %v3179_v28  ;;  %v506_v35 = vmax.f32 %v474_v19, 0.0  ;;  %v424_v38 = vmul.f32 %v3052_v27, %v3385_v34  ;;  %v481_v39 = vmax.f32 %v449_v22, 0.0  ;;  %1757 = vmatpush.bf16.msrb.mxu2 %v2973_v36  ;;  %1668 = vmatpush.bf16.msrb.mxu1 %v2965_v41 }
  0x3d   : > { %4392 = vst [vmem:[#allocation3_spill] sm:$0xff] %v3487_v55  ;;  %1603 = vmatmul.bf16.vlgmr.msra.gmra.mxu1 %v3487_v55  ;;  %v3509_v16 = vpack.c.bf16 %v3504_v13, %v3500_v8  ;;  %v3511_v17 = vld [vmem:[#allocation2 + $0x120] sm:$0xff]  ;;  %v425_v43 = vmul.f32 %v3053_v31, %v3385_v34  ;;  %v3069_v44 = vunpack.c.h.bf16 %v3179_v28  ;;  %v482_v45 = vmax.f32 %v450_v26, 0.0  ;;  %1846 = vmatpush.bf16.msrb.mxu3 %v2981_v37  ;;  %v2979_v36 = vld [vmem:[%s4364_s5 + $0xc8] sm:$0xff]  ;;  %v2988_v37 = vld [vmem:[%s4364_s5 + $0x110] sm:$0xff] }
  0x3e   : > { %576 = vst [vmem:[#allocation2 + $0x141] sm:$0xff] %v504_v2  ;;  %v3514_v20 = vld [vmem:[#allocation2 + $0x128] sm:$0xff]  ;;  %v459_v49 = vadd.f32 %v3408_v50, %v424_v38  ;;  %v432_v54 = vmul.f32 %v3068_v32, %v3385_v34  ;;  %1935 = vmatpush.bf16.msrb.mxu0 %v2989_v52  ;;  %v3084_v4 = vunpack.c.l.bf16 %v3183_v59  ;;  %v3085_v12 = vunpack.c.h.bf16 %v3183_v59  ;;  %v2986_v59 = vld [vmem:[%s4364_s5 + $0x100] sm:$0xff] }
  0x3f   : > { %4393 = vst [vmem:[#allocation4_spill] sm:$0xff] %v3509_v16  ;;  %1623 = vmatmul.bf16.vlgmr.msra.gmra.mxu2 %v3509_v16  ;;  %v3521_v24 = vpack.c.bf16 %v3514_v20, %v3511_v17  ;;  %v3525_v29 = vld [vmem:[#allocation2 + $0x78] sm:$0xff]  ;;  %v460_v53 = vadd.f32 %v3408_v50, %v425_v43  ;;  %v433_v62 = vmul.f32 %v3069_v44, %v3385_v34  ;;  %v3036_v19 = vunpack.c.l.bf16 %v3171_v6  ;;  %v2971_v32 = vld [vmem:[%s4364_s5 + $0x88] sm:$0xff]  ;;  %v2970_v44 = vld [vmem:[%s4364_s5 + $0x80] sm:$0xff] }
  0x40   : > { %551 = vst [vmem:[#allocation2 + $0x19] sm:$0xff] %v479_v5  ;;  %v3528_v33 = vld [vmem:[#allocation2 + $0x80] sm:$0xff]  ;;  %v491_v58 = vmax.f32 %v459_v49, 0.0  ;;  %1758 = vmatpush.bf16.msrb.mxu2 %v2972_v46  ;;  %v467_v0 = vadd.f32 %v3408_v50, %v432_v54  ;;  %1669 = vmatpush.bf16.msrb.mxu1 %v2964_v57  ;;  %v440_v15 = vmul.f32 %v3084_v4, %v3385_v34  ;;  %v2963_v41 = vld [vmem:[%s4364_s5 + $0x48] sm:$0xff] }
  0x41   : > { %552 = vst [vmem:[#allocation2 + $0x21] sm:$0xff] %v480_v10  ;;  %1643 = vmatmul.bf16.vlgmr.msra.gmra.mxu3 %v3521_v24  ;;  %v3553_v51 = vpack.c.bf16 %v3528_v33, %v3525_v29  ;;  %v492_v61 = vmax.f32 %v460_v53, 0.0  ;;  %v3575_v1 = vld [vmem:[#allocation2 + $0xd8] sm:$0xff]  ;;  %v468_v3 = vadd.f32 %v3408_v50, %v433_v62  ;;  %v416_v31 = vmul.f32 %v3036_v19, %v3385_v34  ;;  %v2987_v49 = vld [vmem:[%s4364_s5 + $0x108] sm:$0xff]  ;;  %v2962_v54 = vld [vmem:[%s4364_s5 + $0x40] sm:$0xff] }
  0x42   : > { %561 = vst [vmem:[#allocation2 + $0x91] sm:$0xff] %v489_v14  ;;  %1847 = vmatpush.bf16.msrb.mxu3 %v2980_v47  ;;  %v3577_v2 = vld [vmem:[#allocation2 + $0xe0] sm:$0xff]  ;;  %v499_v5 = vmax.f32 %v467_v0, 0.0  ;;  %v475_v22 = vadd.f32 %v3408_v50, %v440_v15  ;;  %1936 = vmatpush.bf16.msrb.mxu0 %v2988_v37  ;;  %v3025_v19 = vld [vmem:[%s4364_s5 + $0x238] sm:$0xff] }
  0x43   : > { %562 = vst [vmem:[#allocation2 + $0x99] sm:$0xff] %v490_v18  ;;  %v3582_v7 = vld [vmem:[#allocation2 + $0x138] sm:$0xff]  ;;  %v500_v11 = vmax.f32 %v468_v3, 0.0  ;;  %v3588_v14 = vpack.c.bf16 %v3577_v2, %v3575_v1  ;;  %v441_v18 = vmul.f32 %v3085_v12, %v3385_v34  ;;  %v451_v40 = vadd.f32 %v3408_v50, %v416_v31 }
  0x44   : > { %569 = vst [vmem:[#allocation2 + $0xf1] sm:$0xff] %v497_v21  ;;  %v507_v26 = vmax.f32 %v475_v22, 0.0  ;;  %1759 = vmatpush.bf16.msrb.mxu2 %v2971_v32  ;;  %1670 = vmatpush.bf16.msrb.mxu1 %v2963_v41  ;;  %v3001_v12 = vld [vmem:[%s4364_s5 + $0x178] sm:$0xff]  ;;  %v585_v41 = vld [vmem:[#allocation2 + $0x10] sm:$0x3] }
  0x45   : > { %570 = vst [vmem:[#allocation2 + $0xf9] sm:$0xff] %v498_v25  ;;  %v3584_v10 = vld [vmem:[#allocation2 + $0x140] sm:$0xff]  ;;  %v476_v23 = vadd.f32 %v3408_v50, %v441_v18  ;;  %v3037_v25 = vunpack.c.h.bf16 %v3171_v6  ;;  %v483_v47 = vmax.f32 %v451_v40, 0.0  ;;  %v3009_v6 = vld [vmem:[%s4364_s5 + $0x1b8] sm:$0xff] }
  0x46   : > { %4394 = vst [vmem:[#allocation5_spill] sm:$0xff] %v3553_v51  ;;  %v3594_v21 = vpack.c.bf16 %v3584_v10, %v3582_v7  ;;  %1848 = vmatpush.bf16.msrb.mxu3 %v2979_v36  ;;  %1937 = vmatpush.bf16.msrb.mxu0 %v2987_v49 }
  0x47   : > { %577 = vst [vmem:[#allocation2 + $0x151] sm:$0xff] %v505_v30  ;;  %v3560_v56 = vld [vmem:[#allocation2 + $0x18] sm:$0xff]  ;;  %v508_v30 = vmax.f32 %v476_v23, 0.0 }
  0x48   : > { %578 = vst [vmem:[#allocation2 + $0x159] sm:$0xff] %v506_v35  ;;  %v3566_v60 = vld [vmem:[#allocation2 + $0x20] sm:$0xff]  ;;  %v417_v35 = vmul.f32 %v3037_v25, %v3385_v34  ;;  %1760 = vmatpush.bf16.msrb.mxu2 %v2970_v44  ;;  %1671 = vmatpush.bf16.msrb.mxu1 %v2962_v54  ;;  %v948_v22 = vrot.slane %v3560_v56, 2  ;;  %v835_v54 = vrot.slane %v3560_v56, 1 }
  0x49   : > { %553 = vst [vmem:[#allocation2 + $0x31] sm:$0xff] %v481_v39  ;;  %v3571_v63 = vpack.c.bf16 %v3566_v60, %v3560_v56  ;;  %v3599_v27 = vld [vmem:[#allocation2 + $0x90] sm:$0xff]  ;;  %v949_v23 = vrot.slane %v3566_v60, 2 }
  0x4a   : > { %554 = vst [vmem:[#allocation2 + $0x39] sm:$0xff] %v482_v45  ;;  %v3601_v28 = vld [vmem:[#allocation2 + $0x98] sm:$0xff]  ;;  %v452_v43 = vadd.f32 %v3408_v50, %v417_v35  ;;  %v2978_v45 = vld [vmem:[%s4364_s5 + $0xc0] sm:$0xff]  ;;  %1938 = vmatpush.bf16.msrb.mxu0 %v2986_v59  ;;  %v836_v59 = vrot.slane %v3566_v60, 1  ;;  %v946_v60 = vrot.slane %v585_v41, 2 }
  0x4b   : > { %563 = vst [vmem:[#allocation2 + $0xa9] sm:$0xff] %v491_v58  ;;  %1588 = vmatmul.bf16.gmra.mxu0 %v3571_v63  ;;  %v3632_v46 = vpack.c.bf16 %v3601_v28, %v3599_v27  ;;  %1849 = vmatpush.bf16.msrb.mxu3 %v2978_v45  ;;  %v3645_v57 = vld [vmem:[#allocation2 + $0xf0] sm:$0xff]  ;;  %v950_v35 = vsel %vm942_vm3, %v948_v22, %v949_v23  ;;  %v943_v22 = vrot.slane %v3244_v9, 2 }
  0x4c   : > { %564 = vst [vmem:[#allocation2 + $0xb1] sm:$0xff] %v492_v61  ;;  %v484_v53 = vmax.f32 %v452_v43, 0.0  ;;  %v3647_v58 = vld [vmem:[#allocation2 + $0xf8] sm:$0xff]  ;;  %2109 = vmatpush.bf16.msra.mxu2 %v3009_v6  ;;  %2020 = vmatpush.bf16.msra.mxu1 %v3001_v12  ;;  %v837_v12 = vsel %vm829_vm4, %v835_v54, %v836_v59 }
  0x4d   : > { %1608 = vmatmul.bf16.gmra.mxu1 %v3553_v51  ;;  %571 = vst [vmem:[#allocation2 + $0x109] sm:$0xff] %v499_v5  ;;  %v3659_v0 = vpack.c.bf16 %v3647_v58, %v3645_v57 }
  0x4e   : > { %572 = vst [vmem:[#allocation2 + $0x111] sm:$0xff] %v500_v11  ;;  %v3653_v61 = vld [vmem:[#allocation2 + $0x150] sm:$0xff]  ;;  %v3017_v11 = vld [vmem:[%s4364_s5 + $0x1f8] sm:$0xff]  ;;  %2287 = vmatpush.bf16.msra.mxu0 %v3025_v19 }
  0x4f   : > { %1628 = vmatmul.bf16.gmra.mxu2 %v3588_v14  ;;  %579 = vst [vmem:[#allocation2 + $0x169] sm:$0xff] %v507_v26  ;;  %v3655_v62 = vld [vmem:[#allocation2 + $0x158] sm:$0xff]  ;;  %2198 = vmatpush.bf16.msra.mxu3 %v3017_v11 }
  0x50   : > { %v3615_v38 = vld [vmem:[#allocation2 + $0x30] sm:$0xff]  ;;  %580 = vst [vmem:[#allocation2 + $0x171] sm:$0xff] %v508_v30  ;;  %v3663_v3 = vpack.c.bf16 %v3655_v62, %v3653_v61  ;;  %v588_v30 = vld [vmem:[#allocation2 + $0x28] sm:$0x3] }
  0x51   : > { %1648 = vmatmul.bf16.gmra.mxu3 %v3594_v21  ;;  %v3617_v39 = vld [vmem:[#allocation2 + $0x38] sm:$0xff]  ;;  %4395 = vst [vmem:[#allocation6_spill] sm:$0xff] %v3632_v46  ;;  %v951_v36 = vrot.slane %v588_v30, 2  ;;  %v838_v6 = vrot.slane %v588_v30, 1  ;;  %v591_v30 = vld [vmem:[#allocation2 + $0x40] sm:$0x3] }
  0x52   : > { %v3639_v52 = vpack.c.bf16 %v3617_v39, %v3615_v38  ;;  %555 = vst [vmem:[#allocation2 + $0x49] sm:$0xff] %v483_v47  ;;  %v3666_v4 = vld [vmem:[#allocation2 + $0xa8] sm:$0xff]  ;;  %v830_v47 = vrot.slane %v3244_v9, 1  ;;  %v954_v56 = vrot.slane %v3617_v39, 2  ;;  %v840_v9 = vrot.slane %v3615_v38, 1 }
  0x53   : > { %556 = vst [vmem:[#allocation2 + $0x51] sm:$0xff] %v484_v53  ;;  %v3668_v5 = vld [vmem:[#allocation2 + $0xb0] sm:$0xff]  ;;  %v952_v43 = vsel %vm942_vm3, %v949_v23, %v951_v36  ;;  %v833_v53 = vrot.slane %v585_v41, 1  ;;  %v839_v19 = vsel %vm829_vm4, %v836_v59, %v838_v6  ;;  %v953_v23 = vrot.slane %v3615_v38, 2 }
  0x54   : > { %4396 = vst [vmem:[#allocation7_spill] sm:$0xff] %v3663_v3  ;;  %v3691_v25 = vpack.c.bf16 %v3668_v5, %v3666_v4  ;;  %v3698_v31 = vld [vmem:[#allocation2 + $0x108] sm:$0xff]  ;;  %v3713_v45 = vpack.c.bf16 %v952_v43, %v950_v35  ;;  %v1093_v36 = vpack.c.bf16 %v839_v19, %v837_v12  ;;  %v947_v43 = vsel %vm942_vm3, %v943_v22, %v946_v60  ;;  %v3008_v41 = vld [vmem:[%s4364_s5 + $0x1b0] sm:$0xff] }
  0x55   : > { %v3700_v32 = vld [vmem:[#allocation2 + $0x110] sm:$0xff]  ;;  %v834_v11 = vsel %vm829_vm4, %v830_v47, %v833_v53  ;;  %v956_v53 = vrot.slane %v591_v30, 2  ;;  %v1091_v59 = vpack.c.bf16 %v947_v43, %v943_v22  ;;  %2110 = vmatpush.bf16.msra.mxu2 %v3008_v41  ;;  %v851_v43 = vrot.slane %v3477_v48, 1 }
  0x56   : > { %4397 = vst [vmem:[#allocation8_spill] sm:$0xff] %v3691_v25  ;;  %v3704_v37 = vld [vmem:[#allocation2 + $0x168] sm:$0xff]  ;;  %v3711_v44 = vpack.c.bf16 %v3700_v32, %v3698_v31  ;;  %v1090_v35 = vpack.c.bf16 %v834_v11, %v830_v47  ;;  %v843_v47 = vrot.slane %v591_v30, 1  ;;  %v3016_v11 = vld [vmem:[%s4364_s5 + $0x1f0] sm:$0xff]  ;;  %v850_v30 = vrot.slane %v3469_v42, 1 }
  0x57   : > { %v3706_v40 = vld [vmem:[#allocation2 + $0x170] sm:$0xff]  ;;  %v957_v54 = vsel %vm942_vm3, %v954_v56, %v956_v53  ;;  %2199 = vmatpush.bf16.msra.mxu3 %v3016_v11 }
  0x58   : > { %v3718_v49 = vpack.c.bf16 %v3706_v40, %v3704_v37  ;;  %v597_v53 = vld [vmem:[#allocation2 + $0x70] sm:$0x3] }
  0x59   : > { %v3680_v15 = vld [vmem:[#allocation2 + $0x48] sm:$0xff] }
  0x5a   : > { %v3682_v18 = vld [vmem:[#allocation2 + $0x50] sm:$0xff]  ;;  %4398 = vst [vmem:[#allocation9_spill] sm:$0xff] %v3718_v49  ;;  %v958_v12 = vrot.slane %v3680_v15, 2 }
  0x5b   : > { %1593 = vmatmul.bf16.gmra.mxu0 %v3639_v52  ;;  %v3695_v26 = vpack.c.bf16 %v3682_v18, %v3680_v15  ;;  %v959_v19 = vrot.slane %v3682_v18, 2 }
  0x5d   : > { %1613 = vmatmul.bf16.gmra.mxu1 %v3632_v46 }
  0x5f   : > { %1633 = vmatmul.bf16.gmra.mxu2 %v3659_v0 }
  0x61   : > { %1653 = vmatmul.bf16.gmra.mxu3 %v3663_v3  ;;  %v841_v3 = vrot.slane %v3617_v39, 1 }
  0x63   : > { %v842_v38 = vsel %vm829_vm4, %v840_v9, %v841_v3  ;;  %v844_v39 = vsel %vm829_vm4, %v841_v3, %v843_v47  ;;  %v852_v47 = vsel %vm829_vm4, %v850_v30, %v851_v43 }
  0x64   : > { %v3754_v22 = vpack.c.bf16 %v844_v39, %v842_v38 }
  0x6b   : > { %1598 = vmatmul.bf16.gmra.mxu0 %v3695_v26 }
  0x6d   : > { %1618 = vmatmul.bf16.gmra.mxu1 %v3691_v25 }
  0x6f   : > { %1638 = vmatmul.bf16.gmra.mxu2 %v3711_v44 }
  0x71   : > { %1658 = vmatmul.bf16.gmra.mxu3 %v3718_v49  ;;  %v955_v49 = vsel %vm942_vm3, %v953_v23, %v954_v56  ;;  %v594_v23 = vld [vmem:[#allocation2 + $0x58] sm:$0x3]  ;;  %v960_v56 = vsel %vm942_vm3, %v958_v12, %v959_v19  ;;  %v966_v12 = vrot.slane %v597_v53, 2 }
  0x72   : > { %v3733_v6 = vpack.c.bf16 %v957_v54, %v955_v49  ;;  %v3000_v49 = vld [vmem:[%s4364_s5 + $0x170] sm:$0xff]  ;;  %v845_v54 = vrot.slane %v3680_v15, 1  ;;  %v848_v9 = vrot.slane %v594_v23, 1  ;;  %v963_v15 = vrot.slane %v3469_v42, 2  ;;  %v600_v42 = vld [vmem:[#allocation2 + $0x88] sm:$0x3] }
  0x73   : > { %2021 = vmatpush.bf16.msra.mxu1 %v3000_v49 }
  0x7b   : > { %1939 = vmatmul.bf16.vlgmr.msrb.gmra.mxu0 %v1093_v36 }
  0x7d   : > { %1672 = vmatmul.bf16.vlgmr.msrb.gmra.mxu1 %v1090_v35  ;;  %v961_v35 = vrot.slane %v594_v23, 2 }
  0x7f   : > { %1761 = vmatmul.bf16.vlgmr.msrb.gmra.mxu2 %v1091_v59  ;;  %v962_v3 = vsel %vm942_vm3, %v959_v19, %v961_v35  ;;  %v846_v59 = vrot.slane %v3682_v18, 1  ;;  %v964_v18 = vrot.slane %v3477_v48, 2  ;;  %v856_v35 = vrot.slane %v3528_v33, 1 }
  0x80   : > { %v3759_v60 = vpack.c.bf16 %v962_v3, %v960_v56  ;;  %v855_v56 = vrot.slane %v3525_v29, 1  ;;  %v858_v3 = vrot.slane %v600_v42, 1 }
  0x81   : > { %1850 = vmatmul.bf16.vlgmr.msrb.gmra.mxu3 %v3571_v63  ;;  %v3024_v63 = vld [vmem:[%s4364_s5 + $0x230] sm:$0xff]  ;;  %v847_v49 = vsel %vm829_vm4, %v845_v54, %v846_v59  ;;  %v849_v38 = vsel %vm829_vm4, %v846_v59, %v848_v9  ;;  %v967_v19 = vsel %vm942_vm3, %v964_v18, %v966_v12  ;;  %v3015_v54 = vld [vmem:[%s4364_s5 + $0x1e8] sm:$0xff] }
  0x82   : > { %2288 = vmatpush.bf16.msra.mxu0 %v3024_v63  ;;  %v3775_v39 = vpack.c.bf16 %v849_v38, %v847_v49  ;;  %v965_v63 = vsel %vm942_vm3, %v963_v15, %v964_v18  ;;  %v857_v48 = vsel %vm829_vm4, %v855_v56, %v856_v35  ;;  %v859_v30 = vsel %vm829_vm4, %v856_v35, %v858_v3  ;;  %v2999_v59 = vld [vmem:[%s4364_s5 + $0x168] sm:$0xff]  ;;  %v603_v18 = vld [vmem:[#allocation2 + $0xa0] sm:$0x3] }
  0x83   : > { %v3781_v23 = vpack.c.bf16 %v967_v19, %v965_v63  ;;  %2200 = vmatpush.bf16.msra.mxu3 %v3015_v54  ;;  %v3023_v9 = vld [vmem:[%s4364_s5 + $0x228] sm:$0xff]  ;;  %2022 = vmatpush.bf16.msra.mxu1 %v2999_v59  ;;  %v861_v49 = vrot.slane %v3601_v28, 1  ;;  %v971_v15 = vrot.slane %v600_v42, 2  ;;  %v863_v12 = vrot.slane %v603_v18, 1 }
  0x84   : > { %4400 = vst [vmem:[#allocation11_spill] sm:$0xff] %v3775_v39  ;;  %v973_v42 = vrot.slane %v3599_v27, 2 }
  0x85   : > { %4401 = vst [vmem:[#allocation12_spill] sm:$0xff] %v3781_v23  ;;  %v864_v19 = vsel %vm829_vm4, %v861_v49, %v863_v12 }
  0x86   : > { %2289 = vmatpush.bf16.msra.mxu0 %v3023_v9  ;;  %v976_v9 = vrot.slane %v603_v18, 2 }
  0x8b   : > { %1944 = vmatmul.bf16.gmra.mxu0 %v3754_v22 }
  0x8d   : > { %1677 = vmatmul.bf16.gmra.mxu1 %v1093_v36  ;;  %v853_v36 = vrot.slane %v597_v53, 1  ;;  %v3792_v53 = vpack.c.bf16 %v859_v30, %v857_v48  ;;  %v974_v48 = vrot.slane %v3601_v28, 2  ;;  %v865_v30 = vrot.slane %v3666_v4, 1 }
  0x8f   : > { %1766 = vmatmul.bf16.gmra.mxu2 %v3713_v45  ;;  %v854_v41 = vsel %vm829_vm4, %v851_v43, %v853_v36  ;;  %v3007_v43 = vld [vmem:[%s4364_s5 + $0x1a8] sm:$0xff]  ;;  %4402 = vst [vmem:[#allocation13_spill] sm:$0xff] %v3792_v53  ;;  %v968_v36 = vrot.slane %v3525_v29, 2  ;;  %v975_v59 = vsel %vm942_vm3, %v973_v42, %v974_v48  ;;  %v3022_v42 = vld [vmem:[%s4364_s5 + $0x220] sm:$0xff] }
  0x90   : > { %v3769_v11 = vpack.c.bf16 %v854_v41, %v852_v47  ;;  %2111 = vmatpush.bf16.msra.mxu2 %v3007_v43  ;;  %v969_v47 = vrot.slane %v3528_v33, 2  ;;  %v860_v41 = vrot.slane %v3599_v27, 1  ;;  %v866_v43 = vrot.slane %v3668_v5, 1  ;;  %2290 = vmatpush.bf16.msra.mxu0 %v3022_v42 }
  0x91   : > { %1855 = vmatmul.bf16.gmra.mxu3 %v3639_v52  ;;  %v977_v27 = vsel %vm942_vm3, %v974_v48, %v976_v9 }
  0x92   : > { %4399 = vst [vmem:[#allocation10_spill] sm:$0xff] %v3769_v11  ;;  %v970_v38 = vsel %vm942_vm3, %v968_v36, %v969_v47  ;;  %v972_v63 = vsel %vm942_vm3, %v969_v47, %v971_v15  ;;  %v862_v33 = vsel %vm829_vm4, %v860_v41, %v861_v49  ;;  %v606_v47 = vld [vmem:[#allocation2 + $0xb8] sm:$0x3]  ;;  %v3836_v28 = vpack.c.bf16 %v977_v27, %v975_v59  ;;  %v3006_v15 = vld [vmem:[%s4364_s5 + $0x1a0] sm:$0xff] }
  0x93   : > { %v3812_v29 = vpack.c.bf16 %v972_v63, %v970_v38  ;;  %v3817_v56 = vpack.c.bf16 %v864_v19, %v862_v33  ;;  %v868_v41 = vrot.slane %v606_v47, 1  ;;  %v867_v49 = vsel %vm829_vm4, %v865_v30, %v866_v43  ;;  %v3014_v63 = vld [vmem:[%s4364_s5 + $0x1e0] sm:$0xff] }
  0x94   : > { %4405 = vst [vmem:[#allocation16_spill] sm:$0xff] %v3836_v28  ;;  %2112 = vmatpush.bf16.msra.mxu2 %v3006_v15  ;;  %2201 = vmatpush.bf16.msra.mxu3 %v3014_v63  ;;  %v2998_v19 = vld [vmem:[%s4364_s5 + $0x160] sm:$0xff]  ;;  %v979_v59 = vrot.slane %v3668_v5, 2  ;;  %v870_v27 = vrot.slane %v3500_v8, 1  ;;  %v981_v15 = vrot.slane %v606_v47, 2 }
  0x95   : > { %4403 = vst [vmem:[#allocation14_spill] sm:$0xff] %v3812_v29  ;;  %v869_v38 = vsel %vm829_vm4, %v866_v43, %v868_v41  ;;  %2023 = vmatpush.bf16.msra.mxu1 %v2998_v19  ;;  %v978_v43 = vrot.slane %v3666_v4, 2  ;;  %v871_v41 = vrot.slane %v3504_v13, 1  ;;  %v609_v4 = vld [vmem:[#allocation2 + $0xd0] sm:$0x3] }
  0x96   : > { %4404 = vst [vmem:[#allocation15_spill] sm:$0xff] %v3817_v56  ;;  %v3844_v18 = vpack.c.bf16 %v869_v38, %v867_v49  ;;  %v982_v5 = vsel %vm942_vm3, %v979_v59, %v981_v15  ;;  %v873_v42 = vrot.slane %v609_v4, 1  ;;  %v983_v15 = vrot.slane %v3500_v8, 2  ;;  %v612_v8 = vld [vmem:[#allocation2 + $0xe8] sm:$0x3] }
  0x97   : > { %v980_v38 = vsel %vm942_vm3, %v978_v43, %v979_v59 }
  0x98   : > { %4406 = vst [vmem:[#allocation17_spill] sm:$0xff] %v3844_v18 }
  0x9b   : > { %1949 = vmatmul.bf16.gmra.mxu0 %v3775_v39 }
  0x9d   : > { %1682 = vmatmul.bf16.gmra.mxu1 %v3754_v22 }
  0x9f   : > { %1771 = vmatmul.bf16.gmra.mxu2 %v3733_v6 }
  0xa1   : > { %1860 = vmatmul.bf16.gmra.mxu3 %v3695_v26 }
  0xaa   : > { %v3819_v35 = vpop.f32.mrf.mxu0 }
  0xab   : > { %1954 = vmatmul.bf16.gmra.mxu0 %v3769_v11 }
  0xad   : > { %1687 = vmatmul.bf16.gmra.mxu1 %v3775_v39 }
  0xaf   : > { %1776 = vmatmul.bf16.gmra.mxu2 %v3759_v60 }
  0xb1   : > { %1865 = vmatmul.bf16.gmra.mxu3 %v3487_v55 }
  0xb2   : > { %v3829_v54 = vpop.f32.mrf.mxu0 }
  0xba   : > { %v3821_v3 = vpop.f32.mrf.mxu1 }
  0xbb   : > { %1959 = vmatmul.bf16.gmra.mxu0 %v3792_v53 }
  0xbd   : > { %1692 = vmatmul.bf16.gmra.mxu1 %v3769_v11 }
  0xbf   : > { %1781 = vmatmul.bf16.gmra.mxu2 %v3781_v23 }
  0xc1   : > { %1870 = vmatmul.bf16.gmra.mxu3 %v3553_v51  ;;  %v874_v51 = vsel %vm829_vm4, %v871_v41, %v873_v42  ;;  %v986_v42 = vrot.slane %v609_v4, 2  ;;  %v3005_v4 = vld [vmem:[%s4364_s5 + $0x198] sm:$0xff] }
  0xc2   : > { %v3832_v36 = vpop.f32.mrf.mxu1  ;;  %v3849_v12 = vpop.f32.mrf.mxu2  ;;  %2113 = vmatpush.bf16.msra.mxu2 %v3005_v4 }
  0xc4   : > { %v3851_v33 = vpop.f32.mrf.mxu3 }
  0xc5   : > { %4407 = vst [vmem:[#allocation18_spill] sm:$0xff] %v3851_v33  ;;  %v3880_v33 = vpack.c.bf16 %v982_v5, %v980_v38  ;;  %v984_v38 = vrot.slane %v3504_v13, 2 }
  0xc7   : > { %4409 = vst [vmem:[#allocation20_spill] sm:$0xff] %v3880_v33  ;;  %v985_v5 = vsel %vm942_vm3, %v983_v15, %v984_v38  ;;  %v987_v13 = vsel %vm942_vm3, %v984_v38, %v986_v42  ;;  %v3013_v38 = vld [vmem:[%s4364_s5 + $0x1d8] sm:$0xff] }
  0xc8   : > { %v3861_v30 = vpop.f32.mrf.mxu0  ;;  %2202 = vmatpush.bf16.msra.mxu3 %v3013_v38  ;;  %v880_v38 = vrot.slane %v3645_v57, 1 }
  0xca   : > { %v3859_v48 = vpop.f32.mrf.mxu1  ;;  %v3867_v9 = vpop.f32.mrf.mxu2 }
  0xcb   : > { %1964 = vmatmul.bf16.gmra.mxu0 %v3817_v56 }
  0xcc   : > { %v3871_v49 = vpop.f32.mrf.mxu3 }
  0xcd   : > { %1697 = vmatmul.bf16.gmra.mxu1 %v3792_v53  ;;  %4408 = vst [vmem:[#allocation19_spill] sm:$0xff] %v3871_v49  ;;  %v872_v53 = vsel %vm829_vm4, %v870_v27, %v871_v41 }
  0xce   : > { %v3885_v43 = vpack.c.bf16 %v874_v51, %v872_v53  ;;  %v875_v51 = vrot.slane %v3575_v1, 1  ;;  %v876_v53 = vrot.slane %v3577_v2, 1 }
  0xcf   : > { %1786 = vmatmul.bf16.gmra.mxu2 %v3812_v29  ;;  %v3912_v29 = vpack.c.bf16 %v987_v13, %v985_v5  ;;  %v989_v13 = vrot.slane %v3577_v2, 2 }
  0xd0   : > { %v3876_v19 = vpop.f32.mrf.mxu0  ;;  %4410 = vst [vmem:[#allocation21_spill] sm:$0xff] %v3885_v43  ;;  %v877_v55 = vsel %vm829_vm4, %v875_v51, %v876_v53 }
  0xd1   : > { %1875 = vmatmul.bf16.gmra.mxu3 %v3632_v46 }
  0xd2   : > { %v3874_v63 = vpop.f32.mrf.mxu1  ;;  %v3887_v47 = vpop.f32.mrf.mxu2 }
  0xd3   : > { %4411 = vst [vmem:[#allocation22_spill] sm:$0xff] %v3887_v47 }
  0xd4   : > { %v3889_v49 = vpop.f32.mrf.mxu3 }
  0xd5   : > { %4412 = vst [vmem:[#allocation23_spill] sm:$0xff] %v3889_v49 }
  0xd8   : > { %v3893_v59 = vpop.f32.mrf.mxu0 }
  0xda   : > { %v3891_v11 = vpop.f32.mrf.mxu1  ;;  %v3899_v27 = vpop.f32.mrf.mxu2 }
  0xdb   : > { %1969 = vmatmul.bf16.gmra.mxu0 %v3844_v18  ;;  %4413 = vst [vmem:[#allocation24_spill] sm:$0xff] %v3899_v27 }
  0xdc   : > { %v3903_v41 = vpop.f32.mrf.mxu3 }
  0xdd   : > { %1702 = vmatmul.bf16.gmra.mxu1 %v3817_v56  ;;  %4414 = vst [vmem:[#allocation25_spill] sm:$0xff] %v3903_v41  ;;  %v878_v56 = vrot.slane %v612_v8, 1 }
  0xdf   : > { %1791 = vmatmul.bf16.gmra.mxu2 %v3836_v28  ;;  %v879_v23 = vsel %vm829_vm4, %v876_v53, %v878_v56  ;;  %v2997_v56 = vld [vmem:[%s4364_s5 + $0x158] sm:$0xff]  ;;  %v988_v53 = vrot.slane %v3575_v1, 2 }
  0xe0   : > { %v3908_v46 = vpop.f32.mrf.mxu0  ;;  %v3920_v15 = vpack.c.bf16 %v879_v23, %v877_v55  ;;  %v3021_v55 = vld [vmem:[%s4364_s5 + $0x218] sm:$0xff]  ;;  %2024 = vmatpush.bf16.msra.mxu1 %v2997_v56 }
  0xe1   : > { %1880 = vmatmul.bf16.gmra.mxu3 %v3691_v25  ;;  %2291 = vmatpush.bf16.msra.mxu0 %v3021_v55  ;;  %v991_v25 = vrot.slane %v612_v8, 2  ;;  %v990_v56 = vsel %vm942_vm3, %v988_v53, %v989_v13  ;;  %v615_v55 = vld [vmem:[#allocation2 + $0x100] sm:$0x3] }
  0xe2   : > { %v3906_v49 = vpop.f32.mrf.mxu1  ;;  %4415 = vst [vmem:[#allocation26_spill] sm:$0xff] %v3920_v15  ;;  %v3925_v42 = vpop.f32.mrf.mxu2  ;;  %v883_v2 = vrot.slane %v615_v55, 1 }
  0xe3   : > { %4416 = vst [vmem:[#allocation27_spill] sm:$0xff] %v3925_v42  ;;  %v992_v1 = vsel %vm942_vm3, %v989_v13, %v991_v25  ;;  %v993_v25 = vrot.slane %v3645_v57, 2  ;;  %v994_v13 = vrot.slane %v3647_v58, 2 }
  0xe4   : > { %v3927_v5 = vpop.f32.mrf.mxu3 }
  0xe5   : > { %4417 = vst [vmem:[#allocation28_spill] sm:$0xff] %v3927_v5  ;;  %v881_v5 = vrot.slane %v3647_v58, 1 }
  0xe7   : > { %v882_v42 = vsel %vm829_vm4, %v880_v38, %v881_v5  ;;  %v884_v27 = vsel %vm829_vm4, %v881_v5, %v883_v2  ;;  %v885_v5 = vrot.slane %v3698_v31, 1  ;;  %v995_v2 = vsel %vm942_vm3, %v993_v25, %v994_v13 }
  0xe8   : > { %v3937_v23 = vpop.f32.mrf.mxu0  ;;  %v3961_v8 = vpack.c.bf16 %v884_v27, %v882_v42  ;;  %v886_v27 = vrot.slane %v3700_v32, 1 }
  0xea   : > { %v3929_v51 = vpop.f32.mrf.mxu1  ;;  %v3943_v4 = vpop.f32.mrf.mxu2 }
  0xeb   : > { %1974 = vmatmul.bf16.gmra.mxu0 %v3885_v43  ;;  %4418 = vst [vmem:[#allocation29_spill] sm:$0xff] %v3943_v4  ;;  %v3956_v4 = vpack.c.bf16 %v992_v1, %v990_v56  ;;  %v996_v56 = vrot.slane %v615_v55, 2 }
  0xec   : > { %v3947_v41 = vpop.f32.mrf.mxu3 }
  0xed   : > { %1707 = vmatmul.bf16.gmra.mxu1 %v3844_v18  ;;  %4419 = vst [vmem:[#allocation30_spill] sm:$0xff] %v3947_v41  ;;  %v997_v58 = vsel %vm942_vm3, %v994_v13, %v996_v56  ;;  %v3012_v13 = vld [vmem:[%s4364_s5 + $0x1d0] sm:$0xff] }
  0xee   : > { %2203 = vmatpush.bf16.msra.mxu3 %v3012_v13 }
  0xef   : > { %1796 = vmatmul.bf16.gmra.mxu2 %v3880_v33  ;;  %v3981_v33 = vpack.c.bf16 %v997_v58, %v995_v2  ;;  %v998_v58 = vrot.slane %v3698_v31, 2 }
  0xf0   : > { %v3952_v18 = vpop.f32.mrf.mxu0 }
  0xf1   : > { %1885 = vmatmul.bf16.gmra.mxu3 %v3509_v16 }
  0xf2   : > { %v3949_v28 = vpop.f32.mrf.mxu1  ;;  %v3963_v41 = vpop.f32.mrf.mxu2 }
  0xf3   : > { %4420 = vst [vmem:[#allocation31_spill] sm:$0xff] %v3963_v41 }
  0xf4   : > { %v3965_v53 = vpop.f32.mrf.mxu3 }
  0xf5   : > { %4421 = vst [vmem:[#allocation32_spill] sm:$0xff] %v3965_v53  ;;  %v618_v53 = vld [vmem:[#allocation2 + $0x118] sm:$0x3] }
  0xf6   : > { %v888_v16 = vrot.slane %v618_v53, 1 }
  0xf8   : > { %v1940_v47 = vpop.f32.mrf.mxu0  ;;  %v889_v41 = vsel %vm829_vm4, %v886_v27, %v888_v16 }
  0xfa   : > { %v1673_v39 = vpop.f32.mrf.mxu1  ;;  %v3971_v38 = vpop.f32.mrf.mxu2 }
  0xfb   : > { %1979 = vmatmul.bf16.gmra.mxu0 %v3920_v15  ;;  %4422 = vst [vmem:[#allocation33_spill] sm:$0xff] %v3971_v38  ;;  %v887_v38 = vsel %vm829_vm4, %v885_v5, %v886_v27  ;;  %v1674_v55 = vadd.f32 %v1673_v39, %v3819_v35  ;;  %v2996_v39 = vld [vmem:[%s4364_s5 + $0x150] sm:$0xff] }
  0xfc   : > { %v3975_v42 = vpop.f32.mrf.mxu3  ;;  %v3990_v25 = vpack.c.bf16 %v889_v41, %v887_v38  ;;  %v3020_v35 = vld [vmem:[%s4364_s5 + $0x210] sm:$0xff]  ;;  %2025 = vmatpush.bf16.msra.mxu1 %v2996_v39 }
  0xfd   : > { %1712 = vmatmul.bf16.gmra.mxu1 %v3885_v43  ;;  %4423 = vst [vmem:[#allocation34_spill] sm:$0xff] %v3975_v42  ;;  %2292 = vmatpush.bf16.msra.mxu0 %v3020_v35 }
  0xff   : > { %1801 = vmatmul.bf16.gmra.mxu2 %v3912_v29 }
 0x100   : > { %v1942_v57 = vpop.f32.mrf.mxu0 }
 0x101   : > { %1890 = vmatmul.bf16.gmra.mxu3 %v3588_v14 }
 0x102   : > { %v1675_v1 = vpop.f32.mrf.mxu1  ;;  %v1762_v56 = vpop.f32.mrf.mxu2 }
 0x103   : > { %v1676_v43 = vadd.f32 %v1675_v1, %v3829_v54  ;;  %v3004_v54 = vld [vmem:[%s4364_s5 + $0x190] sm:$0xff]  ;;  %v1763_v1 = vadd.f32 %v1762_v56, %v1674_v55  ;;  %v999_v55 = vrot.slane %v3700_v32, 2  ;;  %v890_v56 = vrot.slane %v3511_v17, 1 }
 0x104   : > { %2114 = vmatpush.bf16.msra.mxu2 %v3004_v54  ;;  %v1851_v5 = vpop.f32.mrf.mxu3 }
 0x105   : > { %v1852_v16 = vadd.f32 %v1851_v5, %v1763_v1  ;;  %v891_v1 = vrot.slane %v3514_v20, 1  ;;  %v1001_v5 = vrot.slane %v618_v53, 2 }
 0x107   : > { %v4002_v2 = vadd.f32 %v1940_v47, %v1852_v16  ;;  %v1000_v47 = vsel %vm942_vm3, %v998_v58, %v999_v55  ;;  %v621_v16 = vld [vmem:[#allocation2 + $0x130] sm:$0x3]  ;;  %v1002_v32 = vsel %vm942_vm3, %v999_v55, %v1001_v5  ;;  %v892_v42 = vsel %vm829_vm4, %v890_v56, %v891_v1 }
 0x108   : > { %v1945_v38 = vpop.f32.mrf.mxu0 }
 0x109   : > { %4424 = vst [vmem:[#allocation35_spill] sm:$0xff] %v4002_v2  ;;  %v893_v2 = vrot.slane %v621_v16, 1 }
 0x10a   : > { %v1678_v27 = vpop.f32.mrf.mxu1  ;;  %v1764_v54 = vpop.f32.mrf.mxu2 }
 0x10b   : > { %v1679_v41 = vadd.f32 %v1678_v27, %v3861_v30  ;;  %1984 = vmatmul.bf16.gmra.mxu0 %v3961_v8  ;;  %v1765_v13 = vadd.f32 %v1764_v54, %v1676_v43  ;;  %v4014_v43 = vpack.c.bf16 %v1002_v32, %v1000_v47  ;;  %v894_v53 = vsel %vm829_vm4, %v891_v1, %v893_v2 }
 0x10c   : > { %v1853_v30 = vpop.f32.mrf.mxu3  ;;  %v4021_v58 = vpack.c.bf16 %v894_v53, %v892_v42  ;;  %v1004_v2 = vrot.slane %v3514_v20, 2  ;;  %v896_v1 = vrot.slane %v3584_v10, 1  ;;  %v1006_v32 = vrot.slane %v621_v16, 2 }
 0x10d   : > { %1717 = vmatmul.bf16.gmra.mxu1 %v3920_v15  ;;  %v1854_v27 = vadd.f32 %v1853_v30, %v1765_v13 }
 0x10e   : > { %v1007_v20 = vsel %vm942_vm3, %v1004_v2, %v1006_v32  ;;  %v3019_v32 = vld [vmem:[%s4364_s5 + $0x208] sm:$0xff] }
 0x10f   : > { %1806 = vmatmul.bf16.gmra.mxu2 %v3956_v4  ;;  %v4016_v54 = vadd.f32 %v1942_v57, %v1854_v27  ;;  %v1003_v57 = vrot.slane %v3511_v17, 2  ;;  %2293 = vmatpush.bf16.msra.mxu0 %v3019_v32 }
 0x110   : > { %v1947_v31 = vpop.f32.mrf.mxu0 }
 0x111   : > { %1895 = vmatmul.bf16.gmra.mxu3 %v3659_v0 }
 0x112   : > { %v1680_v39 = vpop.f32.mrf.mxu1  ;;  %v1767_v13 = vpop.f32.mrf.mxu2 }
 0x113   : > { %v1681_v35 = vadd.f32 %v1680_v39, %v3876_v19  ;;  %v1768_v19 = vadd.f32 %v1767_v13, %v1679_v41  ;;  %v895_v41 = vrot.slane %v3582_v7, 1  ;;  %v624_v13 = vld [vmem:[#allocation2 + $0x148] sm:$0x3] }
 0x114   : > { %v1856_v30 = vpop.f32.mrf.mxu3 }
 0x115   : > { %v1857_v39 = vadd.f32 %v1856_v30, %v1768_v19  ;;  %v898_v30 = vrot.slane %v624_v13, 1 }
 0x117   : > { %v4024_v47 = vadd.f32 %v1945_v38, %v1857_v39  ;;  %v1005_v38 = vsel %vm942_vm3, %v1003_v57, %v1004_v2  ;;  %v899_v16 = vsel %vm829_vm4, %v896_v1, %v898_v30  ;;  %v3011_v2 = vld [vmem:[%s4364_s5 + $0x1c8] sm:$0xff] }
 0x118   : > { %v1950_v15 = vpop.f32.mrf.mxu0  ;;  %2204 = vmatpush.bf16.msra.mxu3 %v3011_v2  ;;  %v1011_v2 = vrot.slane %v624_v13, 2 }
 0x11a   : > { %v1683_v55 = vpop.f32.mrf.mxu1  ;;  %v1769_v42 = vpop.f32.mrf.mxu2 }
 0x11b   : > { %v1684_v5 = vadd.f32 %v1683_v55, %v3893_v59  ;;  %1989 = vmatmul.bf16.gmra.mxu0 %v3990_v25  ;;  %v1770_v56 = vadd.f32 %v1769_v42, %v1681_v35  ;;  %v4036_v35 = vpack.c.bf16 %v1007_v20, %v1005_v38  ;;  %v897_v55 = vsel %vm829_vm4, %v895_v41, %v896_v1  ;;  %v2995_v1 = vld [vmem:[%s4364_s5 + $0x148] sm:$0xff] }
 0x11c   : > { %v1858_v27 = vpop.f32.mrf.mxu3  ;;  %v4046_v57 = vpack.c.bf16 %v899_v16, %v897_v55  ;;  %2026 = vmatpush.bf16.msra.mxu1 %v2995_v1  ;;  %v1009_v20 = vrot.slane %v3584_v10, 2  ;;  %v900_v16 = vrot.slane %v3653_v61, 1 }
 0x11d   : > { %1722 = vmatmul.bf16.gmra.mxu1 %v3961_v8  ;;  %v1859_v59 = vadd.f32 %v1858_v27, %v1770_v56 }
 0x11e   : > { %v1012_v10 = vsel %vm942_vm3, %v1009_v20, %v1011_v2 }
 0x11f   : > { %1811 = vmatmul.bf16.gmra.mxu2 %v3981_v33  ;;  %v4038_v39 = vadd.f32 %v1947_v31, %v1859_v59 }
 0x120   : > { %v1952_v17 = vpop.f32.mrf.mxu0 }
 0x121   : > { %1900 = vmatmul.bf16.gmra.mxu3 %v3711_v44 }
 0x122   : > { %v1685_v53 = vpop.f32.mrf.mxu1  ;;  %v1772_v42 = vpop.f32.mrf.mxu2 }
 0x123   : > { %v1686_v19 = vadd.f32 %v1685_v53, %v3908_v46  ;;  %v3003_v46 = vld [vmem:[%s4364_s5 + $0x188] sm:$0xff]  ;;  %v1773_v56 = vadd.f32 %v1772_v42, %v1684_v5  ;;  %v1008_v5 = vrot.slane %v3582_v7, 2 }
 0x124   : > { %2115 = vmatpush.bf16.msra.mxu2 %v3003_v46  ;;  %v1861_v31 = vpop.f32.mrf.mxu3  ;;  %v901_v46 = vrot.slane %v3655_v62, 1 }
 0x125   : > { %v1862_v41 = vadd.f32 %v1861_v31, %v1773_v56  ;;  %v627_v31 = vld [vmem:[#allocation2 + $0x160] sm:$0x3] }
 0x126   : > { %v902_v32 = vsel %vm829_vm4, %v900_v16, %v901_v46  ;;  %v1014_v16 = vrot.slane %v3655_v62, 2 }
 0x127   : > { %v4058_v38 = vadd.f32 %v1950_v15, %v1862_v41  ;;  %v1010_v15 = vsel %vm942_vm3, %v1008_v5, %v1009_v20 }
 0x128   : > { %v1955_v53 = vpop.f32.mrf.mxu0 }
 0x12a   : > { %v1688_v27 = vpop.f32.mrf.mxu1  ;;  %v1774_v30 = vpop.f32.mrf.mxu2 }
 0x12b   : > { %v1689_v59 = vadd.f32 %v1688_v27, %v3937_v23  ;;  %1994 = vmatmul.bf16.gmra.mxu0 %v4021_v58  ;;  %v1775_v55 = vadd.f32 %v1774_v30, %v1686_v19  ;;  %v903_v27 = vrot.slane %v627_v31, 1  ;;  %v4070_v19 = vpack.c.bf16 %v1012_v10, %v1010_v15 }
 0x12c   : > { %v1863_v23 = vpop.f32.mrf.mxu3  ;;  %v905_v15 = vrot.slane %v3704_v37, 1 }
 0x12d   : > { %1727 = vmatmul.bf16.gmra.mxu1 %v3990_v25  ;;  %v1864_v42 = vadd.f32 %v1863_v23, %v1775_v55  ;;  %v904_v13 = vsel %vm829_vm4, %v901_v46, %v903_v27  ;;  %v1016_v27 = vrot.slane %v627_v31, 2 }
 0x12e   : > { %v4077_v5 = vpack.c.bf16 %v904_v13, %v902_v32 }
 0x12f   : > { %1816 = vmatmul.bf16.gmra.mxu2 %v4014_v43  ;;  %v4072_v1 = vadd.f32 %v1952_v17, %v1864_v42  ;;  %v1013_v17 = vrot.slane %v3653_v61, 2  ;;  %v1017_v61 = vsel %vm942_vm3, %v1014_v16, %v1016_v27 }
 0x130   : > { %v1957_v7 = vpop.f32.mrf.mxu0 }
 0x131   : > { %1905 = vmatmul.bf16.gmra.mxu3 %v3521_v24 }
 0x132   : > { %v1690_v56 = vpop.f32.mrf.mxu1  ;;  %v1777_v30 = vpop.f32.mrf.mxu2 }
 0x133   : > { %v1691_v41 = vadd.f32 %v1690_v56, %v3952_v18  ;;  %v1778_v18 = vadd.f32 %v1777_v30, %v1689_v59  ;;  %v906_v59 = vrot.slane %v3706_v40, 1  ;;  %v630_v30 = vld [vmem:[#allocation2 + $0x178] sm:$0x3] }
 0x134   : > { %v1866_v55 = vpop.f32.mrf.mxu3  ;;  %v908_v62 = vrot.slane %v630_v30, 1 }
 0x135   : > { %v1867_v23 = vadd.f32 %v1866_v55, %v1778_v18  ;;  %v3184_v18 = vld [vmem:[%s3354_s30 + $0x78] sm:$0xff]   ;;  %v907_v31 = vsel %vm829_vm4, %v905_v15, %v906_v59 }
 0x137   : > { %v4079_v56 = vadd.f32 %v1955_v53, %v1867_v23  ;;  %v1015_v53 = vsel %vm942_vm3, %v1013_v17, %v1014_v16  ;;  %v3088_v23 = vunpack.c.l.bf16 %v3184_v18  ;;  %v3002_v16 = vld [vmem:[%s4364_s5 + $0x180] sm:$0xff] }
 0x138   : > { %v1960_v2 = vpop.f32.mrf.mxu0  ;;  %2116 = vmatpush.bf16.msra.mxu2 %v3002_v16 }
 0x139   : > { %4425 = vst [vmem:[#allocation36_spill] sm:$0xff] %v4079_v56  ;;  %v442_v17 = vmul.f32 %v3088_v23, %v3385_v34  ;;  %v2994_v23 = vld [vmem:[%s4364_s5 + $0x140] sm:$0xff] }
 0x13a   : > { %v1693_v20 = vpop.f32.mrf.mxu1  ;;  %v1779_v46 = vpop.f32.mrf.mxu2  ;;  %2027 = vmatpush.bf16.msra.mxu1 %v2994_v23 }
 0x13b   : > { %1999 = vmatmul.bf16.gmra.mxu0 %v4046_v57  ;;  %v1780_v42 = vadd.f32 %v1779_v46, %v1691_v41  ;;  %v4091_v41 = vpack.c.bf16 %v1017_v61, %v1015_v53  ;;  %v3089_v46 = vunpack.c.h.bf16 %v3184_v18 }
 0x13c   : > { %v1868_v10 = vpop.f32.mrf.mxu3 }
 0x13d   : > { %1732 = vmatmul.bf16.gmra.mxu1 %v4021_v58  ;;  %v1869_v32 = vadd.f32 %v1868_v10, %v1780_v42  ;;  %v909_v42 = vsel %vm829_vm4, %v906_v59, %v908_v62  ;;  %v1694_v10 = vadd.f32 %v1693_v20, %v3821_v3  ;;  %v443_v15 = vmul.f32 %v3089_v46, %v3385_v34  ;;  %v3018_v34 = vld [vmem:[%s4364_s5 + $0x200] sm:$0xff] }
 0x13e   : > { %v4103_v27 = vpack.c.bf16 %v909_v42, %v907_v31  ;;  %v477_v59 = vadd.f32 %v3408_v50, %v442_v17  ;;  %2294 = vmatpush.bf16.msra.mxu0 %v3018_v34  ;;  %v1019_v17 = vrot.slane %v3706_v40, 2 }
 0x13f   : > { %1821 = vmatmul.bf16.gmra.mxu2 %v4036_v35  ;;  %v4093_v56 = vadd.f32 %v1957_v7, %v1869_v32  ;;  %v3010_v7 = vld [vmem:[%s4364_s5 + $0x1c0] sm:$0xff]  ;;  %v478_v3 = vadd.f32 %v3408_v50, %v443_v15  ;;  %v1018_v50 = vrot.slane %v3704_v37, 2 }
 0x140   : > { %v1962_v55 = vpop.f32.mrf.mxu0  ;;  %2205 = vmatpush.bf16.msra.mxu3 %v3010_v7  ;;  %v509_v18 = vmax.f32 %v477_v59, 0.0 }
 0x141   : > { %1910 = vmatmul.bf16.gmra.mxu3 %v3594_v21  ;;  %v510_v46 = vmax.f32 %v478_v3, 0.0  ;;  %v1020_v3 = vsel %vm942_vm3, %v1018_v50, %v1019_v17 }
 0x142   : > { %v1695_v13 = vpop.f32.mrf.mxu1  ;;  %v1782_v32 = vpop.f32.mrf.mxu2  ;;  %581 = vst [vmem:[#allocation2 + $0x181] sm:$0xff] %v509_v18 }
 0x143   : > { %v1783_v53 = vadd.f32 %v1782_v32, %v1694_v10  ;;  %582 = vst [vmem:[#allocation2 + $0x189] sm:$0xff] %v510_v46  ;;  %v1696_v10 = vadd.f32 %v1695_v13, %v3832_v36  ;;  %v1021_v32 = vrot.slane %v630_v30, 2  ;;  %v4427_v13 = vld [vmem:[#allocation7_spill] sm:$0xff] }
 0x144   : > { %v1871_v20 = vpop.f32.mrf.mxu3 }
 0x145   : > { %v1872_v61 = vadd.f32 %v1871_v20, %v1783_v53  ;;  %v1022_v20 = vsel %vm942_vm3, %v1019_v17, %v1021_v32 }
 0x146   : > { %v4127_v37 = vpack.c.bf16 %v1022_v20, %v1020_v3 }
 0x147   : > { %v4117_v42 = vadd.f32 %v1960_v2, %v1872_v61 }
 0x148   : > { %v1965_v31 = vpop.f32.mrf.mxu0 }
 0x14a   : > { %v1698_v62 = vpop.f32.mrf.mxu1  ;;  %v1784_v16 = vpop.f32.mrf.mxu2 }
 0x14b   : > { %2004 = vmatmul.bf16.gmra.mxu0 %v4077_v5  ;;  %v1785_v7 = vadd.f32 %v1784_v16, %v1696_v10  ;;  %v1699_v36 = vadd.f32 %v1698_v62, %v3859_v48  ;;  %v4138_v16 = vld [vmem:[#allocation2 + $0x180] sm:$0xff]  ;;  %v4140_v48 = vld [vmem:[#allocation2 + $0x188] sm:$0xff]  ;;  %v4142_v62 = vld [vmem:[#allocation2 + $0x190] sm:$0x3] }
 0x14c   : > { %v1873_v15 = vpop.f32.mrf.mxu3  ;;  %v1059_v3 = vrot.slane %v4140_v48, 1 }
 0x14d   : > { %1737 = vmatmul.bf16.gmra.mxu1 %v4046_v57  ;;  %v1874_v59 = vadd.f32 %v1873_v15, %v1785_v7 }
 0x14f   : > { %1826 = vmatmul.bf16.gmra.mxu2 %v4070_v19  ;;  %v4129_v40 = vadd.f32 %v1962_v55, %v1874_v59 }
 0x150   : > { %v1967_v2 = vpop.f32.mrf.mxu0 }
 0x151   : > { %4426 = vst [vmem:[#allocation37_spill] sm:$0xff] %v4129_v40  ;;  %1915 = vmatmul.bf16.gmra.mxu3 %v4427_v13 }
 0x152   : > { %v1700_v53 = vpop.f32.mrf.mxu1  ;;  %v1787_v18 = vpop.f32.mrf.mxu2 }
 0x153   : > { %v1788_v61 = vadd.f32 %v1787_v18, %v1699_v36  ;;  %v1701_v17 = vadd.f32 %v1700_v53, %v3874_v63  ;;  %v1061_v63 = vrot.slane %v4142_v62, 1  ;;  %v4429_v36 = vld [vmem:[#allocation9_spill] sm:$0xff] }
 0x154   : > { %v1876_v30 = vpop.f32.mrf.mxu3 }
 0x155   : > { %v1877_v23 = vadd.f32 %v1876_v30, %v1788_v61  ;;  %v1062_v30 = vsel %vm829_vm4, %v1059_v3, %v1061_v63 }
 0x157   : > { %v4133_v50 = vadd.f32 %v1965_v31, %v1877_v23  ;;  %v1058_v31 = vrot.slane %v4138_v16, 1 }
 0x158   : > { %v1970_v46 = vpop.f32.mrf.mxu0 }
 0x159   : > { %4428 = vst [vmem:[#allocation7_spill] sm:$0xff] %v4133_v50  ;;  %v1060_v61 = vsel %vm829_vm4, %v1058_v31, %v1059_v3  ;;  %v4163_v3 = vpack.c.bf16 %v4140_v48, %v4138_v16 }
 0x15a   : > { %v1703_v34 = vpop.f32.mrf.mxu1  ;;  %v1789_v55 = vpop.f32.mrf.mxu2 }
 0x15b   : > { %2009 = vmatmul.bf16.gmra.mxu0 %v4103_v27  ;;  %v1790_v10 = vadd.f32 %v1789_v55, %v1701_v17  ;;  %v1704_v20 = vadd.f32 %v1703_v34, %v3891_v11 }
 0x15c   : > { %v1878_v7 = vpop.f32.mrf.mxu3 }
 0x15d   : > { %1742 = vmatmul.bf16.gmra.mxu1 %v4077_v5  ;;  %v1879_v15 = vadd.f32 %v1878_v7, %v1790_v10  ;;  %v4154_v7 = vpack.c.bf16 %v1062_v30, %v1060_v61 }
 0x15f   : > { %1831 = vmatmul.bf16.gmra.mxu2 %v4091_v41  ;;  %v4148_v53 = vadd.f32 %v1967_v2, %v1879_v15 }
 0x160   : > { %v1972_v59 = vpop.f32.mrf.mxu0 }
 0x161   : > { %1920 = vmatmul.bf16.gmra.mxu3 %v4429_v36 }
 0x162   : > { %v1705_v32 = vpop.f32.mrf.mxu1  ;;  %v1792_v18 = vpop.f32.mrf.mxu2 }
 0x163   : > { %v1793_v23 = vadd.f32 %v1792_v18, %v1704_v20  ;;  %v1706_v11 = vadd.f32 %v1705_v32, %v3906_v49 }
 0x164   : > { %v1881_v17 = vpop.f32.mrf.mxu3 }
 0x165   : > { %v1882_v55 = vadd.f32 %v1881_v17, %v1793_v23 }
 0x167   : > { %v4156_v40 = vadd.f32 %v1970_v46, %v1882_v55 }
 0x168   : > { %v1975_v50 = vpop.f32.mrf.mxu0 }
 0x16a   : > { %v1708_v10 = vpop.f32.mrf.mxu1  ;;  %v1794_v2 = vpop.f32.mrf.mxu2 }
 0x16b   : > { %2014 = vmatmul.bf16.gmra.mxu0 %v4154_v7  ;;  %v1795_v34 = vadd.f32 %v1794_v2, %v1706_v11  ;;  %v1709_v18 = vadd.f32 %v1708_v10, %v3929_v51 }
 0x16c   : > { %v1883_v15 = vpop.f32.mrf.mxu3 }
 0x16d   : > { %1747 = vmatmul.bf16.gmra.mxu1 %v4103_v27  ;;  %v1884_v31 = vadd.f32 %v1883_v15, %v1795_v34 }
 0x16f   : > { %1836 = vmatmul.bf16.gmra.mxu2 %v4127_v37  ;;  %v4166_v46 = vadd.f32 %v1972_v59, %v1884_v31 }
 0x170   : > { %v1977_v20 = vpop.f32.mrf.mxu0 }
 0x171   : > { %1925 = vmatmul.bf16.gmra.mxu3 %v4163_v3 }
 0x172   : > { %v1710_v63 = vpop.f32.mrf.mxu1  ;;  %v1797_v49 = vpop.f32.mrf.mxu2 }
 0x173   : > { %v1798_v32 = vadd.f32 %v1797_v49, %v1709_v18  ;;  %v1711_v11 = vadd.f32 %v1710_v63, %v3949_v28 }
 0x174   : > { %v1886_v61 = vpop.f32.mrf.mxu3 }
 0x175   : > { %v1887_v30 = vadd.f32 %v1886_v61, %v1798_v32 }
 0x177   : > { %v4170_v55 = vadd.f32 %v1975_v50, %v1887_v30 }
 0x178   : > { %v1980_v17 = vpop.f32.mrf.mxu0 }
 0x17a   : > { %v1713_v23 = vpop.f32.mrf.mxu1  ;;  %v1799_v59 = vpop.f32.mrf.mxu2 }
 0x17b   : > { %2295 = vmatmul.bf16.vlgmr.msra.gmra.mxu0 %v3733_v6  ;;  %v1800_v2 = vadd.f32 %v1799_v59, %v1711_v11  ;;  %v1714_v18 = vadd.f32 %v1713_v23, %v3849_v12 }
 0x17c   : > { %v1888_v34 = vpop.f32.mrf.mxu3 }
 0x17d   : > { %2028 = vmatmul.bf16.vlgmr.msra.gmra.mxu1 %v3713_v45  ;;  %v1889_v51 = vadd.f32 %v1888_v34, %v1800_v2  ;;  %v4430_v2 = vld [vmem:[#allocation22_spill] sm:$0xff] }
 0x17f   : > { %2117 = vmatmul.bf16.vlgmr.msra.gmra.mxu2 %v3639_v52  ;;  %v4176_v31 = vadd.f32 %v1977_v20, %v1889_v51 }
 0x180   : > { %v1982_v15 = vpop.f32.mrf.mxu0 }
 0x181   : > { %2206 = vmatmul.bf16.vlgmr.msra.gmra.mxu3 %v3754_v22 }
 0x182   : > { %v1715_v10 = vpop.f32.mrf.mxu1  ;;  %v1802_v50 = vpop.f32.mrf.mxu2 }
 0x183   : > { %v1803_v45 = vadd.f32 %v1802_v50, %v1714_v18  ;;  %v1716_v30 = vadd.f32 %v1715_v10, %v3867_v9 }
 0x184   : > { %v1891_v49 = vpop.f32.mrf.mxu3 }
 0x185   : > { %v1892_v28 = vadd.f32 %v1891_v49, %v1803_v45  ;;  %v4432_v49 = vld [vmem:[#allocation24_spill] sm:$0xff] }
 0x187   : > { %v4180_v61 = vadd.f32 %v1980_v17, %v1892_v28  ;;  %v4431_v17 = vld [vmem:[#allocation11_spill] sm:$0xff] }
 0x188   : > { %v1985_v32 = vpop.f32.mrf.mxu0 }
 0x18a   : > { %v1718_v63 = vpop.f32.mrf.mxu1  ;;  %v1804_v52 = vpop.f32.mrf.mxu2 }
 0x18b   : > { %2300 = vmatmul.bf16.gmra.mxu0 %v3759_v60  ;;  %v1805_v20 = vadd.f32 %v1804_v52, %v1716_v30  ;;  %v1719_v34 = vadd.f32 %v1718_v63, %v4430_v2  ;;  %v4433_v30 = vld [vmem:[#allocation12_spill] sm:$0xff] }
 0x18c   : > { %v1893_v11 = vpop.f32.mrf.mxu3 }
 0x18d   : > { %2033 = vmatmul.bf16.gmra.mxu1 %v3733_v6  ;;  %v1894_v12 = vadd.f32 %v1893_v11, %v1805_v20 }
 0x18f   : > { %2122 = vmatmul.bf16.gmra.mxu2 %v3695_v26  ;;  %v4186_v59 = vadd.f32 %v1982_v15, %v1894_v12  ;;  %v4434_v12 = vld [vmem:[#allocation3_spill] sm:$0xff] }
 0x190   : > { %v1987_v22 = vpop.f32.mrf.mxu0 }
 0x191   : > { %2211 = vmatmul.bf16.gmra.mxu3 %v4431_v17 }
 0x192   : > { %v1720_v23 = vpop.f32.mrf.mxu1  ;;  %v1807_v51 = vpop.f32.mrf.mxu2 }
 0x193   : > { %v1808_v6 = vadd.f32 %v1807_v51, %v1719_v34  ;;  %v1721_v28 = vadd.f32 %v1720_v23, %v4432_v49  ;;  %v4436_v34 = vld [vmem:[#allocation27_spill] sm:$0xff] }
 0x194   : > { %v1896_v18 = vpop.f32.mrf.mxu3 }
 0x195   : > { %v1897_v9 = vadd.f32 %v1896_v18, %v1808_v6 }
 0x197   : > { %v4190_v45 = vadd.f32 %v1985_v32, %v1897_v9  ;;  %v4437_v32 = vld [vmem:[#allocation10_spill] sm:$0xff] }
 0x198   : > { %v1990_v50 = vpop.f32.mrf.mxu0 }
 0x19a   : > { %v1723_v10 = vpop.f32.mrf.mxu1  ;;  %v1809_v26 = vpop.f32.mrf.mxu2 }
 0x19b   : > { %2305 = vmatmul.bf16.gmra.mxu0 %v4433_v30  ;;  %v1810_v15 = vadd.f32 %v1809_v26, %v1721_v28  ;;  %v1724_v17 = vadd.f32 %v1723_v10, %v4436_v34  ;;  %v4439_v28 = vld [vmem:[#allocation29_spill] sm:$0xff] }
 0x19c   : > { %v1898_v52 = vpop.f32.mrf.mxu3 }
 0x19d   : > { %2038 = vmatmul.bf16.gmra.mxu1 %v3759_v60  ;;  %v1899_v63 = vadd.f32 %v1898_v52, %v1810_v15  ;;  %v4440_v15 = vld [vmem:[#allocation14_spill] sm:$0xff] }
 0x19f   : > { %2127 = vmatmul.bf16.gmra.mxu2 %v4434_v12  ;;  %v4196_v2 = vadd.f32 %v1987_v22, %v1899_v63 }
 0x1a0   : > { %v1992_v11 = vpop.f32.mrf.mxu0 }
 0x1a1   : > { %4435 = vst [vmem:[#allocation9_spill] sm:$0xff] %v4196_v2  ;;  %2216 = vmatmul.bf16.gmra.mxu3 %v4437_v32  ;;  %v4441_v32 = vld [vmem:[#allocation5_spill] sm:$0xff] }
 0x1a2   : > { %v1725_v20 = vpop.f32.mrf.mxu1  ;;  %v1812_v51 = vpop.f32.mrf.mxu2 }
 0x1a3   : > { %v1813_v60 = vadd.f32 %v1812_v51, %v1724_v17  ;;  %v1726_v26 = vadd.f32 %v1725_v20, %v4439_v28  ;;  %v4443_v51 = vld [vmem:[#allocation31_spill] sm:$0xff] }
 0x1a4   : > { %v1901_v6 = vpop.f32.mrf.mxu3 }
 0x1a5   : > { %v1902_v23 = vadd.f32 %v1901_v6, %v1813_v60 }
 0x1a7   : > { %v4200_v49 = vadd.f32 %v1990_v50, %v1902_v23  ;;  %v4444_v50 = vld [vmem:[#allocation13_spill] sm:$0xff] }
 0x1a8   : > { %v1995_v9 = vpop.f32.mrf.mxu0 }
 0x1a9   : > { %4438 = vst [vmem:[#allocation22_spill] sm:$0xff] %v4200_v49 }
 0x1aa   : > { %v1728_v18 = vpop.f32.mrf.mxu1  ;;  %v1814_v22 = vpop.f32.mrf.mxu2 }
 0x1ab   : > { %2310 = vmatmul.bf16.gmra.mxu0 %v4440_v15  ;;  %v1815_v52 = vadd.f32 %v1814_v22, %v1726_v26  ;;  %v1729_v60 = vadd.f32 %v1728_v18, %v4443_v51  ;;  %v4446_v26 = vld [vmem:[#allocation33_spill] sm:$0xff] }
 0x1ac   : > { %v1903_v63 = vpop.f32.mrf.mxu3 }
 0x1ad   : > { %2043 = vmatmul.bf16.gmra.mxu1 %v4433_v30  ;;  %v1904_v10 = vadd.f32 %v1903_v63, %v1815_v52  ;;  %v4447_v52 = vld [vmem:[#allocation16_spill] sm:$0xff] }
 0x1af   : > { %2132 = vmatmul.bf16.gmra.mxu2 %v4441_v32  ;;  %v4206_v17 = vadd.f32 %v1992_v11, %v1904_v10 }
 0x1b0   : > { %v1997_v34 = vpop.f32.mrf.mxu0 }
 0x1b1   : > { %4442 = vst [vmem:[#allocation11_spill] sm:$0xff] %v4206_v17  ;;  %2221 = vmatmul.bf16.gmra.mxu3 %v4444_v50  ;;  %v4448_v50 = vld [vmem:[#allocation6_spill] sm:$0xff] }
 0x1b2   : > { %v1730_v12 = vpop.f32.mrf.mxu1  ;;  %v1817_v6 = vpop.f32.mrf.mxu2 }
 0x1b3   : > { %v1818_v30 = vadd.f32 %v1817_v6, %v1729_v60  ;;  %v1731_v22 = vadd.f32 %v1730_v12, %v4446_v26  ;;  %v4450_v6 = vld [vmem:[#allocation18_spill] sm:$0xff] }
 0x1b4   : > { %v1906_v23 = vpop.f32.mrf.mxu3 }
 0x1b5   : > { %v1907_v20 = vadd.f32 %v1906_v23, %v1818_v30 }
 0x1b7   : > { %v4210_v2 = vadd.f32 %v1995_v9, %v1907_v20  ;;  %v4451_v9 = vld [vmem:[#allocation15_spill] sm:$0xff] }
 0x1b8   : > { %v2000_v49 = vpop.f32.mrf.mxu0 }
 0x1b9   : > { %4445 = vst [vmem:[#allocation24_spill] sm:$0xff] %v4210_v2 }
 0x1ba   : > { %v1733_v28 = vpop.f32.mrf.mxu1  ;;  %v1819_v11 = vpop.f32.mrf.mxu2 }
 0x1bb   : > { %2315 = vmatmul.bf16.gmra.mxu0 %v4447_v52  ;;  %v1820_v63 = vadd.f32 %v1819_v11, %v1731_v22  ;;  %v1734_v30 = vadd.f32 %v1733_v28, %v4450_v6  ;;  %v4453_v22 = vld [vmem:[#allocation19_spill] sm:$0xff] }
 0x1bc   : > { %v1908_v10 = vpop.f32.mrf.mxu3 }
 0x1bd   : > { %2048 = vmatmul.bf16.gmra.mxu1 %v4440_v15  ;;  %v1909_v18 = vadd.f32 %v1908_v10, %v1820_v63  ;;  %v4454_v63 = vld [vmem:[#allocation20_spill] sm:$0xff] }
 0x1bf   : > { %2137 = vmatmul.bf16.gmra.mxu2 %v4448_v50  ;;  %v4216_v60 = vadd.f32 %v1997_v34, %v1909_v18 }
 0x1c0   : > { %v2002_v51 = vpop.f32.mrf.mxu0 }
 0x1c1   : > { %4449 = vst [vmem:[#allocation12_spill] sm:$0xff] %v4216_v60  ;;  %2226 = vmatmul.bf16.gmra.mxu3 %v4451_v9  ;;  %v4455_v9 = vld [vmem:[#allocation8_spill] sm:$0xff] }
 0x1c2   : > { %v1735_v32 = vpop.f32.mrf.mxu1  ;;  %v1822_v23 = vpop.f32.mrf.mxu2 }
 0x1c3   : > { %v1823_v15 = vadd.f32 %v1822_v23, %v1734_v30  ;;  %v1736_v11 = vadd.f32 %v1735_v32, %v4453_v22  ;;  %v4456_v23 = vld [vmem:[#allocation23_spill] sm:$0xff] }
 0x1c4   : > { %v1911_v20 = vpop.f32.mrf.mxu3 }
 0x1c5   : > { %v1912_v12 = vadd.f32 %v1911_v20, %v1823_v15 }
 0x1c7   : > { %v4220_v17 = vadd.f32 %v2000_v49, %v1912_v12  ;;  %v4457_v49 = vld [vmem:[#allocation17_spill] sm:$0xff] }
 0x1c8   : > { %v2005_v2 = vpop.f32.mrf.mxu0 }
 0x1c9   : > { %4452 = vst [vmem:[#allocation3_spill] sm:$0xff] %v4220_v17 }
 0x1ca   : > { %v1738_v26 = vpop.f32.mrf.mxu1  ;;  %v1824_v34 = vpop.f32.mrf.mxu2 }
 0x1cb   : > { %2320 = vmatmul.bf16.gmra.mxu0 %v4454_v63  ;;  %v1825_v10 = vadd.f32 %v1824_v34, %v1736_v11  ;;  %v1739_v15 = vadd.f32 %v1738_v26, %v4456_v23  ;;  %v4459_v11 = vld [vmem:[#allocation25_spill] sm:$0xff]  ;;  %v4460_v23 = vld [vmem:[#allocation4_spill] sm:$0xff] }
 0x1cc   : > { %v1913_v18 = vpop.f32.mrf.mxu3 }
 0x1cd   : > { %2053 = vmatmul.bf16.gmra.mxu1 %v4447_v52  ;;  %v1914_v28 = vadd.f32 %v1913_v18, %v1825_v10 }
 0x1cf   : > { %2142 = vmatmul.bf16.gmra.mxu2 %v4455_v9  ;;  %v4226_v30 = vadd.f32 %v2002_v51, %v1914_v28 }
 0x1d0   : > { %v2007_v6 = vpop.f32.mrf.mxu0 }
 0x1d1   : > { %2231 = vmatmul.bf16.gmra.mxu3 %v4457_v49  ;;  %v4461_v49 = vld [vmem:[#allocation28_spill] sm:$0xff] }
 0x1d2   : > { %v1740_v50 = vpop.f32.mrf.mxu1  ;;  %v1827_v20 = vpop.f32.mrf.mxu2 }
 0x1d3   : > { %v1828_v52 = vadd.f32 %v1827_v20, %v1739_v15  ;;  %v1741_v34 = vadd.f32 %v1740_v50, %v4459_v11 }
 0x1d4   : > { %v1916_v12 = vpop.f32.mrf.mxu3 }
 0x1d5   : > { %v1917_v32 = vadd.f32 %v1916_v12, %v1828_v52 }
 0x1d7   : > { %v4230_v60 = vadd.f32 %v2005_v2, %v1917_v32  ;;  %v4462_v2 = vld [vmem:[#allocation21_spill] sm:$0xff] }
 0x1d8   : > { %v2010_v17 = vpop.f32.mrf.mxu0 }
 0x1d9   : > { %4458 = vst [vmem:[#allocation27_spill] sm:$0xff] %v4230_v60 }
 0x1da   : > { %v1743_v22 = vpop.f32.mrf.mxu1  ;;  %v1829_v51 = vpop.f32.mrf.mxu2 }
 0x1db   : > { %2325 = vmatmul.bf16.gmra.mxu0 %v3912_v29  ;;  %v1830_v10 = vadd.f32 %v1829_v51, %v1741_v34  ;;  %v1744_v20 = vadd.f32 %v1743_v22, %v4461_v49  ;;  %v4463_v34 = vld [vmem:[#allocation30_spill] sm:$0xff] }
 0x1dc   : > { %v1918_v18 = vpop.f32.mrf.mxu3 }
 0x1dd   : > { %2058 = vmatmul.bf16.gmra.mxu1 %v4454_v63  ;;  %v1919_v26 = vadd.f32 %v1918_v18, %v1830_v10 }
 0x1df   : > { %2147 = vmatmul.bf16.gmra.mxu2 %v4460_v23  ;;  %v4236_v15 = vadd.f32 %v2007_v6, %v1919_v26 }
 0x1e0   : > { %v2012_v9 = vpop.f32.mrf.mxu0 }
 0x1e1   : > { %2236 = vmatmul.bf16.gmra.mxu3 %v4462_v2 }
 0x1e2   : > { %v1745_v28 = vpop.f32.mrf.mxu1  ;;  %v1832_v52 = vpop.f32.mrf.mxu2 }
 0x1e3   : > { %v1833_v63 = vadd.f32 %v1832_v52, %v1744_v20  ;;  %v1746_v51 = vadd.f32 %v1745_v28, %v4463_v34  ;;  %v4464_v20 = vld [vmem:[#allocation32_spill] sm:$0xff] }
 0x1e4   : > { %v1921_v12 = vpop.f32.mrf.mxu3 }
 0x1e5   : > { %v1922_v50 = vadd.f32 %v1921_v12, %v1833_v63 }
 0x1e7   : > { %v4240_v60 = vadd.f32 %v2010_v17, %v1922_v50  ;;  %v4465_v17 = vld [vmem:[#allocation26_spill] sm:$0xff] }
 0x1e8   : > { %v2015_v11 = vpop.f32.mrf.mxu0 }
 0x1ea   : > { %v1748_v32 = vpop.f32.mrf.mxu1  ;;  %v1834_v6 = vpop.f32.mrf.mxu2 }
 0x1eb   : > { %2330 = vmatmul.bf16.gmra.mxu0 %v3956_v4  ;;  %v1835_v10 = vadd.f32 %v1834_v6, %v1746_v51  ;;  %v1749_v2 = vadd.f32 %v1748_v32, %v4464_v20  ;;  %v4466_v51 = vld [vmem:[#allocation34_spill] sm:$0xff] }
 0x1ec   : > { %v1923_v18 = vpop.f32.mrf.mxu3 }
 0x1ed   : > { %2063 = vmatmul.bf16.gmra.mxu1 %v3912_v29  ;;  %v1924_v22 = vadd.f32 %v1923_v18, %v1835_v10 }
 0x1ef   : > { %2152 = vmatmul.bf16.gmra.mxu2 %v3588_v14  ;;  %v4246_v49 = vadd.f32 %v2012_v9, %v1924_v22 }
 0x1f0   : > { %v2017_v23 = vpop.f32.mrf.mxu0 }
 0x1f1   : > { %2241 = vmatmul.bf16.gmra.mxu3 %v4465_v17 }
 0x1f2   : > { %v1750_v26 = vpop.f32.mrf.mxu1  ;;  %v1837_v52 = vpop.f32.mrf.mxu2 }
 0x1f3   : > { %v1838_v29 = vadd.f32 %v1837_v52, %v1749_v2  ;;  %v1751_v6 = vadd.f32 %v1750_v26, %v4466_v51  ;;  %v4467_v2 = vld [vmem:[#allocation35_spill] sm:$0xff] }
 0x1f4   : > { %v1926_v63 = vpop.f32.mrf.mxu3 }
 0x1f5   : > { %v1927_v28 = vadd.f32 %v1926_v63, %v1838_v29 }
 0x1f7   : > { %v4250_v34 = vadd.f32 %v2015_v11, %v1927_v28 }
 0x1f8   : > { %v2296_v50 = vpop.f32.mrf.mxu0 }
 0x1fa   : > { %v2029_v12 = vpop.f32.mrf.mxu1  ;;  %v1839_v14 = vpop.f32.mrf.mxu2 }
 0x1fb   : > { %2335 = vmatmul.bf16.gmra.mxu0 %v3981_v33  ;;  %v1840_v9 = vadd.f32 %v1839_v14, %v1751_v6  ;;  %v2030_v17 = vadd.f32 %v2029_v12, %v4467_v2 }
 0x1fc   : > { %v1928_v10 = vpop.f32.mrf.mxu3 }
 0x1fd   : > { %2068 = vmatmul.bf16.gmra.mxu1 %v3956_v4  ;;  %v1929_v32 = vadd.f32 %v1928_v10, %v1840_v9 }
 0x1ff   : > { %2157 = vmatmul.bf16.gmra.mxu2 %v3659_v0  ;;  %v4256_v20 = vadd.f32 %v2017_v23, %v1929_v32 }
 0x200   : > { %v2298_v22 = vpop.f32.mrf.mxu0 }
 0x201   : > { %2246 = vmatmul.bf16.gmra.mxu3 %v3961_v8 }
 0x202   : > { %v2031_v18 = vpop.f32.mrf.mxu1  ;;  %v2118_v11 = vpop.f32.mrf.mxu2 }
 0x203   : > { %v2119_v52 = vadd.f32 %v2118_v11, %v2030_v17  ;;  %v2032_v28 = vadd.f32 %v2031_v18, %v4016_v54 }
 0x204   : > { %v2207_v4 = vpop.f32.mrf.mxu3 }
 0x205   : > { %v2208_v63 = vadd.f32 %v2207_v4, %v2119_v52 }
 0x207   : > { %v2297_v6 = vadd.f32 %v2296_v50, %v2208_v63 }
 0x208   : > { %v2301_v29 = vpop.f32.mrf.mxu0 }
 0x209   : > { %v2478_v54 = vmul.f32 %v2297_v6, %v2297_v6 }
 0x20a   : > { %v2034_v26 = vpop.f32.mrf.mxu1  ;;  %v2120_v0 = vpop.f32.mrf.mxu2 }
 0x20b   : > { %2340 = vmatmul.bf16.gmra.mxu0 %v4014_v43  ;;  %v2121_v23 = vadd.f32 %v2120_v0, %v2032_v28 }
 0x20c   : > { %v2209_v51 = vpop.f32.mrf.mxu3 }
 0x20d   : > { %2073 = vmatmul.bf16.gmra.mxu1 %v3981_v33  ;;  %v2210_v8 = vadd.f32 %v2209_v51, %v2121_v23  ;;  %v2035_v33 = vadd.f32 %v2034_v26, %v4024_v47 }
 0x20f   : > { %v2299_v12 = vadd.f32 %v2298_v22, %v2210_v8  ;;  %2162 = vmatmul.bf16.gmra.mxu2 %v3711_v44 }
 0x210   : > { %v2303_v9 = vpop.f32.mrf.mxu0 }
 0x211   : > { %v3093_v10 = vpack.c.bf16 %v2299_v12, %v2297_v6  ;;  %v2440_v32 = vadd.f32 %v2299_v12, %v2297_v6  ;;  %v2479_v18 = vmul.f32 %v2299_v12, %v2299_v12  ;;  %2251 = vmatmul.bf16.gmra.mxu3 %v3990_v25 }
 0x212   : > { %v2036_v14 = vpop.f32.mrf.mxu1  ;;  %v2123_v50 = vpop.f32.mrf.mxu2 }
 0x213   : > { %3094 = vst [vmem:[%s4269_s18] sm:$0xff] %v3093_v10   ;;  %v2510_v22 = vadd.f32 %v2479_v18, %v2478_v54  ;;  %v2124_v11 = vadd.f32 %v2123_v50, %v2035_v33  ;;  %v2037_v47 = vadd.f32 %v2036_v14, %v4038_v39 }
 0x214   : > { %v2212_v44 = vpop.f32.mrf.mxu3 }
 0x215   : > { %v2213_v2 = vadd.f32 %v2212_v44, %v2124_v11 }
 0x217   : > { %v2302_v52 = vadd.f32 %v2301_v29, %v2213_v2 }
 0x218   : > { %v2306_v4 = vpop.f32.mrf.mxu0 }
 0x219   : > { %v2441_v63 = vadd.f32 %v2440_v32, %v2302_v52  ;;  %v2480_v28 = vmul.f32 %v2302_v52, %v2302_v52 }
 0x21a   : > { %v2039_v17 = vpop.f32.mrf.mxu1  ;;  %v2125_v26 = vpop.f32.mrf.mxu2 }
 0x21b   : > { %2345 = vmatmul.bf16.gmra.mxu0 %v4036_v35  ;;  %v2511_v25 = vadd.f32 %v2510_v22, %v2480_v28  ;;  %v2126_v0 = vadd.f32 %v2125_v26, %v2037_v47  ;;  %v2040_v54 = vadd.f32 %v2039_v17, %v4058_v38 }
 0x21c   : > { %v2214_v23 = vpop.f32.mrf.mxu3 }
 0x21d   : > { %2078 = vmatmul.bf16.gmra.mxu1 %v4014_v43  ;;  %v2215_v51 = vadd.f32 %v2214_v23, %v2126_v0 }
 0x21f   : > { %v2304_v12 = vadd.f32 %v2303_v9, %v2215_v51  ;;  %2167 = vmatmul.bf16.gmra.mxu2 %v3521_v24 }
 0x220   : > { %v2308_v8 = vpop.f32.mrf.mxu0 }
 0x221   : > { %v3098_v29 = vpack.c.bf16 %v2304_v12, %v2302_v52  ;;  %v2442_v33 = vadd.f32 %v2441_v63, %v2304_v12  ;;  %v2481_v43 = vmul.f32 %v2304_v12, %v2304_v12  ;;  %2256 = vmatmul.bf16.gmra.mxu3 %v4021_v58 }
 0x222   : > { %v2041_v6 = vpop.f32.mrf.mxu1  ;;  %v2128_v39 = vpop.f32.mrf.mxu2 }
 0x223   : > { %3185 = vst [vmem:[%s4269_s18 + $0x8] sm:$0xff] %v3098_v29   ;;  %v2512_v14 = vadd.f32 %v2511_v25, %v2481_v43  ;;  %v2129_v10 = vadd.f32 %v2128_v39, %v2040_v54  ;;  %v2042_v44 = vadd.f32 %v2041_v6, %v4072_v1  ;;  %v4468_v25 = vld [vmem:[#allocation36_spill] sm:$0xff] }
 0x224   : > { %v2217_v32 = vpop.f32.mrf.mxu3 }
 0x225   : > { %v2218_v18 = vadd.f32 %v2217_v32, %v2129_v10  ;;  %v1065_v10 = vrot.slane %v4138_v16, 2  ;;  %v1066_v32 = vrot.slane %v4140_v48, 2 }
 0x227   : > { %v2307_v11 = vadd.f32 %v2306_v4, %v2218_v18 }
 0x228   : > { %v2311_v22 = vpop.f32.mrf.mxu0 }
 0x229   : > { %v2443_v9 = vadd.f32 %v2442_v33, %v2307_v11  ;;  %v2482_v24 = vmul.f32 %v2307_v11, %v2307_v11 }
 0x22a   : > { %v2044_v50 = vpop.f32.mrf.mxu1  ;;  %v2130_v38 = vpop.f32.mrf.mxu2 }
 0x22b   : > { %2350 = vmatmul.bf16.gmra.mxu0 %v4070_v19  ;;  %v2513_v58 = vadd.f32 %v2512_v14, %v2482_v24  ;;  %v2131_v2 = vadd.f32 %v2130_v38, %v2042_v44  ;;  %v2045_v0 = vadd.f32 %v2044_v50, %v4468_v25  ;;  %v1067_v24 = vsel %vm942_vm3, %v1065_v10, %v1066_v32 }
 0x22c   : > { %v2219_v17 = vpop.f32.mrf.mxu3 }
 0x22d   : > { %2083 = vmatmul.bf16.gmra.mxu1 %v4036_v35  ;;  %v2220_v52 = vadd.f32 %v2219_v17, %v2131_v2 }
 0x22f   : > { %v2309_v47 = vadd.f32 %v2308_v8, %v2220_v52  ;;  %2172 = vmatmul.bf16.gmra.mxu2 %v3594_v21 }
 0x230   : > { %v2313_v28 = vpop.f32.mrf.mxu0 }
 0x231   : > { %v3103_v4 = vpack.c.bf16 %v2309_v47, %v2307_v11  ;;  %v2444_v26 = vadd.f32 %v2443_v9, %v2309_v47  ;;  %v2483_v35 = vmul.f32 %v2309_v47, %v2309_v47  ;;  %2261 = vmatmul.bf16.gmra.mxu3 %v4046_v57 }
 0x232   : > { %v2046_v63 = vpop.f32.mrf.mxu1  ;;  %v2133_v1 = vpop.f32.mrf.mxu2 }
 0x233   : > { %3186 = vst [vmem:[%s4269_s18 + $0x10] sm:$0xff] %v3103_v4   ;;  %v2514_v23 = vadd.f32 %v2513_v58, %v2483_v35  ;;  %v2134_v51 = vadd.f32 %v2133_v1, %v2045_v0  ;;  %v2047_v54 = vadd.f32 %v2046_v63, %v4093_v56 }
 0x234   : > { %v2222_v6 = vpop.f32.mrf.mxu3 }
 0x235   : > { %v2223_v12 = vadd.f32 %v2222_v6, %v2134_v51 }
 0x237   : > { %v2312_v43 = vadd.f32 %v2311_v22, %v2223_v12 }
 0x238   : > { %v2316_v33 = vpop.f32.mrf.mxu0 }
 0x239   : > { %v2445_v8 = vadd.f32 %v2444_v26, %v2312_v43  ;;  %v2484_v21 = vmul.f32 %v2312_v43, %v2312_v43  ;;  %v4469_v26 = vld [vmem:[#allocation37_spill] sm:$0xff] }
 0x23a   : > { %v2049_v29 = vpop.f32.mrf.mxu1  ;;  %v2135_v39 = vpop.f32.mrf.mxu2 }
 0x23b   : > { %2355 = vmatmul.bf16.gmra.mxu0 %v4091_v41  ;;  %v2515_v14 = vadd.f32 %v2514_v23, %v2484_v21  ;;  %v2136_v57 = vadd.f32 %v2135_v39, %v2047_v54  ;;  %v2050_v56 = vadd.f32 %v2049_v29, %v4117_v42 }
 0x23c   : > { %v2224_v18 = vpop.f32.mrf.mxu3 }
 0x23d   : > { %2088 = vmatmul.bf16.gmra.mxu1 %v4070_v19  ;;  %v2225_v50 = vadd.f32 %v2224_v18, %v2136_v57  ;;  %v1068_v19 = vrot.slane %v4142_v62, 2 }
 0x23f   : > { %v2314_v9 = vadd.f32 %v2313_v28, %v2225_v50  ;;  %2177 = vmatmul.bf16.gmra.mxu2 %v4427_v13  ;;  %v1069_v44 = vsel %vm942_vm3, %v1066_v32, %v1068_v19 }
 0x240   : > { %v2318_v22 = vpop.f32.mrf.mxu0  ;;  %v4299_v48 = vpack.c.bf16 %v1069_v44, %v1067_v24  ;;  %v636_v44 = vld [vmem:[#allocation2 + $0x1a8] sm:$0x3] }
 0x241   : > { %v3108_v38 = vpack.c.bf16 %v2314_v9, %v2312_v43  ;;  %v2446_v16 = vadd.f32 %v2445_v8, %v2314_v9  ;;  %v2485_v58 = vmul.f32 %v2314_v9, %v2314_v9  ;;  %2266 = vmatmul.bf16.gmra.mxu3 %v4077_v5  ;;  %v4470_v43 = vld [vmem:[#allocation7_spill] sm:$0xff] }
 0x242   : > { %v2051_v11 = vpop.f32.mrf.mxu1  ;;  %v2138_v2 = vpop.f32.mrf.mxu2 }
 0x243   : > { %3187 = vst [vmem:[%s4269_s18 + $0x18] sm:$0xff] %v3108_v38   ;;  %v2516_v17 = vadd.f32 %v2515_v14, %v2485_v58  ;;  %v2139_v62 = vadd.f32 %v2138_v2, %v2050_v56  ;;  %v2052_v35 = vadd.f32 %v2051_v11, %v4469_v26  ;;  %v1085_v2 = vrot.slane %v636_v44, 2 }
 0x244   : > { %v2227_v52 = vpop.f32.mrf.mxu3 }
 0x245   : > { %v2228_v63 = vadd.f32 %v2227_v52, %v2139_v62 }
 0x247   : > { %v2317_v42 = vadd.f32 %v2316_v33, %v2228_v63 }
 0x248   : > { %v2321_v28 = vpop.f32.mrf.mxu0 }
 0x249   : > { %v2447_v47 = vadd.f32 %v2446_v16, %v2317_v42  ;;  %v2486_v4 = vmul.f32 %v2317_v42, %v2317_v42  ;;  %v3235_v16 = vld [vmem:[#allocation2] sm:$0xff] }
 0x24a   : > { %v2054_v13 = vpop.f32.mrf.mxu1  ;;  %v2140_v5 = vpop.f32.mrf.mxu2  ;;  %v1082_v58 = vrot.slane %v3235_v16, 2 }
 0x24b   : > { %2360 = vmatmul.bf16.gmra.mxu0 %v4127_v37  ;;  %v2517_v25 = vadd.f32 %v2516_v17, %v2486_v4  ;;  %v2141_v0 = vadd.f32 %v2140_v5, %v2052_v35  ;;  %v2055_v8 = vadd.f32 %v2054_v13, %v4470_v43 }
 0x24c   : > { %v2229_v1 = vpop.f32.mrf.mxu3  ;;  %v1086_v13 = vsel %vm942_vm3, %v1082_v58, %v1085_v2 }
 0x24d   : > { %2093 = vmatmul.bf16.gmra.mxu1 %v4091_v41  ;;  %v2230_v23 = vadd.f32 %v2229_v1, %v2141_v0  ;;  %v1142_v35 = vpack.c.bf16 %v1086_v13, %v1082_v58 }
 0x24f   : > { %v2319_v12 = vadd.f32 %v2318_v22, %v2230_v23  ;;  %2182 = vmatmul.bf16.gmra.mxu2 %v4429_v36 }
 0x250   : > { %v2323_v6 = vpop.f32.mrf.mxu0 }
 0x251   : > { %v3113_v29 = vpack.c.bf16 %v2319_v12, %v2317_v42  ;;  %v2448_v33 = vadd.f32 %v2447_v47, %v2319_v12  ;;  %v2487_v41 = vmul.f32 %v2319_v12, %v2319_v12  ;;  %2271 = vmatmul.bf16.gmra.mxu3 %v4103_v27 }
 0x252   : > { %v2056_v51 = vpop.f32.mrf.mxu1  ;;  %v2143_v21 = vpop.f32.mrf.mxu2 }
 0x253   : > { %3188 = vst [vmem:[%s4269_s18 + $0x20] sm:$0xff] %v3113_v29   ;;  %v2518_v54 = vadd.f32 %v2517_v25, %v2487_v41  ;;  %v2144_v39 = vadd.f32 %v2143_v21, %v2055_v8  ;;  %v2057_v11 = vadd.f32 %v2056_v51, %v4148_v53  ;;  %v1075_v25 = vrot.slane %v3235_v16, 1 }
 0x254   : > { %v2232_v14 = vpop.f32.mrf.mxu3  ;;  %v1140_v29 = vpack.c.bf16 %v3235_v16, %v3235_v16 }
 0x255   : > { %v2233_v57 = vadd.f32 %v2232_v14, %v2144_v39 }
 0x257   : > { %v2322_v18 = vadd.f32 %v2321_v28, %v2233_v57 }
 0x258   : > { %v2326_v32 = vpop.f32.mrf.mxu0 }
 0x259   : > { %v2449_v50 = vadd.f32 %v2448_v33, %v2322_v18  ;;  %v2488_v36 = vmul.f32 %v2322_v18, %v2322_v18 }
 0x25a   : > { %v2059_v10 = vpop.f32.mrf.mxu1  ;;  %v2145_v22 = vpop.f32.mrf.mxu2 }
 0x25b   : > { %2365 = vmatmul.bf16.gmra.mxu0 %v4299_v48  ;;  %v2519_v19 = vadd.f32 %v2518_v54, %v2488_v36  ;;  %v2146_v27 = vadd.f32 %v2145_v22, %v2057_v11  ;;  %v2060_v52 = vadd.f32 %v2059_v10, %v4156_v40 }
 0x25c   : > { %v2234_v9 = vpop.f32.mrf.mxu3 }
 0x25d   : > { %2098 = vmatmul.bf16.gmra.mxu1 %v4127_v37  ;;  %v2235_v56 = vadd.f32 %v2234_v9, %v2146_v27 }
 0x25f   : > { %v2324_v17 = vadd.f32 %v2323_v6, %v2235_v56  ;;  %2187 = vmatmul.bf16.gmra.mxu2 %v4163_v3  ;;  %v1078_v3 = vrot.slane %v636_v44, 1 }
 0x260   : > { %v2328_v38 = vpop.f32.mrf.mxu0 }
 0x261   : > { %v3118_v37 = vpack.c.bf16 %v2324_v17, %v2322_v18  ;;  %v2450_v62 = vadd.f32 %v2449_v50, %v2324_v17  ;;  %v2489_v53 = vmul.f32 %v2324_v17, %v2324_v17  ;;  %2276 = vmatmul.bf16.gmra.mxu3 %v4154_v7  ;;  %v1079_v51 = vsel %vm829_vm4, %v1075_v25, %v1078_v3 }
 0x262   : > { %v2061_v24 = vpop.f32.mrf.mxu1  ;;  %v2148_v63 = vpop.f32.mrf.mxu2  ;;  %v1141_v43 = vpack.c.bf16 %v1079_v51, %v1075_v25 }
 0x263   : > { %3189 = vst [vmem:[%s4269_s18 + $0x28] sm:$0xff] %v3118_v37   ;;  %v2520_v28 = vadd.f32 %v2519_v19, %v2489_v53  ;;  %v2149_v42 = vadd.f32 %v2148_v63, %v2060_v52  ;;  %v2062_v7 = vadd.f32 %v2061_v24, %v4166_v46 }
 0x264   : > { %v2237_v47 = vpop.f32.mrf.mxu3 }
 0x265   : > { %v2238_v4 = vadd.f32 %v2237_v47, %v2149_v42 }
 0x267   : > { %v2327_v0 = vadd.f32 %v2326_v32, %v2238_v4 }
 0x268   : > { %v2331_v5 = vpop.f32.mrf.mxu0 }
 0x269   : > { %v2451_v1 = vadd.f32 %v2450_v62, %v2327_v0  ;;  %v2490_v40 = vmul.f32 %v2327_v0, %v2327_v0 }
 0x26a   : > { %v2064_v26 = vpop.f32.mrf.mxu1  ;;  %v2150_v23 = vpop.f32.mrf.mxu2 }
 0x26b   : > { %2370 = vmatmul.bf16.gmra.mxu0 %v1142_v35  ;;  %v2521_v6 = vadd.f32 %v2520_v28, %v2490_v40  ;;  %v2151_v12 = vadd.f32 %v2150_v23, %v2062_v7  ;;  %v2065_v46 = vadd.f32 %v2064_v26, %v4170_v55 }
 0x26c   : > { %v2239_v33 = vpop.f32.mrf.mxu3 }
 0x26d   : > { %2103 = vmatmul.bf16.gmra.mxu1 %v4299_v48  ;;  %v2240_v41 = vadd.f32 %v2239_v33, %v2151_v12 }
 0x26f   : > { %v2329_v54 = vadd.f32 %v2328_v38, %v2240_v41  ;;  %2192 = vmatmul.bf16.gmra.mxu2 %v1140_v29 }
 0x270   : > { %v2333_v21 = vpop.f32.mrf.mxu0 }
 0x271   : > { %v3123_v48 = vpack.c.bf16 %v2329_v54, %v2327_v0  ;;  %v2452_v39 = vadd.f32 %v2451_v1, %v2329_v54  ;;  %v2491_v14 = vmul.f32 %v2329_v54, %v2329_v54  ;;  %2281 = vmatmul.bf16.gmra.mxu3 %v1141_v43 }
 0x272   : > { %v2066_v8 = vpop.f32.mrf.mxu1  ;;  %v2153_v57 = vpop.f32.mrf.mxu2 }
 0x273   : > { %3190 = vst [vmem:[%s4269_s18 + $0x30] sm:$0xff] %v3123_v48   ;;  %v2522_v10 = vadd.f32 %v2521_v6, %v2491_v14  ;;  %v2154_v32 = vadd.f32 %v2153_v57, %v2065_v46  ;;  %v2067_v9 = vadd.f32 %v2066_v8, %v4176_v31  ;;  %v4471_v46 = vld [vmem:[#allocation9_spill] sm:$0xff] }
 0x274   : > { %v2242_v18 = vpop.f32.mrf.mxu3 }
 0x275   : > { %v2243_v50 = vadd.f32 %v2242_v18, %v2154_v32 }
 0x277   : > { %v2332_v22 = vadd.f32 %v2331_v5, %v2243_v50 }
 0x278   : > { %v2336_v11 = vpop.f32.mrf.mxu0 }
 0x279   : > { %v2453_v19 = vadd.f32 %v2452_v39, %v2332_v22  ;;  %v2492_v27 = vmul.f32 %v2332_v22, %v2332_v22 }
 0x27a   : > { %v2069_v36 = vpop.f32.mrf.mxu1  ;;  %v2155_v56 = vpop.f32.mrf.mxu2 }
 0x27b   : > { %v2523_v24 = vadd.f32 %v2522_v10, %v2492_v27  ;;  %v2156_v44 = vadd.f32 %v2155_v56, %v2067_v9  ;;  %v2070_v53 = vadd.f32 %v2069_v36, %v4180_v61  ;;  %v4472_v56 = vld [vmem:[#allocation22_spill] sm:$0xff] }
 0x27c   : > { %v2244_v38 = vpop.f32.mrf.mxu3 }
 0x27d   : > { %v2245_v55 = vadd.f32 %v2244_v38, %v2156_v44 }
 0x27f   : > { %v2334_v2 = vadd.f32 %v2333_v21, %v2245_v55 }
 0x280   : > { %v2338_v58 = vpop.f32.mrf.mxu0 }
 0x281   : > { %v3128_v17 = vpack.c.bf16 %v2334_v2, %v2332_v22  ;;  %v2454_v37 = vadd.f32 %v2453_v19, %v2334_v2  ;;  %v2493_v62 = vmul.f32 %v2334_v2, %v2334_v2 }
 0x282   : > { %v2071_v16 = vpop.f32.mrf.mxu1  ;;  %v2158_v52 = vpop.f32.mrf.mxu2 }
 0x283   : > { %3191 = vst [vmem:[%s4269_s18 + $0x38] sm:$0xff] %v3128_v17   ;;  %v2524_v63 = vadd.f32 %v2523_v24, %v2493_v62  ;;  %v2159_v13 = vadd.f32 %v2158_v52, %v2070_v53  ;;  %v2072_v5 = vadd.f32 %v2071_v16, %v4186_v59  ;;  %v4473_v52 = vld [vmem:[#allocation11_spill] sm:$0xff] }
 0x284   : > { %v2247_v28 = vpop.f32.mrf.mxu3 }
 0x285   : > { %v2248_v42 = vadd.f32 %v2247_v28, %v2159_v13 }
 0x287   : > { %v2337_v4 = vadd.f32 %v2336_v11, %v2248_v42 }
 0x288   : > { %v2341_v47 = vpop.f32.mrf.mxu0 }
 0x289   : > { %v2455_v26 = vadd.f32 %v2454_v37, %v2337_v4  ;;  %v2494_v35 = vmul.f32 %v2337_v4, %v2337_v4 }
 0x28a   : > { %v2074_v31 = vpop.f32.mrf.mxu1  ;;  %v2160_v25 = vpop.f32.mrf.mxu2 }
 0x28b   : > { %v2525_v3 = vadd.f32 %v2524_v63, %v2494_v35  ;;  %v2161_v0 = vadd.f32 %v2160_v25, %v2072_v5  ;;  %v2075_v29 = vadd.f32 %v2074_v31, %v4190_v45 }
 0x28c   : > { %v2249_v1 = vpop.f32.mrf.mxu3 }
 0x28d   : > { %v2250_v40 = vadd.f32 %v2249_v1, %v2161_v0  ;;  %v4474_v0 = vld [vmem:[#allocation24_spill] sm:$0xff] }
 0x28f   : > { %v2339_v23 = vadd.f32 %v2338_v58, %v2250_v40 }
 0x290   : > { %v2343_v7 = vpop.f32.mrf.mxu0 }
 0x291   : > { %v3133_v51 = vpack.c.bf16 %v2339_v23, %v2337_v4  ;;  %v2456_v6 = vadd.f32 %v2455_v26, %v2339_v23  ;;  %v2495_v12 = vmul.f32 %v2339_v23, %v2339_v23 }
 0x292   : > { %v2076_v61 = vpop.f32.mrf.mxu1  ;;  %v2163_v33 = vpop.f32.mrf.mxu2 }
 0x293   : > { %3192 = vst [vmem:[%s4269_s18 + $0x40] sm:$0xff] %v3133_v51   ;;  %v2526_v41 = vadd.f32 %v2525_v3, %v2495_v12  ;;  %v2164_v43 = vadd.f32 %v2163_v33, %v2075_v29  ;;  %v2077_v57 = vadd.f32 %v2076_v61, %v4471_v46 }
 0x294   : > { %v2252_v8 = vpop.f32.mrf.mxu3 }
 0x295   : > { %v2253_v21 = vadd.f32 %v2252_v8, %v2164_v43  ;;  %v4475_v43 = vld [vmem:[#allocation12_spill] sm:$0xff] }
 0x297   : > { %v2342_v48 = vadd.f32 %v2341_v47, %v2253_v21 }
 0x298   : > { %v2346_v54 = vpop.f32.mrf.mxu0 }
 0x299   : > { %v2457_v39 = vadd.f32 %v2456_v6, %v2342_v48  ;;  %v2496_v14 = vmul.f32 %v2342_v48, %v2342_v48 }
 0x29a   : > { %v2079_v59 = vpop.f32.mrf.mxu1  ;;  %v2165_v10 = vpop.f32.mrf.mxu2 }
 0x29b   : > { %v2527_v32 = vadd.f32 %v2526_v41, %v2496_v14  ;;  %v2166_v18 = vadd.f32 %v2165_v10, %v2077_v57  ;;  %v2080_v24 = vadd.f32 %v2079_v59, %v4472_v56 }
 0x29c   : > { %v2254_v50 = vpop.f32.mrf.mxu3 }
 0x29d   : > { %v2255_v36 = vadd.f32 %v2254_v50, %v2166_v18  ;;  %v4476_v18 = vld [vmem:[#allocation3_spill] sm:$0xff] }
 0x29f   : > { %v2344_v22 = vadd.f32 %v2343_v7, %v2255_v36 }
 0x2a0   : > { %v2348_v11 = vpop.f32.mrf.mxu0 }
 0x2a1   : > { %v3138_v19 = vpack.c.bf16 %v2344_v22, %v2342_v48  ;;  %v2458_v27 = vadd.f32 %v2457_v39, %v2344_v22  ;;  %v2497_v9 = vmul.f32 %v2344_v22, %v2344_v22 }
 0x2a2   : > { %v2081_v45 = vpop.f32.mrf.mxu1  ;;  %v2168_v44 = vpop.f32.mrf.mxu2 }
 0x2a3   : > { %3193 = vst [vmem:[%s4269_s18 + $0x48] sm:$0xff] %v3138_v19   ;;  %v2528_v38 = vadd.f32 %v2527_v32, %v2497_v9  ;;  %v2169_v55 = vadd.f32 %v2168_v44, %v2080_v24  ;;  %v2082_v63 = vadd.f32 %v2081_v45, %v4473_v52 }
 0x2a4   : > { %v2257_v16 = vpop.f32.mrf.mxu3 }
 0x2a5   : > { %v2258_v58 = vadd.f32 %v2257_v16, %v2169_v55 }
 0x2a7   : > { %v2347_v37 = vadd.f32 %v2346_v54, %v2258_v58 }
 0x2a8   : > { %v2351_v17 = vpop.f32.mrf.mxu0 }
 0x2a9   : > { %v2459_v62 = vadd.f32 %v2458_v27, %v2347_v37  ;;  %v2498_v53 = vmul.f32 %v2347_v37, %v2347_v37 }
 0x2aa   : > { %v2084_v2 = vpop.f32.mrf.mxu1  ;;  %v2170_v13 = vpop.f32.mrf.mxu2 }
 0x2ab   : > { %v2529_v28 = vadd.f32 %v2528_v38, %v2498_v53  ;;  %v2171_v42 = vadd.f32 %v2170_v13, %v2082_v63  ;;  %v2085_v1 = vadd.f32 %v2084_v2, %v4474_v0 }
 0x2ac   : > { %v2259_v31 = vpop.f32.mrf.mxu3 }
 0x2ad   : > { %v2260_v47 = vadd.f32 %v2259_v31, %v2171_v42 }
 0x2af   : > { %v2349_v35 = vadd.f32 %v2348_v11, %v2260_v47 }
 0x2b0   : > { %v2353_v26 = vpop.f32.mrf.mxu0 }
 0x2b1   : > { %v3143_v5 = vpack.c.bf16 %v2349_v35, %v2347_v37  ;;  %v2460_v25 = vadd.f32 %v2459_v62, %v2349_v35  ;;  %v2499_v3 = vmul.f32 %v2349_v35, %v2349_v35 }
 0x2b2   : > { %v2086_v4 = vpop.f32.mrf.mxu1  ;;  %v2173_v40 = vpop.f32.mrf.mxu2 }
 0x2b3   : > { %3194 = vst [vmem:[%s4269_s18 + $0x50] sm:$0xff] %v3143_v5   ;;  %v2530_v61 = vadd.f32 %v2529_v28, %v2499_v3  ;;  %v2174_v7 = vadd.f32 %v2173_v40, %v2085_v1  ;;  %v2087_v8 = vadd.f32 %v2086_v4, %v4475_v43  ;;  %v4477_v28 = vld [vmem:[#allocation27_spill] sm:$0xff] }
 0x2b4   : > { %v2262_v23 = vpop.f32.mrf.mxu3 }
 0x2b5   : > { %v2263_v51 = vadd.f32 %v2262_v23, %v2174_v7 }
 0x2b7   : > { %v2352_v12 = vadd.f32 %v2351_v17, %v2263_v51 }
 0x2b8   : > { %v2356_v29 = vpop.f32.mrf.mxu0 }
 0x2b9   : > { %v2461_v33 = vadd.f32 %v2460_v25, %v2352_v12  ;;  %v2500_v41 = vmul.f32 %v2352_v12, %v2352_v12 }
 0x2ba   : > { %v2089_v6 = vpop.f32.mrf.mxu1  ;;  %v2175_v21 = vpop.f32.mrf.mxu2 }
 0x2bb   : > { %v2531_v59 = vadd.f32 %v2530_v61, %v2500_v41  ;;  %v2176_v54 = vadd.f32 %v2175_v21, %v2087_v8  ;;  %v2090_v50 = vadd.f32 %v2089_v6, %v4476_v18 }
 0x2bc   : > { %v2264_v48 = vpop.f32.mrf.mxu3 }
 0x2bd   : > { %v2265_v39 = vadd.f32 %v2264_v48, %v2176_v54 }
 0x2bf   : > { %v2354_v46 = vadd.f32 %v2353_v26, %v2265_v39 }
 0x2c0   : > { %v2358_v45 = vpop.f32.mrf.mxu0 }
 0x2c1   : > { %v3148_v57 = vpack.c.bf16 %v2354_v46, %v2352_v12  ;;  %v2462_v10 = vadd.f32 %v2461_v33, %v2354_v46  ;;  %v2501_v32 = vmul.f32 %v2354_v46, %v2354_v46 }
 0x2c2   : > { %v2091_v14 = vpop.f32.mrf.mxu1  ;;  %v2178_v36 = vpop.f32.mrf.mxu2 }
 0x2c3   : > { %3195 = vst [vmem:[%s4269_s18 + $0x58] sm:$0xff] %v3148_v57   ;;  %v2532_v11 = vadd.f32 %v2531_v59, %v2501_v32  ;;  %v2179_v22 = vadd.f32 %v2178_v36, %v2090_v50  ;;  %v2092_v38 = vadd.f32 %v2091_v14, %v4226_v30 }
 0x2c4   : > { %v2267_v19 = vpop.f32.mrf.mxu3 }
 0x2c5   : > { %v2268_v27 = vadd.f32 %v2267_v19, %v2179_v22 }
 0x2c7   : > { %v2357_v56 = vadd.f32 %v2356_v29, %v2268_v27 }
 0x2c8   : > { %v2361_v17 = vpop.f32.mrf.mxu0 }
 0x2c9   : > { %v2463_v24 = vadd.f32 %v2462_v10, %v2357_v56  ;;  %v2502_v44 = vmul.f32 %v2357_v56, %v2357_v56 }
 0x2ca   : > { %v2094_v9 = vpop.f32.mrf.mxu1  ;;  %v2180_v55 = vpop.f32.mrf.mxu2 }
 0x2cb   : > { %v2533_v16 = vadd.f32 %v2532_v11, %v2502_v44  ;;  %v2181_v58 = vadd.f32 %v2180_v55, %v2092_v38  ;;  %v2095_v42 = vadd.f32 %v2094_v9, %v4477_v28 }
 0x2cc   : > { %v2269_v2 = vpop.f32.mrf.mxu3 }
 0x2cd   : > { %v2270_v37 = vadd.f32 %v2269_v2, %v2181_v58 }
 0x2cf   : > { %v2359_v53 = vadd.f32 %v2358_v45, %v2270_v37 }
 0x2d0   : > { %v2363_v30 = vpop.f32.mrf.mxu0 }
 0x2d1   : > { %v3153_v52 = vpack.c.bf16 %v2359_v53, %v2357_v56  ;;  %v2464_v63 = vadd.f32 %v2463_v24, %v2359_v53  ;;  %v2503_v13 = vmul.f32 %v2359_v53, %v2359_v53 }
 0x2d2   : > { %v2096_v62 = vpop.f32.mrf.mxu1  ;;  %v2183_v31 = vpop.f32.mrf.mxu2 }
 0x2d3   : > { %3196 = vst [vmem:[%s4269_s18 + $0x60] sm:$0xff] %v3153_v52   ;;  %v2534_v47 = vadd.f32 %v2533_v16, %v2503_v13  ;;  %v2184_v4 = vadd.f32 %v2183_v31, %v2095_v42  ;;  %v2097_v1 = vadd.f32 %v2096_v62, %v4236_v15 }
 0x2d4   : > { %v2272_v26 = vpop.f32.mrf.mxu3 }
 0x2d5   : > { %v2273_v35 = vadd.f32 %v2272_v26, %v2184_v4 }
 0x2d7   : > { %v2362_v5 = vadd.f32 %v2361_v17, %v2273_v35 }
 0x2d8   : > { %v2366_v12 = vpop.f32.mrf.mxu0 }
 0x2d9   : > { %v2465_v3 = vadd.f32 %v2464_v63, %v2362_v5  ;;  %v2504_v0 = vmul.f32 %v2362_v5, %v2362_v5 }
 0x2da   : > { %v2099_v25 = vpop.f32.mrf.mxu1  ;;  %v2185_v40 = vpop.f32.mrf.mxu2 }
 0x2db   : > { %v2535_v61 = vadd.f32 %v2534_v47, %v2504_v0  ;;  %v2186_v7 = vadd.f32 %v2185_v40, %v2097_v1  ;;  %v2100_v43 = vadd.f32 %v2099_v25, %v4240_v60 }
 0x2dc   : > { %v2274_v23 = vpop.f32.mrf.mxu3 }
 0x2dd   : > { %v2275_v51 = vadd.f32 %v2274_v23, %v2186_v7 }
 0x2df   : > { %v2364_v6 = vadd.f32 %v2363_v30, %v2275_v51 }
 0x2e0   : > { %v2368_v10 = vpop.f32.mrf.mxu0 }
 0x2e1   : > { %v3158_v29 = vpack.c.bf16 %v2364_v6, %v2362_v5  ;;  %v2466_v33 = vadd.f32 %v2465_v3, %v2364_v6  ;;  %v2505_v41 = vmul.f32 %v2364_v6, %v2364_v6 }
 0x2e2   : > { %v2188_v8 = vpop.f32.mrf.mxu2  ;;  %v2101_v21 = vpop.f32.mrf.mxu1 }
 0x2e3   : > { %3197 = vst [vmem:[%s4269_s18 + $0x68] sm:$0xff] %v3158_v29   ;;  %v2536_v59 = vadd.f32 %v2535_v61, %v2505_v41  ;;  %v2189_v54 = vadd.f32 %v2188_v8, %v2100_v43  ;;  %v2102_v57 = vadd.f32 %v2101_v21, %v4246_v49 }
 0x2e4   : > { %v2277_v48 = vpop.f32.mrf.mxu3 }
 0x2e5   : > { %v2278_v39 = vadd.f32 %v2277_v48, %v2189_v54 }
 0x2e7   : > { %v2367_v15 = vadd.f32 %v2366_v12, %v2278_v39 }
 0x2e8   : > { %v2371_v38 = vpop.f32.mrf.mxu0 }
 0x2e9   : > { %v2467_v14 = vadd.f32 %v2466_v33, %v2367_v15  ;;  %v2506_v46 = vmul.f32 %v2367_v15, %v2367_v15 }
 0x2ea   : > { %v2190_v32 = vpop.f32.mrf.mxu2  ;;  %v2104_v45 = vpop.f32.mrf.mxu1 }
 0x2eb   : > { %v2537_v18 = vadd.f32 %v2536_v59, %v2506_v46  ;;  %v2191_v50 = vadd.f32 %v2190_v32, %v2102_v57  ;;  %v2105_v9 = vadd.f32 %v2104_v45, %v4250_v34 }
 0x2ec   : > { %v2279_v36 = vpop.f32.mrf.mxu3 }
 0x2ed   : > { %v2280_v60 = vadd.f32 %v2279_v36, %v2191_v50 }
 0x2ef   : > { %v2369_v11 = vadd.f32 %v2368_v10, %v2280_v60 }
 0x2f0   : > { %v2373_v34 = vpop.f32.mrf.mxu0 }
 0x2f1   : > { %v3163_v22 = vpack.c.bf16 %v2369_v11, %v2367_v15  ;;  %v2468_v19 = vadd.f32 %v2467_v14, %v2369_v11  ;;  %v2507_v27 = vmul.f32 %v2369_v11, %v2369_v11 }
 0x2f2   : > { %v2193_v56 = vpop.f32.mrf.mxu2  ;;  %v2106_v16 = vpop.f32.mrf.mxu1 }
 0x2f3   : > { %3198 = vst [vmem:[%s4269_s18 + $0x70] sm:$0xff] %v3163_v22   ;;  %v2538_v24 = vadd.f32 %v2537_v18, %v2507_v27  ;;  %v2194_v44 = vadd.f32 %v2193_v56, %v2105_v9  ;;  %v2107_v37 = vadd.f32 %v2106_v16, %v4256_v20 }
 0x2f4   : > { %v2282_v55 = vpop.f32.mrf.mxu3 }
 0x2f5   : > { %v2283_v49 = vadd.f32 %v2282_v55, %v2194_v44 }
 0x2f7   : > { %v2372_v58 = vadd.f32 %v2371_v38, %v2283_v49 }
 0x2f9   : > { %v2469_v2 = vadd.f32 %v2468_v19, %v2372_v58  ;;  %v2508_v17 = vmul.f32 %v2372_v58, %v2372_v58 }
 0x2fa   : > { %v2195_v62 = vpop.f32.mrf.mxu2 }
 0x2fb   : > { %v2539_v53 = vadd.f32 %v2538_v24, %v2508_v17  ;;  %v2196_v52 = vadd.f32 %v2195_v62, %v2107_v37 }
 0x2fc   : > { %v2284_v63 = vpop.f32.mrf.mxu3 }
 0x2fd   : > { %v2285_v13 = vadd.f32 %v2284_v63, %v2196_v52 }
 0x2ff   : > { %v2374_v28 = vadd.f32 %v2373_v34, %v2285_v13 }
 0x301   : > { %v3168_v42 = vpack.c.bf16 %v2374_v28, %v2372_v58  ;;  %v2470_v31 = vadd.f32 %v2469_v2, %v2374_v28  ;;  %v2509_v47 = vmul.f32 %v2374_v28, %v2374_v28 }
 0x303   : > { %3199 = vst [vmem:[%s4269_s18 + $0x78] sm:$0xff] %v3168_v42   ;;  %v2471_v4 = vrot.slane %v2470_v31, 4  ;;  %v2540_v26 = vadd.f32 %v2539_v53, %v2509_v47 }
 0x305   : > { %v2472_v35 = vadd.f32 %v2471_v4, %v2470_v31  ;;  %v2541_v30 = vrot.slane %v2540_v26, 4 }
 0x307   : > { %v2473_v5 = vrot.slane %v2472_v35, 2  ;;  %v2542_v25 = vadd.f32 %v2541_v30, %v2540_v26 }
 0x309   : > { %v2474_v20 = vadd.f32 %v2473_v5, %v2472_v35  ;;  %v2543_v3 = vrot.slane %v2542_v25, 2 }
 0x30b   : > { %v2475_v0 = vrot.slane %v2474_v20, 1  ;;  %v2544_v1 = vadd.f32 %v2543_v3, %v2542_v25 }
 0x30d   : > { %v2476_v40 = vadd.f32 %v2475_v0, %v2474_v20  ;;  %v2545_v61 = vrot.slane %v2544_v1, 1 }
 0x30f   : > { %2477 = vst [vmem:[%s319_s20] sm:$0x1] %v2476_v40  ;;  %v2546_v7 = vadd.f32 %v2545_v61, %v2544_v1 }
 0x311   : > { %2547 = vst [vmem:[%s322_s24] sm:$0x1] %v2546_v7 }
 0x312 PF: > { %s19_s27 = sadd.s32 1, %s3242_s27  }
 0x313   : > { %p16_p4 = scmp.ge.s32.totalorder %s19_s27, 4  }
 0x315   :  { %18 = sbr.rel (!%p16_p4) target bundleno = 1 (0x1), region = 100 }

</bundles_post_ra>
